<compile_context>
chip_gen: v5e
topology: v5e:2x2
jax: 0.10.0
libtpu: 0.0.40
codegen_flags: <defaults>
</compile_context>

<pallas_src>
import functools

import jax
import jax.numpy as jnp
from jax.experimental import pallas as pl
from jax.experimental.pallas import tpu as pltpu


def _round_up(x, m):
    return ((x + m - 1) // m) * m


def _pad_gate_cols(w, h, hp):
    """Zero-pad each of the 4 gate blocks along the last axis: (..., 4h) -> (..., 4hp)."""
    if hp == h:
        return w
    lead = w.shape[:-1]
    w4 = w.reshape(lead + (4, h))
    pad = [(0, 0)] * len(lead) + [(0, 0), (0, hp - h)]
    return jnp.pad(w4, pad).reshape(lead + (4 * hp,))


def _pad_rows(w, h, hp):
    """Zero-pad the contraction (hidden) dim: (h, n) -> (hp, n)."""
    if hp == h:
        return w
    return jnp.pad(w, ((0, hp - h), (0, 0)))


# ----------------------------------------------------------------------------
# Fused encoder kernel: all layers + all time steps inside one pallas_call.
#   x_ref        : (T*Bp, E)        time-major embedded tokens (row = t*Bp + b)
#   wih0_ref     : (E, 4Hp)         layer-0 input weights (padded gate blocks)
#   wih_rest_ref : (max(L-1,1), Hp, 4Hp)   layer>=1 input weights
#   whh_ref      : (L, Hp, 4Hp)     recurrent weights
#   bias_ref     : (L, 1, 4Hp)      b_ih + b_hh
#   h_out_ref    : (L, Bp, Hp)      final hidden state per layer
#   c_out_ref    : (L, Bp, Hp)      final cell state per layer
#   gx_sc        : (T*Bp, 4Hp)      hoisted input-projection gates (VMEM)
#   seq_sc       : (T*Bp, Hp)       inter-layer sequence activations (VMEM)
# ----------------------------------------------------------------------------
def _encoder_kernel(x_ref, wih0_ref, wih_rest_ref, whh_ref, bias_ref,
                    h_out_ref, c_out_ref,
                    gx_sc, seq_sc,
                    *, T, Bp, Hp, L):

    def gate_math(gates):
        # gates: (Bp, 4Hp), lane-aligned slices (Hp multiple of 128).
        if_g = jax.nn.sigmoid(gates[:, 0:2 * Hp])       # i and f in one EUP pass
        i_g = if_g[:, :Hp]
        f_g = if_g[:, Hp:]
        g_g = jnp.tanh(gates[:, 2 * Hp:3 * Hp])
        o_g = jax.nn.sigmoid(gates[:, 3 * Hp:4 * Hp])
        return i_g, f_g, g_g, o_g

    for l in range(L):                      # static layer loop (L is small)
        if l == 0:
            src = x_ref[...]                # (T*Bp, E)
            wih = wih0_ref[...]             # (E, 4Hp)
        else:
            src = seq_sc[...]               # (T*Bp, Hp) previous layer's output
            wih = wih_rest_ref[l - 1]       # (Hp, 4Hp)

        # Hoisted input projection: one big, MXU-shaped matmul per layer.
        gx_sc[...] = (jnp.dot(src, wih, preferred_element_type=jnp.float32)
                      + bias_ref[l])

        whh = whh_ref[l]                    # (Hp, 4Hp), stays resident
        write_seq = (l + 1 < L)             # last layer's sequence is never needed

        # ---- peeled step t = 0 (h0 = c0 = 0: no recurrent matmul needed) ----
        gates0 = gx_sc[pl.ds(0, Bp), :]                 # (Bp, 4Hp)
        i0, f0, g0, o0 = gate_math(gates0)
        del f0                                          # f * c0 == 0
        c_cur = i0 * g0
        h_cur = o0 * jnp.tanh(c_cur)
        if write_seq:
            seq_sc[pl.ds(0, Bp), :] = h_cur

        # ---- steps t = 1 .. T-1, state carried in registers ----
        def step(t, carry, whh=whh, write_seq=write_seq):
            h_prev, c_prev = carry
            row = pl.multiple_of(t * Bp, Bp)            # sublane-aligned (Bp % 8 == 0)
            gx = gx_sc[pl.ds(row, Bp), :]               # (Bp, 4Hp)
            # Single MXU matmul on the serial path.
            gates = gx + jnp.dot(h_prev, whh, preferred_element_type=jnp.float32)
            i_g, f_g, g_g, o_g = gate_math(gates)
            c_new = f_g * c_prev + i_g * g_g
            h_new = o_g * jnp.tanh(c_new)
            if write_seq:
                seq_sc[pl.ds(row, Bp), :] = h_new       # stays in VMEM for next layer
            return (h_new, c_new)

        unroll = True if T <= 16 else 8
        h_fin, c_fin = jax.lax.fori_loop(1, T, step, (h_cur, c_cur), unroll=unroll)

        # Final states written exactly once per layer (dense, lane-aligned).
        h_out_ref[l] = h_fin
        c_out_ref[l] = c_fin


def _encoder_lstm(x2d, wih0, wih_rest, whh, bias, *, T, Bp, Hp, L):
    E = x2d.shape[1]
    G = 4 * Hp

    kernel = functools.partial(_encoder_kernel, T=T, Bp=Bp, Hp=Hp, L=L)

    # Explicit VMEM budget: inputs + outputs + scratch (x2 margin + 4 MiB).
    f32 = 4
    vmem_bytes = f32 * (x2d.size + wih0.size + wih_rest.size + whh.size + bias.size
                        + 2 * L * Bp * Hp                 # outputs
                        + T * Bp * G + T * Bp * Hp)       # scratch
    vmem_limit = int(min(max(2 * vmem_bytes + (4 << 20), 8 << 20), 64 << 20))

    grid_spec = pltpu.PrefetchScalarGridSpec(
        num_scalar_prefetch=0,
        grid=(1,),                                           # whole problem in one step
        in_specs=[
            pl.BlockSpec((T * Bp, E), lambda i: (0, 0)),     # embedded tokens
            pl.BlockSpec((E, G), lambda i: (0, 0)),          # W_ih layer 0
            pl.BlockSpec(wih_rest.shape, lambda i: (0, 0, 0)),  # W_ih layers >= 1
            pl.BlockSpec((L, Hp, G), lambda i: (0, 0, 0)),   # W_hh
            pl.BlockSpec((L, 1, G), lambda i: (0, 0, 0)),    # bias
        ],
        out_specs=[
            pl.BlockSpec((L, Bp, Hp), lambda i: (0, 0, 0)),  # hidden
            pl.BlockSpec((L, Bp, Hp), lambda i: (0, 0, 0)),  # cell
        ],
        scratch_shapes=[
            pltpu.VMEM((T * Bp, G), jnp.float32),    # hoisted input-projection gates
            pltpu.VMEM((T * Bp, Hp), jnp.float32),   # inter-layer activations (VMEM only)
        ],
    )

    out_shapes = (jax.ShapeDtypeStruct((L, Bp, Hp), jnp.float32),
                  jax.ShapeDtypeStruct((L, Bp, Hp), jnp.float32))

    return pl.pallas_call(
        kernel,
        out_shape=out_shapes,
        grid_spec=grid_spec,
        compiler_params=pltpu.CompilerParams(
            dimension_semantics=("arbitrary",),
            vmem_limit_bytes=vmem_limit),
    )(x2d, wih0, wih_rest, whh, bias)


# ----------------------------------------------------------------------------
# Encoder forward (embedding gather + weight packing in plain JAX, LSTM fused
# hot path in Pallas).
# ----------------------------------------------------------------------------
def encoder_forward(params, x_bt):
    """x_bt: (B, T) int32 token ids -> (hidden, cell), each (num_layers, B, H)."""
    emb_table = params["embedding"]
    B, T = x_bt.shape
    H = params["lstm"][0]["w_hh"].shape[0]
    L = len(params["lstm"])
    Bp = _round_up(B, 8)      # sublane padding
    Hp = _round_up(H, 128)    # lane padding (gate slices + dense stores)

    # Transpose only the tiny id matrix (not the activations), then gather the
    # embedding directly into a time-major (T*Bp, E) slab.
    # TODO(synk): the embedding gather stays in plain JAX; a data-dependent
    # gather of this size has no advantage as a Pallas kernel.
    x_tb = jnp.transpose(x_bt)                                 # (T, B) ids
    if Bp != B:
        x_tb = jnp.pad(x_tb, ((0, 0), (0, Bp - B)))            # pad with id 0
    ids = x_tb.reshape(-1)                                     # (T*Bp,)
    x2d = jnp.take(emb_table, ids, axis=0).astype(jnp.float32)  # (T*Bp, E)
    # Dropout: eval mode => identity (PyTorch dropout is a no-op at inference).

    # Pad/stack LSTM weights into lane-aligned layouts (per-gate zero padding).
    wih0 = _pad_gate_cols(params["lstm"][0]["w_ih"], H, Hp)    # (E, 4Hp)
    whh_list, bias_list, wih_rest_list = [], [], []
    for l, layer in enumerate(params["lstm"]):
        whh = _pad_gate_cols(_pad_rows(layer["w_hh"], H, Hp), H, Hp)  # (Hp, 4Hp)
        whh_list.append(whh)
        bias_list.append(_pad_gate_cols(layer["bias"], H, Hp))        # (1, 4Hp)
        if l > 0:
            wih = _pad_gate_cols(_pad_rows(layer["w_ih"], H, Hp), H, Hp)
            wih_rest_list.append(wih)
    whh_s = jnp.stack(whh_list)                                # (L, Hp, 4Hp)
    bias_s = jnp.stack(bias_list)                              # (L, 1, 4Hp)
    if L > 1:
        wih_rest = jnp.stack(wih_rest_list)                    # (L-1, Hp, 4Hp)
    else:
        wih_rest = jnp.zeros((1, Hp, 4 * Hp), jnp.float32)     # dummy, never read

    h_pad, c_pad = _encoder_lstm(x2d, wih0, wih_rest, whh_s, bias_s,
                                 T=T, Bp=Bp, Hp=Hp, L=L)
    # Strip batch/hidden padding.
    return h_pad[:, :B, :H], c_pad[:, :B, :H]


# ----------------------------------------------------------------------------
# Parameter init mimicking PyTorch defaults and a pure-JAX reference.
# ----------------------------------------------------------------------------
def init_params(key, input_dim, embed_dim, hidden_dim, num_layers):
    keys = jax.random.split(key, 1 + 4 * num_layers)
    params = {}
    params["embedding"] = jax.random.normal(
        keys[0], (input_dim, embed_dim), dtype=jnp.float32)   # N(0,1) like nn.Embedding

    k = 1.0 / jnp.sqrt(jnp.float32(hidden_dim))
    layers = []
    for l in range(num_layers):
        in_dim = embed_dim if l == 0 else hidden_dim
        kw = keys[1 + 4 * l: 1 + 4 * (l + 1)]
        w_ih = jax.random.uniform(kw[0], (in_dim, 4 * hidden_dim),
                                  minval=-k, maxval=k, dtype=jnp.float32)
        w_hh = jax.random.uniform(kw[1], (hidden_dim, 4 * hidden_dim),
                                  minval=-k, maxval=k, dtype=jnp.float32)
        b_ih = jax.random.uniform(kw[2], (4 * hidden_dim,),
                                  minval=-k, maxval=k, dtype=jnp.float32)
        b_hh = jax.random.uniform(kw[3], (4 * hidden_dim,),
                                  minval=-k, maxval=k, dtype=jnp.float32)
        layers.append({
            "w_ih": w_ih,
            "w_hh": w_hh,
            "bias": (b_ih + b_hh).reshape(1, 4 * hidden_dim),
        })
    params["lstm"] = layers
    return params


def _ref_encoder(params, x_bt):
    """Pure-JAX reference (same math, unpadded) for correctness checking."""
    emb = jnp.take(params["embedding"], x_bt, axis=0)          # (B, T, E)
    seq = jnp.transpose(emb, (1, 0, 2)).astype(jnp.float32)    # (T, B, E)
    B = x_bt.shape[0]
    hs, cs = [], []
    for layer in params["lstm"]:
        w_ih, w_hh, bias = layer["w_ih"], layer["w_hh"], layer["bias"]
        Hh = w_hh.shape[0]

        def step(carry, x_t, w_ih=w_ih, w_hh=w_hh, bias=bias, Hh=Hh):
            h, c = carry
            gates = (jnp.dot(x_t, w_ih, precision=jax.lax.Precision.HIGHEST)
                     + jnp.dot(h, w_hh, precision=jax.lax.Precision.HIGHEST)
                     + bias)
            i = jax.nn.sigmoid(gates[:, 0 * Hh:1 * Hh])
            f = jax.nn.sigmoid(gates[:, 1 * Hh:2 * Hh])
            g = jnp.tanh(gates[:, 2 * Hh:3 * Hh])
            o = jax.nn.sigmoid(gates[:, 3 * Hh:4 * Hh])
            c2 = f * c + i * g
            h2 = o * jnp.tanh(c2)
            return (h2, c2), h2

        init = (jnp.zeros((B, Hh), jnp.float32), jnp.zeros((B, Hh), jnp.float32))
        (hT, cT), outs = jax.lax.scan(step, init, seq)
        hs.append(hT)
        cs.append(cT)
        seq = outs
    return jnp.stack(hs), jnp.stack(cs)


if __name__ == "__main__":
    INPUT_DIM = 16     # vocab size
    EMBED_DIM = 32
    HIDDEN_DIM = 32
    NUM_LAYERS = 2
    B, T = 2, 8

    key = jax.random.PRNGKey(0)
    pkey, xkey = jax.random.split(key)
    params = init_params(pkey, INPUT_DIM, EMBED_DIM, HIDDEN_DIM, NUM_LAYERS)
    x = jax.random.randint(xkey, (B, T), 0, INPUT_DIM, dtype=jnp.int32)

    hidden, cell = jax.jit(functools.partial(encoder_forward, params))(x)
    jax.block_until_ready((hidden, cell))

    assert hidden.shape == (NUM_LAYERS, B, HIDDEN_DIM)
    assert cell.shape == (NUM_LAYERS, B, HIDDEN_DIM)

    ref_h, ref_c = jax.jit(functools.partial(_ref_encoder, params))(x)
    jax.block_until_ready((ref_h, ref_c))
    assert jnp.allclose(hidden, ref_h, atol=1e-3, rtol=1e-3), \
        float(jnp.max(jnp.abs(hidden - ref_h)))
    assert jnp.allclose(cell, ref_c, atol=1e-3, rtol=1e-3), \
        float(jnp.max(jnp.abs(cell - ref_c)))

    print("KERNEL_OK")
</pallas_src>

<mosaic_0001>
module attributes {stable_mosaic.version = 11 : i64} {
  func.func @_encoder_kernel(%arg0: i32, %arg1: memref<64x32xf32, #tpu.memory_space<vmem>>, %arg2: memref<32x512xf32, #tpu.memory_space<vmem>>, %arg3: memref<1x128x512xf32, #tpu.memory_space<vmem>>, %arg4: memref<2x128x512xf32, #tpu.memory_space<vmem>>, %arg5: memref<2x1x512xf32, #tpu.memory_space<vmem>>, %arg6: memref<2x8x128xf32, #tpu.memory_space<vmem>>, %arg7: memref<2x8x128xf32, #tpu.memory_space<vmem>>, %arg8: memref<64x512xf32, #tpu.memory_space<vmem>>, %arg9: memref<64x128xf32, #tpu.memory_space<vmem>>) attributes {dimension_semantics = [#tpu.dimension_semantics<arbitrary>], iteration_bounds = array<i64: 1>, scalar_prefetch = 0 : i64, scratch_operands = 2 : i64, tpu.core_type = #tpu.core_type<tc>, window_params = [{pipeline_mode = #tpu.pipeline_mode<synchronous>, transform_indices = @transform_0, window_bounds = array<i64: 64, 32>}, {pipeline_mode = #tpu.pipeline_mode<synchronous>, transform_indices = @transform_1, window_bounds = array<i64: 32, 512>}, {pipeline_mode = #tpu.pipeline_mode<synchronous>, transform_indices = @transform_2, window_bounds = array<i64: 1, 128, 512>}, {pipeline_mode = #tpu.pipeline_mode<synchronous>, transform_indices = @transform_3, window_bounds = array<i64: 2, 128, 512>}, {pipeline_mode = #tpu.pipeline_mode<synchronous>, transform_indices = @transform_4, window_bounds = array<i64: 2, 1, 512>}, {pipeline_mode = #tpu.pipeline_mode<synchronous>, transform_indices = @transform_5, window_bounds = array<i64: 2, 8, 128>}, {pipeline_mode = #tpu.pipeline_mode<synchronous>, transform_indices = @transform_6, window_bounds = array<i64: 2, 8, 128>}]} {
    %c0 = arith.constant 0 : index
    %c0_0 = arith.constant 0 : index
    %0 = vector.load %arg1[%c0, %c0_0] : memref<64x32xf32, #tpu.memory_space<vmem>>, vector<64x32xf32>
    %c0_1 = arith.constant 0 : index
    %c0_2 = arith.constant 0 : index
    %1 = vector.load %arg2[%c0_1, %c0_2] : memref<32x512xf32, #tpu.memory_space<vmem>>, vector<32x512xf32>
    %cst = arith.constant dense<0.000000e+00> : vector<64x512xf32>
    %2 = tpu.matmul %0, %1, %cst {dimension_numbers = #tpu.dot_dimension_numbers<[1], [0], [0], [1], [0, 0, 1, 1], [], []>} : vector<64x32xf32>, vector<32x512xf32>, vector<64x512xf32> -> vector<64x512xf32>
    %c0_3 = arith.constant 0 : index
    %c0_4 = arith.constant 0 : index
    %c0_5 = arith.constant 0 : index
    %3 = vector.load %arg5[%c0_3, %c0_4, %c0_5] : memref<2x1x512xf32, #tpu.memory_space<vmem>>, vector<1x1x512xf32>
    %4 = vector.shape_cast %3 : vector<1x1x512xf32> to vector<1x512xf32>
    %5 = vector.broadcast %4 : vector<1x512xf32> to vector<64x512xf32>
    %6 = arith.addf %2, %5 : vector<64x512xf32>
    %c0_6 = arith.constant 0 : index
    %c0_7 = arith.constant 0 : index
    %7 = vector.load %arg8[%c0_6, %c0_7] : memref<64x512xf32, #tpu.memory_space<vmem>>, vector<64x512xf32>
    tpu.vector_store %arg8[%c0_6, %c0_7], %6 {strides = array<i32>} : memref<64x512xf32, #tpu.memory_space<vmem>>, vector<64x512xf32>,
    %c0_8 = arith.constant 0 : index
    %c0_9 = arith.constant 0 : index
    %c0_10 = arith.constant 0 : index
    %8 = vector.load %arg4[%c0_8, %c0_9, %c0_10] : memref<2x128x512xf32, #tpu.memory_space<vmem>>, vector<1x128x512xf32>
    %9 = vector.shape_cast %8 : vector<1x128x512xf32> to vector<128x512xf32>
    %c0_11 = arith.constant 0 : index
    %c0_12 = arith.constant 0 : index
    %10 = vector.load %arg8[%c0_11, %c0_12] : memref<64x512xf32, #tpu.memory_space<vmem>>, vector<8x512xf32>
    %11 = vector.extract_strided_slice %10 {offsets = [0, 0], sizes = [8, 256], strides = [1, 1]} : vector<8x512xf32> to vector<8x256xf32>
    %12 = arith.negf %11 : vector<8x256xf32>
    %13 = math.exp %12 : vector<8x256xf32>
    %cst_13 = arith.constant 1.000000e+00 : f32
    %14 = vector.broadcast %cst_13 : f32 to vector<8x256xf32>
    %15 = arith.addf %14, %13 : vector<8x256xf32>
    %16 = arith.divf %14, %15 : vector<8x256xf32>
    %17 = vector.extract_strided_slice %16 {offsets = [0, 0], sizes = [8, 128], strides = [1, 1]} : vector<8x256xf32> to vector<8x128xf32>
    %18 = vector.extract_strided_slice %10 {offsets = [0, 256], sizes = [8, 128], strides = [1, 1]} : vector<8x512xf32> to vector<8x128xf32>
    %19 = math.tanh %18 : vector<8x128xf32>
    %20 = vector.extract_strided_slice %10 {offsets = [0, 384], sizes = [8, 128], strides = [1, 1]} : vector<8x512xf32> to vector<8x128xf32>
    %21 = arith.negf %20 : vector<8x128xf32>
    %22 = math.exp %21 : vector<8x128xf32>
    %cst_14 = arith.constant 1.000000e+00 : f32
    %23 = vector.broadcast %cst_14 : f32 to vector<8x128xf32>
    %24 = arith.addf %23, %22 : vector<8x128xf32>
    %25 = arith.divf %23, %24 : vector<8x128xf32>
    %26 = arith.mulf %17, %19 : vector<8x128xf32>
    %27 = math.tanh %26 : vector<8x128xf32>
    %28 = arith.mulf %25, %27 : vector<8x128xf32>
    %c0_15 = arith.constant 0 : index
    %c0_16 = arith.constant 0 : index
    %29 = vector.load %arg9[%c0_15, %c0_16] : memref<64x128xf32, #tpu.memory_space<vmem>>, vector<8x128xf32>
    tpu.vector_store %arg9[%c0_15, %c0_16], %28 {strides = array<i32>} : memref<64x128xf32, #tpu.memory_space<vmem>>, vector<8x128xf32>,
    %c1_i32 = arith.constant 1 : i32
    %c8_i32 = arith.constant 8 : i32
    %30 = arith.muli %c1_i32, %c8_i32 : i32
    %31 = tpu.assume_multiple %30, 8 : i32
    %32 = arith.index_cast %31 : i32 to index
    %c0_17 = arith.constant 0 : index
    %33 = vector.load %arg8[%32, %c0_17] : memref<64x512xf32, #tpu.memory_space<vmem>>, vector<8x512xf32>
    %cst_18 = arith.constant dense<0.000000e+00> : vector<8x512xf32>
    %34 = tpu.matmul %28, %9, %cst_18 {dimension_numbers = #tpu.dot_dimension_numbers<[1], [0], [0], [1], [0, 0, 1, 1], [], []>} : vector<8x128xf32>, vector<128x512xf32>, vector<8x512xf32> -> vector<8x512xf32>
    %35 = arith.addf %33, %34 : vector<8x512xf32>
    %36 = vector.extract_strided_slice %35 {offsets = [0, 0], sizes = [8, 256], strides = [1, 1]} : vector<8x512xf32> to vector<8x256xf32>
    %37 = arith.negf %36 : vector<8x256xf32>
    %38 = math.exp %37 : vector<8x256xf32>
    %cst_19 = arith.constant 1.000000e+00 : f32
    %39 = vector.broadcast %cst_19 : f32 to vector<8x256xf32>
    %40 = arith.addf %39, %38 : vector<8x256xf32>
    %41 = arith.divf %39, %40 : vector<8x256xf32>
    %42 = vector.extract_strided_slice %41 {offsets = [0, 0], sizes = [8, 128], strides = [1, 1]} : vector<8x256xf32> to vector<8x128xf32>
    %43 = vector.extract_strided_slice %41 {offsets = [0, 128], sizes = [8, 128], strides = [1, 1]} : vector<8x256xf32> to vector<8x128xf32>
    %44 = vector.extract_strided_slice %35 {offsets = [0, 256], sizes = [8, 128], strides = [1, 1]} : vector<8x512xf32> to vector<8x128xf32>
    %45 = math.tanh %44 : vector<8x128xf32>
    %46 = vector.extract_strided_slice %35 {offsets = [0, 384], sizes = [8, 128], strides = [1, 1]} : vector<8x512xf32> to vector<8x128xf32>
    %47 = arith.negf %46 : vector<8x128xf32>
    %48 = math.exp %47 : vector<8x128xf32>
    %cst_20 = arith.constant 1.000000e+00 : f32
    %49 = vector.broadcast %cst_20 : f32 to vector<8x128xf32>
    %50 = arith.addf %49, %48 : vector<8x128xf32>
    %51 = arith.divf %49, %50 : vector<8x128xf32>
    %52 = arith.mulf %43, %26 : vector<8x128xf32>
    %53 = arith.mulf %42, %45 : vector<8x128xf32>
    %54 = arith.addf %52, %53 : vector<8x128xf32>
    %55 = math.tanh %54 : vector<8x128xf32>
    %56 = arith.mulf %51, %55 : vector<8x128xf32>
    %57 = arith.index_cast %31 : i32 to index
    %c0_21 = arith.constant 0 : index
    %58 = vector.load %arg9[%57, %c0_21] : memref<64x128xf32, #tpu.memory_space<vmem>>, vector<8x128xf32>
    tpu.vector_store %arg9[%57, %c0_21], %56 {strides = array<i32>} : memref<64x128xf32, #tpu.memory_space<vmem>>, vector<8x128xf32>,
    %c2_i32 = arith.constant 2 : i32
    %c8_i32_22 = arith.constant 8 : i32
    %59 = arith.muli %c2_i32, %c8_i32_22 : i32
    %60 = tpu.assume_multiple %59, 8 : i32
    %61 = arith.index_cast %60 : i32 to index
    %c0_23 = arith.constant 0 : index
    %62 = vector.load %arg8[%61, %c0_23] : memref<64x512xf32, #tpu.memory_space<vmem>>, vector<8x512xf32>
    %cst_24 = arith.constant dense<0.000000e+00> : vector<8x512xf32>
    %63 = tpu.matmul %56, %9, %cst_24 {dimension_numbers = #tpu.dot_dimension_numbers<[1], [0], [0], [1], [0, 0, 1, 1], [], []>} : vector<8x128xf32>, vector<128x512xf32>, vector<8x512xf32> -> vector<8x512xf32>
    %64 = arith.addf %62, %63 : vector<8x512xf32>
    %65 = vector.extract_strided_slice %64 {offsets = [0, 0], sizes = [8, 256], strides = [1, 1]} : vector<8x512xf32> to vector<8x256xf32>
    %66 = arith.negf %65 : vector<8x256xf32>
    %67 = math.exp %66 : vector<8x256xf32>
    %cst_25 = arith.constant 1.000000e+00 : f32
    %68 = vector.broadcast %cst_25 : f32 to vector<8x256xf32>
    %69 = arith.addf %68, %67 : vector<8x256xf32>
    %70 = arith.divf %68, %69 : vector<8x256xf32>
    %71 = vector.extract_strided_slice %70 {offsets = [0, 0], sizes = [8, 128], strides = [1, 1]} : vector<8x256xf32> to vector<8x128xf32>
    %72 = vector.extract_strided_slice %70 {offsets = [0, 128], sizes = [8, 128], strides = [1, 1]} : vector<8x256xf32> to vector<8x128xf32>
    %73 = vector.extract_strided_slice %64 {offsets = [0, 256], sizes = [8, 128], strides = [1, 1]} : vector<8x512xf32> to vector<8x128xf32>
    %74 = math.tanh %73 : vector<8x128xf32>
    %75 = vector.extract_strided_slice %64 {offsets = [0, 384], sizes = [8, 128], strides = [1, 1]} : vector<8x512xf32> to vector<8x128xf32>
    %76 = arith.negf %75 : vector<8x128xf32>
    %77 = math.exp %76 : vector<8x128xf32>
    %cst_26 = arith.constant 1.000000e+00 : f32
    %78 = vector.broadcast %cst_26 : f32 to vector<8x128xf32>
    %79 = arith.addf %78, %77 : vector<8x128xf32>
    %80 = arith.divf %78, %79 : vector<8x128xf32>
    %81 = arith.mulf %72, %54 : vector<8x128xf32>
    %82 = arith.mulf %71, %74 : vector<8x128xf32>
    %83 = arith.addf %81, %82 : vector<8x128xf32>
    %84 = math.tanh %83 : vector<8x128xf32>
    %85 = arith.mulf %80, %84 : vector<8x128xf32>
    %86 = arith.index_cast %60 : i32 to index
    %c0_27 = arith.constant 0 : index
    %87 = vector.load %arg9[%86, %c0_27] : memref<64x128xf32, #tpu.memory_space<vmem>>, vector<8x128xf32>
    tpu.vector_store %arg9[%86, %c0_27], %85 {strides = array<i32>} : memref<64x128xf32, #tpu.memory_space<vmem>>, vector<8x128xf32>,
    %c3_i32 = arith.constant 3 : i32
    %c8_i32_28 = arith.constant 8 : i32
    %88 = arith.muli %c3_i32, %c8_i32_28 : i32
    %89 = tpu.assume_multiple %88, 8 : i32
    %90 = arith.index_cast %89 : i32 to index
    %c0_29 = arith.constant 0 : index
    %91 = vector.load %arg8[%90, %c0_29] : memref<64x512xf32, #tpu.memory_space<vmem>>, vector<8x512xf32>
    %cst_30 = arith.constant dense<0.000000e+00> : vector<8x512xf32>
    %92 = tpu.matmul %85, %9, %cst_30 {dimension_numbers = #tpu.dot_dimension_numbers<[1], [0], [0], [1], [0, 0, 1, 1], [], []>} : vector<8x128xf32>, vector<128x512xf32>, vector<8x512xf32> -> vector<8x512xf32>
    %93 = arith.addf %91, %92 : vector<8x512xf32>
    %94 = vector.extract_strided_slice %93 {offsets = [0, 0], sizes = [8, 256], strides = [1, 1]} : vector<8x512xf32> to vector<8x256xf32>
    %95 = arith.negf %94 : vector<8x256xf32>
    %96 = math.exp %95 : vector<8x256xf32>
    %cst_31 = arith.constant 1.000000e+00 : f32
    %97 = vector.broadcast %cst_31 : f32 to vector<8x256xf32>
    %98 = arith.addf %97, %96 : vector<8x256xf32>
    %99 = arith.divf %97, %98 : vector<8x256xf32>
    %100 = vector.extract_strided_slice %99 {offsets = [0, 0], sizes = [8, 128], strides = [1, 1]} : vector<8x256xf32> to vector<8x128xf32>
    %101 = vector.extract_strided_slice %99 {offsets = [0, 128], sizes = [8, 128], strides = [1, 1]} : vector<8x256xf32> to vector<8x128xf32>
    %102 = vector.extract_strided_slice %93 {offsets = [0, 256], sizes = [8, 128], strides = [1, 1]} : vector<8x512xf32> to vector<8x128xf32>
    %103 = math.tanh %102 : vector<8x128xf32>
    %104 = vector.extract_strided_slice %93 {offsets = [0, 384], sizes = [8, 128], strides = [1, 1]} : vector<8x512xf32> to vector<8x128xf32>
    %105 = arith.negf %104 : vector<8x128xf32>
    %106 = math.exp %105 : vector<8x128xf32>
    %cst_32 = arith.constant 1.000000e+00 : f32
    %107 = vector.broadcast %cst_32 : f32 to vector<8x128xf32>
    %108 = arith.addf %107, %106 : vector<8x128xf32>
    %109 = arith.divf %107, %108 : vector<8x128xf32>
    %110 = arith.mulf %101, %83 : vector<8x128xf32>
    %111 = arith.mulf %100, %103 : vector<8x128xf32>
    %112 = arith.addf %110, %111 : vector<8x128xf32>
    %113 = math.tanh %112 : vector<8x128xf32>
    %114 = arith.mulf %109, %113 : vector<8x128xf32>
    %115 = arith.index_cast %89 : i32 to index
    %c0_33 = arith.constant 0 : index
    %116 = vector.load %arg9[%115, %c0_33] : memref<64x128xf32, #tpu.memory_space<vmem>>, vector<8x128xf32>
    tpu.vector_store %arg9[%115, %c0_33], %114 {strides = array<i32>} : memref<64x128xf32, #tpu.memory_space<vmem>>, vector<8x128xf32>,
    %c4_i32 = arith.constant 4 : i32
    %c8_i32_34 = arith.constant 8 : i32
    %117 = arith.muli %c4_i32, %c8_i32_34 : i32
    %118 = tpu.assume_multiple %117, 8 : i32
    %119 = arith.index_cast %118 : i32 to index
    %c0_35 = arith.constant 0 : index
    %120 = vector.load %arg8[%119, %c0_35] : memref<64x512xf32, #tpu.memory_space<vmem>>, vector<8x512xf32>
    %cst_36 = arith.constant dense<0.000000e+00> : vector<8x512xf32>
    %121 = tpu.matmul %114, %9, %cst_36 {dimension_numbers = #tpu.dot_dimension_numbers<[1], [0], [0], [1], [0, 0, 1, 1], [], []>} : vector<8x128xf32>, vector<128x512xf32>, vector<8x512xf32> -> vector<8x512xf32>
    %122 = arith.addf %120, %121 : vector<8x512xf32>
    %123 = vector.extract_strided_slice %122 {offsets = [0, 0], sizes = [8, 256], strides = [1, 1]} : vector<8x512xf32> to vector<8x256xf32>
    %124 = arith.negf %123 : vector<8x256xf32>
    %125 = math.exp %124 : vector<8x256xf32>
    %cst_37 = arith.constant 1.000000e+00 : f32
    %126 = vector.broadcast %cst_37 : f32 to vector<8x256xf32>
    %127 = arith.addf %126, %125 : vector<8x256xf32>
    %128 = arith.divf %126, %127 : vector<8x256xf32>
    %129 = vector.extract_strided_slice %128 {offsets = [0, 0], sizes = [8, 128], strides = [1, 1]} : vector<8x256xf32> to vector<8x128xf32>
    %130 = vector.extract_strided_slice %128 {offsets = [0, 128], sizes = [8, 128], strides = [1, 1]} : vector<8x256xf32> to vector<8x128xf32>
    %131 = vector.extract_strided_slice %122 {offsets = [0, 256], sizes = [8, 128], strides = [1, 1]} : vector<8x512xf32> to vector<8x128xf32>
    %132 = math.tanh %131 : vector<8x128xf32>
    %133 = vector.extract_strided_slice %122 {offsets = [0, 384], sizes = [8, 128], strides = [1, 1]} : vector<8x512xf32> to vector<8x128xf32>
    %134 = arith.negf %133 : vector<8x128xf32>
    %135 = math.exp %134 : vector<8x128xf32>
    %cst_38 = arith.constant 1.000000e+00 : f32
    %136 = vector.broadcast %cst_38 : f32 to vector<8x128xf32>
    %137 = arith.addf %136, %135 : vector<8x128xf32>
    %138 = arith.divf %136, %137 : vector<8x128xf32>
    %139 = arith.mulf %130, %112 : vector<8x128xf32>
    %140 = arith.mulf %129, %132 : vector<8x128xf32>
    %141 = arith.addf %139, %140 : vector<8x128xf32>
    %142 = math.tanh %141 : vector<8x128xf32>
    %143 = arith.mulf %138, %142 : vector<8x128xf32>
    %144 = arith.index_cast %118 : i32 to index
    %c0_39 = arith.constant 0 : index
    %145 = vector.load %arg9[%144, %c0_39] : memref<64x128xf32, #tpu.memory_space<vmem>>, vector<8x128xf32>
    tpu.vector_store %arg9[%144, %c0_39], %143 {strides = array<i32>} : memref<64x128xf32, #tpu.memory_space<vmem>>, vector<8x128xf32>,
    %c5_i32 = arith.constant 5 : i32
    %c8_i32_40 = arith.constant 8 : i32
    %146 = arith.muli %c5_i32, %c8_i32_40 : i32
    %147 = tpu.assume_multiple %146, 8 : i32
    %148 = arith.index_cast %147 : i32 to index
    %c0_41 = arith.constant 0 : index
    %149 = vector.load %arg8[%148, %c0_41] : memref<64x512xf32, #tpu.memory_space<vmem>>, vector<8x512xf32>
    %cst_42 = arith.constant dense<0.000000e+00> : vector<8x512xf32>
    %150 = tpu.matmul %143, %9, %cst_42 {dimension_numbers = #tpu.dot_dimension_numbers<[1], [0], [0], [1], [0, 0, 1, 1], [], []>} : vector<8x128xf32>, vector<128x512xf32>, vector<8x512xf32> -> vector<8x512xf32>
    %151 = arith.addf %149, %150 : vector<8x512xf32>
    %152 = vector.extract_strided_slice %151 {offsets = [0, 0], sizes = [8, 256], strides = [1, 1]} : vector<8x512xf32> to vector<8x256xf32>
    %153 = arith.negf %152 : vector<8x256xf32>
    %154 = math.exp %153 : vector<8x256xf32>
    %cst_43 = arith.constant 1.000000e+00 : f32
    %155 = vector.broadcast %cst_43 : f32 to vector<8x256xf32>
    %156 = arith.addf %155, %154 : vector<8x256xf32>
    %157 = arith.divf %155, %156 : vector<8x256xf32>
    %158 = vector.extract_strided_slice %157 {offsets = [0, 0], sizes = [8, 128], strides = [1, 1]} : vector<8x256xf32> to vector<8x128xf32>
    %159 = vector.extract_strided_slice %157 {offsets = [0, 128], sizes = [8, 128], strides = [1, 1]} : vector<8x256xf32> to vector<8x128xf32>
    %160 = vector.extract_strided_slice %151 {offsets = [0, 256], sizes = [8, 128], strides = [1, 1]} : vector<8x512xf32> to vector<8x128xf32>
    %161 = math.tanh %160 : vector<8x128xf32>
    %162 = vector.extract_strided_slice %151 {offsets = [0, 384], sizes = [8, 128], strides = [1, 1]} : vector<8x512xf32> to vector<8x128xf32>
    %163 = arith.negf %162 : vector<8x128xf32>
    %164 = math.exp %163 : vector<8x128xf32>
    %cst_44 = arith.constant 1.000000e+00 : f32
    %165 = vector.broadcast %cst_44 : f32 to vector<8x128xf32>
    %166 = arith.addf %165, %164 : vector<8x128xf32>
    %167 = arith.divf %165, %166 : vector<8x128xf32>
    %168 = arith.mulf %159, %141 : vector<8x128xf32>
    %169 = arith.mulf %158, %161 : vector<8x128xf32>
    %170 = arith.addf %168, %169 : vector<8x128xf32>
    %171 = math.tanh %170 : vector<8x128xf32>
    %172 = arith.mulf %167, %171 : vector<8x128xf32>
    %173 = arith.index_cast %147 : i32 to index
    %c0_45 = arith.constant 0 : index
    %174 = vector.load %arg9[%173, %c0_45] : memref<64x128xf32, #tpu.memory_space<vmem>>, vector<8x128xf32>
    tpu.vector_store %arg9[%173, %c0_45], %172 {strides = array<i32>} : memref<64x128xf32, #tpu.memory_space<vmem>>, vector<8x128xf32>,
    %c6_i32 = arith.constant 6 : i32
    %c8_i32_46 = arith.constant 8 : i32
    %175 = arith.muli %c6_i32, %c8_i32_46 : i32
    %176 = tpu.assume_multiple %175, 8 : i32
    %177 = arith.index_cast %176 : i32 to index
    %c0_47 = arith.constant 0 : index
    %178 = vector.load %arg8[%177, %c0_47] : memref<64x512xf32, #tpu.memory_space<vmem>>, vector<8x512xf32>
    %cst_48 = arith.constant dense<0.000000e+00> : vector<8x512xf32>
    %179 = tpu.matmul %172, %9, %cst_48 {dimension_numbers = #tpu.dot_dimension_numbers<[1], [0], [0], [1], [0, 0, 1, 1], [], []>} : vector<8x128xf32>, vector<128x512xf32>, vector<8x512xf32> -> vector<8x512xf32>
    %180 = arith.addf %178, %179 : vector<8x512xf32>
    %181 = vector.extract_strided_slice %180 {offsets = [0, 0], sizes = [8, 256], strides = [1, 1]} : vector<8x512xf32> to vector<8x256xf32>
    %182 = arith.negf %181 : vector<8x256xf32>
    %183 = math.exp %182 : vector<8x256xf32>
    %cst_49 = arith.constant 1.000000e+00 : f32
    %184 = vector.broadcast %cst_49 : f32 to vector<8x256xf32>
    %185 = arith.addf %184, %183 : vector<8x256xf32>
    %186 = arith.divf %184, %185 : vector<8x256xf32>
    %187 = vector.extract_strided_slice %186 {offsets = [0, 0], sizes = [8, 128], strides = [1, 1]} : vector<8x256xf32> to vector<8x128xf32>
    %188 = vector.extract_strided_slice %186 {offsets = [0, 128], sizes = [8, 128], strides = [1, 1]} : vector<8x256xf32> to vector<8x128xf32>
    %189 = vector.extract_strided_slice %180 {offsets = [0, 256], sizes = [8, 128], strides = [1, 1]} : vector<8x512xf32> to vector<8x128xf32>
    %190 = math.tanh %189 : vector<8x128xf32>
    %191 = vector.extract_strided_slice %180 {offsets = [0, 384], sizes = [8, 128], strides = [1, 1]} : vector<8x512xf32> to vector<8x128xf32>
    %192 = arith.negf %191 : vector<8x128xf32>
    %193 = math.exp %192 : vector<8x128xf32>
    %cst_50 = arith.constant 1.000000e+00 : f32
    %194 = vector.broadcast %cst_50 : f32 to vector<8x128xf32>
    %195 = arith.addf %194, %193 : vector<8x128xf32>
    %196 = arith.divf %194, %195 : vector<8x128xf32>
    %197 = arith.mulf %188, %170 : vector<8x128xf32>
    %198 = arith.mulf %187, %190 : vector<8x128xf32>
    %199 = arith.addf %197, %198 : vector<8x128xf32>
    %200 = math.tanh %199 : vector<8x128xf32>
    %201 = arith.mulf %196, %200 : vector<8x128xf32>
    %202 = arith.index_cast %176 : i32 to index
    %c0_51 = arith.constant 0 : index
    %203 = vector.load %arg9[%202, %c0_51] : memref<64x128xf32, #tpu.memory_space<vmem>>, vector<8x128xf32>
    tpu.vector_store %arg9[%202, %c0_51], %201 {strides = array<i32>} : memref<64x128xf32, #tpu.memory_space<vmem>>, vector<8x128xf32>,
    %c7_i32 = arith.constant 7 : i32
    %c8_i32_52 = arith.constant 8 : i32
    %204 = arith.muli %c7_i32, %c8_i32_52 : i32
    %205 = tpu.assume_multiple %204, 8 : i32
    %206 = arith.index_cast %205 : i32 to index
    %c0_53 = arith.constant 0 : index
    %207 = vector.load %arg8[%206, %c0_53] : memref<64x512xf32, #tpu.memory_space<vmem>>, vector<8x512xf32>
    %cst_54 = arith.constant dense<0.000000e+00> : vector<8x512xf32>
    %208 = tpu.matmul %201, %9, %cst_54 {dimension_numbers = #tpu.dot_dimension_numbers<[1], [0], [0], [1], [0, 0, 1, 1], [], []>} : vector<8x128xf32>, vector<128x512xf32>, vector<8x512xf32> -> vector<8x512xf32>
    %209 = arith.addf %207, %208 : vector<8x512xf32>
    %210 = vector.extract_strided_slice %209 {offsets = [0, 0], sizes = [8, 256], strides = [1, 1]} : vector<8x512xf32> to vector<8x256xf32>
    %211 = arith.negf %210 : vector<8x256xf32>
    %212 = math.exp %211 : vector<8x256xf32>
    %cst_55 = arith.constant 1.000000e+00 : f32
    %213 = vector.broadcast %cst_55 : f32 to vector<8x256xf32>
    %214 = arith.addf %213, %212 : vector<8x256xf32>
    %215 = arith.divf %213, %214 : vector<8x256xf32>
    %216 = vector.extract_strided_slice %215 {offsets = [0, 0], sizes = [8, 128], strides = [1, 1]} : vector<8x256xf32> to vector<8x128xf32>
    %217 = vector.extract_strided_slice %215 {offsets = [0, 128], sizes = [8, 128], strides = [1, 1]} : vector<8x256xf32> to vector<8x128xf32>
    %218 = vector.extract_strided_slice %209 {offsets = [0, 256], sizes = [8, 128], strides = [1, 1]} : vector<8x512xf32> to vector<8x128xf32>
    %219 = math.tanh %218 : vector<8x128xf32>
    %220 = vector.extract_strided_slice %209 {offsets = [0, 384], sizes = [8, 128], strides = [1, 1]} : vector<8x512xf32> to vector<8x128xf32>
    %221 = arith.negf %220 : vector<8x128xf32>
    %222 = math.exp %221 : vector<8x128xf32>
    %cst_56 = arith.constant 1.000000e+00 : f32
    %223 = vector.broadcast %cst_56 : f32 to vector<8x128xf32>
    %224 = arith.addf %223, %222 : vector<8x128xf32>
    %225 = arith.divf %223, %224 : vector<8x128xf32>
    %226 = arith.mulf %217, %199 : vector<8x128xf32>
    %227 = arith.mulf %216, %219 : vector<8x128xf32>
    %228 = arith.addf %226, %227 : vector<8x128xf32>
    %229 = math.tanh %228 : vector<8x128xf32>
    %230 = arith.mulf %225, %229 : vector<8x128xf32>
    %231 = arith.index_cast %205 : i32 to index
    %c0_57 = arith.constant 0 : index
    %232 = vector.load %arg9[%231, %c0_57] : memref<64x128xf32, #tpu.memory_space<vmem>>, vector<8x128xf32>
    tpu.vector_store %arg9[%231, %c0_57], %230 {strides = array<i32>} : memref<64x128xf32, #tpu.memory_space<vmem>>, vector<8x128xf32>,
    %c7_i32_58 = arith.constant 7 : i32
    %c0_59 = arith.constant 0 : index
    %c0_60 = arith.constant 0 : index
    %c0_61 = arith.constant 0 : index
    %233 = vector.load %arg6[%c0_59, %c0_60, %c0_61] : memref<2x8x128xf32, #tpu.memory_space<vmem>>, vector<1x8x128xf32>
    %234 = vector.shape_cast %233 : vector<1x8x128xf32> to vector<8x128xf32>
    %235 = vector.shape_cast %230 : vector<8x128xf32> to vector<1x8x128xf32>
    tpu.vector_store %arg6[%c0_59, %c0_60, %c0_61], %235 {strides = array<i32>} : memref<2x8x128xf32, #tpu.memory_space<vmem>>, vector<1x8x128xf32>,
    %c0_62 = arith.constant 0 : index
    %c0_63 = arith.constant 0 : index
    %c0_64 = arith.constant 0 : index
    %236 = vector.load %arg7[%c0_62, %c0_63, %c0_64] : memref<2x8x128xf32, #tpu.memory_space<vmem>>, vector<1x8x128xf32>
    %237 = vector.shape_cast %236 : vector<1x8x128xf32> to vector<8x128xf32>
    %238 = vector.shape_cast %228 : vector<8x128xf32> to vector<1x8x128xf32>
    tpu.vector_store %arg7[%c0_62, %c0_63, %c0_64], %238 {strides = array<i32>} : memref<2x8x128xf32, #tpu.memory_space<vmem>>, vector<1x8x128xf32>,
    %c0_65 = arith.constant 0 : index
    %c0_66 = arith.constant 0 : index
    %239 = vector.load %arg9[%c0_65, %c0_66] : memref<64x128xf32, #tpu.memory_space<vmem>>, vector<64x128xf32>
    %c0_67 = arith.constant 0 : index
    %c0_68 = arith.constant 0 : index
    %c0_69 = arith.constant 0 : index
    %240 = vector.load %arg3[%c0_67, %c0_68, %c0_69] : memref<1x128x512xf32, #tpu.memory_space<vmem>>, vector<1x128x512xf32>
    %241 = vector.shape_cast %240 : vector<1x128x512xf32> to vector<128x512xf32>
    %cst_70 = arith.constant dense<0.000000e+00> : vector<64x512xf32>
    %242 = tpu.matmul %239, %241, %cst_70 {dimension_numbers = #tpu.dot_dimension_numbers<[1], [0], [0], [1], [0, 0, 1, 1], [], []>} : vector<64x128xf32>, vector<128x512xf32>, vector<64x512xf32> -> vector<64x512xf32>
    %c1 = arith.constant 1 : index
    %c0_71 = arith.constant 0 : index
    %c0_72 = arith.constant 0 : index
    %243 = vector.load %arg5[%c1, %c0_71, %c0_72] : memref<2x1x512xf32, #tpu.memory_space<vmem>>, vector<1x1x512xf32>
    %244 = vector.shape_cast %243 : vector<1x1x512xf32> to vector<1x512xf32>
    %245 = vector.broadcast %244 : vector<1x512xf32> to vector<64x512xf32>
    %246 = arith.addf %242, %245 : vector<64x512xf32>
    %c0_73 = arith.constant 0 : index
    %c0_74 = arith.constant 0 : index
    %247 = vector.load %arg8[%c0_73, %c0_74] : memref<64x512xf32, #tpu.memory_space<vmem>>, vector<64x512xf32>
    tpu.vector_store %arg8[%c0_73, %c0_74], %246 {strides = array<i32>} : memref<64x512xf32, #tpu.memory_space<vmem>>, vector<64x512xf32>,
    %c1_75 = arith.constant 1 : index
    %c0_76 = arith.constant 0 : index
    %c0_77 = arith.constant 0 : index
    %248 = vector.load %arg4[%c1_75, %c0_76, %c0_77] : memref<2x128x512xf32, #tpu.memory_space<vmem>>, vector<1x128x512xf32>
    %249 = vector.shape_cast %248 : vector<1x128x512xf32> to vector<128x512xf32>
    %c0_78 = arith.constant 0 : index
    %c0_79 = arith.constant 0 : index
    %250 = vector.load %arg8[%c0_78, %c0_79] : memref<64x512xf32, #tpu.memory_space<vmem>>, vector<8x512xf32>
    %251 = vector.extract_strided_slice %250 {offsets = [0, 0], sizes = [8, 256], strides = [1, 1]} : vector<8x512xf32> to vector<8x256xf32>
    %252 = arith.negf %251 : vector<8x256xf32>
    %253 = math.exp %252 : vector<8x256xf32>
    %cst_80 = arith.constant 1.000000e+00 : f32
    %254 = vector.broadcast %cst_80 : f32 to vector<8x256xf32>
    %255 = arith.addf %254, %253 : vector<8x256xf32>
    %256 = arith.divf %254, %255 : vector<8x256xf32>
    %257 = vector.extract_strided_slice %256 {offsets = [0, 0], sizes = [8, 128], strides = [1, 1]} : vector<8x256xf32> to vector<8x128xf32>
    %258 = vector.extract_strided_slice %250 {offsets = [0, 256], sizes = [8, 128], strides = [1, 1]} : vector<8x512xf32> to vector<8x128xf32>
    %259 = math.tanh %258 : vector<8x128xf32>
    %260 = vector.extract_strided_slice %250 {offsets = [0, 384], sizes = [8, 128], strides = [1, 1]} : vector<8x512xf32> to vector<8x128xf32>
    %261 = arith.negf %260 : vector<8x128xf32>
    %262 = math.exp %261 : vector<8x128xf32>
    %cst_81 = arith.constant 1.000000e+00 : f32
    %263 = vector.broadcast %cst_81 : f32 to vector<8x128xf32>
    %264 = arith.addf %263, %262 : vector<8x128xf32>
    %265 = arith.divf %263, %264 : vector<8x128xf32>
    %266 = arith.mulf %257, %259 : vector<8x128xf32>
    %267 = math.tanh %266 : vector<8x128xf32>
    %268 = arith.mulf %265, %267 : vector<8x128xf32>
    %c1_i32_82 = arith.constant 1 : i32
    %c8_i32_83 = arith.constant 8 : i32
    %269 = arith.muli %c1_i32_82, %c8_i32_83 : i32
    %270 = tpu.assume_multiple %269, 8 : i32
    %271 = arith.index_cast %270 : i32 to index
    %c0_84 = arith.constant 0 : index
    %272 = vector.load %arg8[%271, %c0_84] : memref<64x512xf32, #tpu.memory_space<vmem>>, vector<8x512xf32>
    %cst_85 = arith.constant dense<0.000000e+00> : vector<8x512xf32>
    %273 = tpu.matmul %268, %249, %cst_85 {dimension_numbers = #tpu.dot_dimension_numbers<[1], [0], [0], [1], [0, 0, 1, 1], [], []>} : vector<8x128xf32>, vector<128x512xf32>, vector<8x512xf32> -> vector<8x512xf32>
    %274 = arith.addf %272, %273 : vector<8x512xf32>
    %275 = vector.extract_strided_slice %274 {offsets = [0, 0], sizes = [8, 256], strides = [1, 1]} : vector<8x512xf32> to vector<8x256xf32>
    %276 = arith.negf %275 : vector<8x256xf32>
    %277 = math.exp %276 : vector<8x256xf32>
    %cst_86 = arith.constant 1.000000e+00 : f32
    %278 = vector.broadcast %cst_86 : f32 to vector<8x256xf32>
    %279 = arith.addf %278, %277 : vector<8x256xf32>
    %280 = arith.divf %278, %279 : vector<8x256xf32>
    %281 = vector.extract_strided_slice %280 {offsets = [0, 0], sizes = [8, 128], strides = [1, 1]} : vector<8x256xf32> to vector<8x128xf32>
    %282 = vector.extract_strided_slice %280 {offsets = [0, 128], sizes = [8, 128], strides = [1, 1]} : vector<8x256xf32> to vector<8x128xf32>
    %283 = vector.extract_strided_slice %274 {offsets = [0, 256], sizes = [8, 128], strides = [1, 1]} : vector<8x512xf32> to vector<8x128xf32>
    %284 = math.tanh %283 : vector<8x128xf32>
    %285 = vector.extract_strided_slice %274 {offsets = [0, 384], sizes = [8, 128], strides = [1, 1]} : vector<8x512xf32> to vector<8x128xf32>
    %286 = arith.negf %285 : vector<8x128xf32>
    %287 = math.exp %286 : vector<8x128xf32>
    %cst_87 = arith.constant 1.000000e+00 : f32
    %288 = vector.broadcast %cst_87 : f32 to vector<8x128xf32>
    %289 = arith.addf %288, %287 : vector<8x128xf32>
    %290 = arith.divf %288, %289 : vector<8x128xf32>
    %291 = arith.mulf %282, %266 : vector<8x128xf32>
    %292 = arith.mulf %281, %284 : vector<8x128xf32>
    %293 = arith.addf %291, %292 : vector<8x128xf32>
    %294 = math.tanh %293 : vector<8x128xf32>
    %295 = arith.mulf %290, %294 : vector<8x128xf32>
    %c2_i32_88 = arith.constant 2 : i32
    %c8_i32_89 = arith.constant 8 : i32
    %296 = arith.muli %c2_i32_88, %c8_i32_89 : i32
    %297 = tpu.assume_multiple %296, 8 : i32
    %298 = arith.index_cast %297 : i32 to index
    %c0_90 = arith.constant 0 : index
    %299 = vector.load %arg8[%298, %c0_90] : memref<64x512xf32, #tpu.memory_space<vmem>>, vector<8x512xf32>
    %cst_91 = arith.constant dense<0.000000e+00> : vector<8x512xf32>
    %300 = tpu.matmul %295, %249, %cst_91 {dimension_numbers = #tpu.dot_dimension_numbers<[1], [0], [0], [1], [0, 0, 1, 1], [], []>} : vector<8x128xf32>, vector<128x512xf32>, vector<8x512xf32> -> vector<8x512xf32>
    %301 = arith.addf %299, %300 : vector<8x512xf32>
    %302 = vector.extract_strided_slice %301 {offsets = [0, 0], sizes = [8, 256], strides = [1, 1]} : vector<8x512xf32> to vector<8x256xf32>
    %303 = arith.negf %302 : vector<8x256xf32>
    %304 = math.exp %303 : vector<8x256xf32>
    %cst_92 = arith.constant 1.000000e+00 : f32
    %305 = vector.broadcast %cst_92 : f32 to vector<8x256xf32>
    %306 = arith.addf %305, %304 : vector<8x256xf32>
    %307 = arith.divf %305, %306 : vector<8x256xf32>
    %308 = vector.extract_strided_slice %307 {offsets = [0, 0], sizes = [8, 128], strides = [1, 1]} : vector<8x256xf32> to vector<8x128xf32>
    %309 = vector.extract_strided_slice %307 {offsets = [0, 128], sizes = [8, 128], strides = [1, 1]} : vector<8x256xf32> to vector<8x128xf32>
    %310 = vector.extract_strided_slice %301 {offsets = [0, 256], sizes = [8, 128], strides = [1, 1]} : vector<8x512xf32> to vector<8x128xf32>
    %311 = math.tanh %310 : vector<8x128xf32>
    %312 = vector.extract_strided_slice %301 {offsets = [0, 384], sizes = [8, 128], strides = [1, 1]} : vector<8x512xf32> to vector<8x128xf32>
    %313 = arith.negf %312 : vector<8x128xf32>
    %314 = math.exp %313 : vector<8x128xf32>
    %cst_93 = arith.constant 1.000000e+00 : f32
    %315 = vector.broadcast %cst_93 : f32 to vector<8x128xf32>
    %316 = arith.addf %315, %314 : vector<8x128xf32>
    %317 = arith.divf %315, %316 : vector<8x128xf32>
    %318 = arith.mulf %309, %293 : vector<8x128xf32>
    %319 = arith.mulf %308, %311 : vector<8x128xf32>
    %320 = arith.addf %318, %319 : vector<8x128xf32>
    %321 = math.tanh %320 : vector<8x128xf32>
    %322 = arith.mulf %317, %321 : vector<8x128xf32>
    %c3_i32_94 = arith.constant 3 : i32
    %c8_i32_95 = arith.constant 8 : i32
    %323 = arith.muli %c3_i32_94, %c8_i32_95 : i32
    %324 = tpu.assume_multiple %323, 8 : i32
    %325 = arith.index_cast %324 : i32 to index
    %c0_96 = arith.constant 0 : index
    %326 = vector.load %arg8[%325, %c0_96] : memref<64x512xf32, #tpu.memory_space<vmem>>, vector<8x512xf32>
    %cst_97 = arith.constant dense<0.000000e+00> : vector<8x512xf32>
    %327 = tpu.matmul %322, %249, %cst_97 {dimension_numbers = #tpu.dot_dimension_numbers<[1], [0], [0], [1], [0, 0, 1, 1], [], []>} : vector<8x128xf32>, vector<128x512xf32>, vector<8x512xf32> -> vector<8x512xf32>
    %328 = arith.addf %326, %327 : vector<8x512xf32>
    %329 = vector.extract_strided_slice %328 {offsets = [0, 0], sizes = [8, 256], strides = [1, 1]} : vector<8x512xf32> to vector<8x256xf32>
    %330 = arith.negf %329 : vector<8x256xf32>
    %331 = math.exp %330 : vector<8x256xf32>
    %cst_98 = arith.constant 1.000000e+00 : f32
    %332 = vector.broadcast %cst_98 : f32 to vector<8x256xf32>
    %333 = arith.addf %332, %331 : vector<8x256xf32>
    %334 = arith.divf %332, %333 : vector<8x256xf32>
    %335 = vector.extract_strided_slice %334 {offsets = [0, 0], sizes = [8, 128], strides = [1, 1]} : vector<8x256xf32> to vector<8x128xf32>
    %336 = vector.extract_strided_slice %334 {offsets = [0, 128], sizes = [8, 128], strides = [1, 1]} : vector<8x256xf32> to vector<8x128xf32>
    %337 = vector.extract_strided_slice %328 {offsets = [0, 256], sizes = [8, 128], strides = [1, 1]} : vector<8x512xf32> to vector<8x128xf32>
    %338 = math.tanh %337 : vector<8x128xf32>
    %339 = vector.extract_strided_slice %328 {offsets = [0, 384], sizes = [8, 128], strides = [1, 1]} : vector<8x512xf32> to vector<8x128xf32>
    %340 = arith.negf %339 : vector<8x128xf32>
    %341 = math.exp %340 : vector<8x128xf32>
    %cst_99 = arith.constant 1.000000e+00 : f32
    %342 = vector.broadcast %cst_99 : f32 to vector<8x128xf32>
    %343 = arith.addf %342, %341 : vector<8x128xf32>
    %344 = arith.divf %342, %343 : vector<8x128xf32>
    %345 = arith.mulf %336, %320 : vector<8x128xf32>
    %346 = arith.mulf %335, %338 : vector<8x128xf32>
    %347 = arith.addf %345, %346 : vector<8x128xf32>
    %348 = math.tanh %347 : vector<8x128xf32>
    %349 = arith.mulf %344, %348 : vector<8x128xf32>
    %c4_i32_100 = arith.constant 4 : i32
    %c8_i32_101 = arith.constant 8 : i32
    %350 = arith.muli %c4_i32_100, %c8_i32_101 : i32
    %351 = tpu.assume_multiple %350, 8 : i32
    %352 = arith.index_cast %351 : i32 to index
    %c0_102 = arith.constant 0 : index
    %353 = vector.load %arg8[%352, %c0_102] : memref<64x512xf32, #tpu.memory_space<vmem>>, vector<8x512xf32>
    %cst_103 = arith.constant dense<0.000000e+00> : vector<8x512xf32>
    %354 = tpu.matmul %349, %249, %cst_103 {dimension_numbers = #tpu.dot_dimension_numbers<[1], [0], [0], [1], [0, 0, 1, 1], [], []>} : vector<8x128xf32>, vector<128x512xf32>, vector<8x512xf32> -> vector<8x512xf32>
    %355 = arith.addf %353, %354 : vector<8x512xf32>
    %356 = vector.extract_strided_slice %355 {offsets = [0, 0], sizes = [8, 256], strides = [1, 1]} : vector<8x512xf32> to vector<8x256xf32>
    %357 = arith.negf %356 : vector<8x256xf32>
    %358 = math.exp %357 : vector<8x256xf32>
    %cst_104 = arith.constant 1.000000e+00 : f32
    %359 = vector.broadcast %cst_104 : f32 to vector<8x256xf32>
    %360 = arith.addf %359, %358 : vector<8x256xf32>
    %361 = arith.divf %359, %360 : vector<8x256xf32>
    %362 = vector.extract_strided_slice %361 {offsets = [0, 0], sizes = [8, 128], strides = [1, 1]} : vector<8x256xf32> to vector<8x128xf32>
    %363 = vector.extract_strided_slice %361 {offsets = [0, 128], sizes = [8, 128], strides = [1, 1]} : vector<8x256xf32> to vector<8x128xf32>
    %364 = vector.extract_strided_slice %355 {offsets = [0, 256], sizes = [8, 128], strides = [1, 1]} : vector<8x512xf32> to vector<8x128xf32>
    %365 = math.tanh %364 : vector<8x128xf32>
    %366 = vector.extract_strided_slice %355 {offsets = [0, 384], sizes = [8, 128], strides = [1, 1]} : vector<8x512xf32> to vector<8x128xf32>
    %367 = arith.negf %366 : vector<8x128xf32>
    %368 = math.exp %367 : vector<8x128xf32>
    %cst_105 = arith.constant 1.000000e+00 : f32
    %369 = vector.broadcast %cst_105 : f32 to vector<8x128xf32>
    %370 = arith.addf %369, %368 : vector<8x128xf32>
    %371 = arith.divf %369, %370 : vector<8x128xf32>
    %372 = arith.mulf %363, %347 : vector<8x128xf32>
    %373 = arith.mulf %362, %365 : vector<8x128xf32>
    %374 = arith.addf %372, %373 : vector<8x128xf32>
    %375 = math.tanh %374 : vector<8x128xf32>
    %376 = arith.mulf %371, %375 : vector<8x128xf32>
    %c5_i32_106 = arith.constant 5 : i32
    %c8_i32_107 = arith.constant 8 : i32
    %377 = arith.muli %c5_i32_106, %c8_i32_107 : i32
    %378 = tpu.assume_multiple %377, 8 : i32
    %379 = arith.index_cast %378 : i32 to index
    %c0_108 = arith.constant 0 : index
    %380 = vector.load %arg8[%379, %c0_108] : memref<64x512xf32, #tpu.memory_space<vmem>>, vector<8x512xf32>
    %cst_109 = arith.constant dense<0.000000e+00> : vector<8x512xf32>
    %381 = tpu.matmul %376, %249, %cst_109 {dimension_numbers = #tpu.dot_dimension_numbers<[1], [0], [0], [1], [0, 0, 1, 1], [], []>} : vector<8x128xf32>, vector<128x512xf32>, vector<8x512xf32> -> vector<8x512xf32>
    %382 = arith.addf %380, %381 : vector<8x512xf32>
    %383 = vector.extract_strided_slice %382 {offsets = [0, 0], sizes = [8, 256], strides = [1, 1]} : vector<8x512xf32> to vector<8x256xf32>
    %384 = arith.negf %383 : vector<8x256xf32>
    %385 = math.exp %384 : vector<8x256xf32>
    %cst_110 = arith.constant 1.000000e+00 : f32
    %386 = vector.broadcast %cst_110 : f32 to vector<8x256xf32>
    %387 = arith.addf %386, %385 : vector<8x256xf32>
    %388 = arith.divf %386, %387 : vector<8x256xf32>
    %389 = vector.extract_strided_slice %388 {offsets = [0, 0], sizes = [8, 128], strides = [1, 1]} : vector<8x256xf32> to vector<8x128xf32>
    %390 = vector.extract_strided_slice %388 {offsets = [0, 128], sizes = [8, 128], strides = [1, 1]} : vector<8x256xf32> to vector<8x128xf32>
    %391 = vector.extract_strided_slice %382 {offsets = [0, 256], sizes = [8, 128], strides = [1, 1]} : vector<8x512xf32> to vector<8x128xf32>
    %392 = math.tanh %391 : vector<8x128xf32>
    %393 = vector.extract_strided_slice %382 {offsets = [0, 384], sizes = [8, 128], strides = [1, 1]} : vector<8x512xf32> to vector<8x128xf32>
    %394 = arith.negf %393 : vector<8x128xf32>
    %395 = math.exp %394 : vector<8x128xf32>
    %cst_111 = arith.constant 1.000000e+00 : f32
    %396 = vector.broadcast %cst_111 : f32 to vector<8x128xf32>
    %397 = arith.addf %396, %395 : vector<8x128xf32>
    %398 = arith.divf %396, %397 : vector<8x128xf32>
    %399 = arith.mulf %390, %374 : vector<8x128xf32>
    %400 = arith.mulf %389, %392 : vector<8x128xf32>
    %401 = arith.addf %399, %400 : vector<8x128xf32>
    %402 = math.tanh %401 : vector<8x128xf32>
    %403 = arith.mulf %398, %402 : vector<8x128xf32>
    %c6_i32_112 = arith.constant 6 : i32
    %c8_i32_113 = arith.constant 8 : i32
    %404 = arith.muli %c6_i32_112, %c8_i32_113 : i32
    %405 = tpu.assume_multiple %404, 8 : i32
    %406 = arith.index_cast %405 : i32 to index
    %c0_114 = arith.constant 0 : index
    %407 = vector.load %arg8[%406, %c0_114] : memref<64x512xf32, #tpu.memory_space<vmem>>, vector<8x512xf32>
    %cst_115 = arith.constant dense<0.000000e+00> : vector<8x512xf32>
    %408 = tpu.matmul %403, %249, %cst_115 {dimension_numbers = #tpu.dot_dimension_numbers<[1], [0], [0], [1], [0, 0, 1, 1], [], []>} : vector<8x128xf32>, vector<128x512xf32>, vector<8x512xf32> -> vector<8x512xf32>
    %409 = arith.addf %407, %408 : vector<8x512xf32>
    %410 = vector.extract_strided_slice %409 {offsets = [0, 0], sizes = [8, 256], strides = [1, 1]} : vector<8x512xf32> to vector<8x256xf32>
    %411 = arith.negf %410 : vector<8x256xf32>
    %412 = math.exp %411 : vector<8x256xf32>
    %cst_116 = arith.constant 1.000000e+00 : f32
    %413 = vector.broadcast %cst_116 : f32 to vector<8x256xf32>
    %414 = arith.addf %413, %412 : vector<8x256xf32>
    %415 = arith.divf %413, %414 : vector<8x256xf32>
    %416 = vector.extract_strided_slice %415 {offsets = [0, 0], sizes = [8, 128], strides = [1, 1]} : vector<8x256xf32> to vector<8x128xf32>
    %417 = vector.extract_strided_slice %415 {offsets = [0, 128], sizes = [8, 128], strides = [1, 1]} : vector<8x256xf32> to vector<8x128xf32>
    %418 = vector.extract_strided_slice %409 {offsets = [0, 256], sizes = [8, 128], strides = [1, 1]} : vector<8x512xf32> to vector<8x128xf32>
    %419 = math.tanh %418 : vector<8x128xf32>
    %420 = vector.extract_strided_slice %409 {offsets = [0, 384], sizes = [8, 128], strides = [1, 1]} : vector<8x512xf32> to vector<8x128xf32>
    %421 = arith.negf %420 : vector<8x128xf32>
    %422 = math.exp %421 : vector<8x128xf32>
    %cst_117 = arith.constant 1.000000e+00 : f32
    %423 = vector.broadcast %cst_117 : f32 to vector<8x128xf32>
    %424 = arith.addf %423, %422 : vector<8x128xf32>
    %425 = arith.divf %423, %424 : vector<8x128xf32>
    %426 = arith.mulf %417, %401 : vector<8x128xf32>
    %427 = arith.mulf %416, %419 : vector<8x128xf32>
    %428 = arith.addf %426, %427 : vector<8x128xf32>
    %429 = math.tanh %428 : vector<8x128xf32>
    %430 = arith.mulf %425, %429 : vector<8x128xf32>
    %c7_i32_118 = arith.constant 7 : i32
    %c8_i32_119 = arith.constant 8 : i32
    %431 = arith.muli %c7_i32_118, %c8_i32_119 : i32
    %432 = tpu.assume_multiple %431, 8 : i32
    %433 = arith.index_cast %432 : i32 to index
    %c0_120 = arith.constant 0 : index
    %434 = vector.load %arg8[%433, %c0_120] : memref<64x512xf32, #tpu.memory_space<vmem>>, vector<8x512xf32>
    %cst_121 = arith.constant dense<0.000000e+00> : vector<8x512xf32>
    %435 = tpu.matmul %430, %249, %cst_121 {dimension_numbers = #tpu.dot_dimension_numbers<[1], [0], [0], [1], [0, 0, 1, 1], [], []>} : vector<8x128xf32>, vector<128x512xf32>, vector<8x512xf32> -> vector<8x512xf32>
    %436 = arith.addf %434, %435 : vector<8x512xf32>
    %437 = vector.extract_strided_slice %436 {offsets = [0, 0], sizes = [8, 256], strides = [1, 1]} : vector<8x512xf32> to vector<8x256xf32>
    %438 = arith.negf %437 : vector<8x256xf32>
    %439 = math.exp %438 : vector<8x256xf32>
    %cst_122 = arith.constant 1.000000e+00 : f32
    %440 = vector.broadcast %cst_122 : f32 to vector<8x256xf32>
    %441 = arith.addf %440, %439 : vector<8x256xf32>
    %442 = arith.divf %440, %441 : vector<8x256xf32>
    %443 = vector.extract_strided_slice %442 {offsets = [0, 0], sizes = [8, 128], strides = [1, 1]} : vector<8x256xf32> to vector<8x128xf32>
    %444 = vector.extract_strided_slice %442 {offsets = [0, 128], sizes = [8, 128], strides = [1, 1]} : vector<8x256xf32> to vector<8x128xf32>
    %445 = vector.extract_strided_slice %436 {offsets = [0, 256], sizes = [8, 128], strides = [1, 1]} : vector<8x512xf32> to vector<8x128xf32>
    %446 = math.tanh %445 : vector<8x128xf32>
    %447 = vector.extract_strided_slice %436 {offsets = [0, 384], sizes = [8, 128], strides = [1, 1]} : vector<8x512xf32> to vector<8x128xf32>
    %448 = arith.negf %447 : vector<8x128xf32>
    %449 = math.exp %448 : vector<8x128xf32>
    %cst_123 = arith.constant 1.000000e+00 : f32
    %450 = vector.broadcast %cst_123 : f32 to vector<8x128xf32>
    %451 = arith.addf %450, %449 : vector<8x128xf32>
    %452 = arith.divf %450, %451 : vector<8x128xf32>
    %453 = arith.mulf %444, %428 : vector<8x128xf32>
    %454 = arith.mulf %443, %446 : vector<8x128xf32>
    %455 = arith.addf %453, %454 : vector<8x128xf32>
    %456 = math.tanh %455 : vector<8x128xf32>
    %457 = arith.mulf %452, %456 : vector<8x128xf32>
    %c7_i32_124 = arith.constant 7 : i32
    %c1_125 = arith.constant 1 : index
    %c0_126 = arith.constant 0 : index
    %c0_127 = arith.constant 0 : index
    %458 = vector.load %arg6[%c1_125, %c0_126, %c0_127] : memref<2x8x128xf32, #tpu.memory_space<vmem>>, vector<1x8x128xf32>
    %459 = vector.shape_cast %458 : vector<1x8x128xf32> to vector<8x128xf32>
    %460 = vector.shape_cast %457 : vector<8x128xf32> to vector<1x8x128xf32>
    tpu.vector_store %arg6[%c1_125, %c0_126, %c0_127], %460 {strides = array<i32>} : memref<2x8x128xf32, #tpu.memory_space<vmem>>, vector<1x8x128xf32>,
    %c1_128 = arith.constant 1 : index
    %c0_129 = arith.constant 0 : index
    %c0_130 = arith.constant 0 : index
    %461 = vector.load %arg7[%c1_128, %c0_129, %c0_130] : memref<2x8x128xf32, #tpu.memory_space<vmem>>, vector<1x8x128xf32>
    %462 = vector.shape_cast %461 : vector<1x8x128xf32> to vector<8x128xf32>
    %463 = vector.shape_cast %455 : vector<8x128xf32> to vector<1x8x128xf32>
    tpu.vector_store %arg7[%c1_128, %c0_129, %c0_130], %463 {strides = array<i32>} : memref<2x8x128xf32, #tpu.memory_space<vmem>>, vector<1x8x128xf32>,
    return
  }
  func.func @transform_0(%arg0: i32) -> (i32, i32) {
    %c0_i32 = arith.constant 0 : i32
    %c0_i32_0 = arith.constant 0 : i32
    %c0_i32_1 = arith.constant 0 : i32
    return %c0_i32, %c0_i32_0 : i32, i32
  }
  func.func @transform_1(%arg0: i32) -> (i32, i32) {
    %c0_i32 = arith.constant 0 : i32
    %c0_i32_0 = arith.constant 0 : i32
    %c0_i32_1 = arith.constant 0 : i32
    return %c0_i32, %c0_i32_0 : i32, i32
  }
  func.func @transform_2(%arg0: i32) -> (i32, i32, i32) {
    %c0_i32 = arith.constant 0 : i32
    %c0_i32_0 = arith.constant 0 : i32
    %c0_i32_1 = arith.constant 0 : i32
    %c0_i32_2 = arith.constant 0 : i32
    return %c0_i32, %c0_i32_0, %c0_i32_1 : i32, i32, i32
  }
  func.func @transform_3(%arg0: i32) -> (i32, i32, i32) {
    %c0_i32 = arith.constant 0 : i32
    %c0_i32_0 = arith.constant 0 : i32
    %c0_i32_1 = arith.constant 0 : i32
    %c0_i32_2 = arith.constant 0 : i32
    return %c0_i32, %c0_i32_0, %c0_i32_1 : i32, i32, i32
  }
  func.func @transform_4(%arg0: i32) -> (i32, i32, i32) {
    %c0_i32 = arith.constant 0 : i32
    %c0_i32_0 = arith.constant 0 : i32
    %c0_i32_1 = arith.constant 0 : i32
    %c0_i32_2 = arith.constant 0 : i32
    return %c0_i32, %c0_i32_0, %c0_i32_1 : i32, i32, i32
  }
  func.func @transform_5(%arg0: i32) -> (i32, i32, i32) {
    %c0_i32 = arith.constant 0 : i32
    %c0_i32_0 = arith.constant 0 : i32
    %c0_i32_1 = arith.constant 0 : i32
    %c0_i32_2 = arith.constant 0 : i32
    return %c0_i32, %c0_i32_0, %c0_i32_1 : i32, i32, i32
  }
  func.func @transform_6(%arg0: i32) -> (i32, i32, i32) {
    %c0_i32 = arith.constant 0 : i32
    %c0_i32_0 = arith.constant 0 : i32
    %c0_i32_1 = arith.constant 0 : i32
    %c0_i32_2 = arith.constant 0 : i32
    return %c0_i32, %c0_i32_0, %c0_i32_1 : i32, i32, i32
  }
}

</mosaic_0001>

<bundles_post_ra>
// kernel: encoder_forward.1
= control target key start
LH: loop header
LB: loop body
LE: loop exit
PB: predicated region body
PF: predicated region fallthrough
CT: control target
= control target key end

     0   :  { %12 = vsyncpa [#allocation5], 0  ;;  %s3449_s24 = smov [#allocation4]   ;;  %s3450_s26 = smov 512   ;;  %s5679_s0 = inlined_call_operand.vmem [shape: f32[64,32], index: 0, kind: input, shape index: {}]   ;;  %s5680_s1 = inlined_call_operand.vmem [shape: f32[32,512], index: 1, kind: input, shape index: {}]   ;;  %s5681_s2 = inlined_call_operand.vmem [shape: f32[1,128,512], index: 2, kind: input, shape index: {}]   ;;  %s5682_s3 = inlined_call_operand.hbm [shape: f32[2,128,512], index: 3, kind: input, shape index: {}]   ;;  %s5683_s4 = inlined_call_operand.vmem [shape: f32[2,1,512], index: 4, kind: input, shape index: {}]   ;;  %s5684_s5 = inlined_call_operand.vmem [shape: f32[2,8,128], index: 5, kind: output, shape index: {0}]   ;;  %s5685_s6 = inlined_call_operand.vmem [shape: f32[2,8,128], index: 6, kind: output, shape index: {1}]  }
   0x1   :  { %s23_s23 = sshll.u32 %s5682_s3, 4  ;;  %s25_s25 = sshll.u32 %s3449_s24, 4  ;;  %s24_s23 = int_to_ptr.hbm [resolvable:$true] %s23_s23  ;;  %s26_s25 = int_to_ptr.vmem [resolvable:$true] %s25_s25 }
   0x2   :  { %s3451_s27 = smov 32  }
   0x3   :  { %31 = dma.hbm_to_vmem [thread:$0]  %s24_s23, 16384, %s26_s25, [#allocation5], %s3450_s26, %s3450_s26, %s3451_s27  }
   0x4   :  { %3447 = dma.done.wait [#allocation5], 16384  }
   0x5   :  { %3448 = vsyncadd [#allocation5], 4294950912  ;;  %v58_v0 = vld [vmem:[%s5680_s1 + $0x60] sm:$0xff]  ;;  %v61_v1 = vld [vmem:[%s5680_s1 + $0x78] sm:$0xff]  ;;  %vm72_vm0 = vcmask 261120  }
   0x6   :  { %v54_v2 = vld [vmem:[%s5680_s1 + $0x40] sm:$0xff]  ;;  %109 = vmatpush.msra.mxu0 %v58_v0  ;;  %232 = vmatpush.msra.mxu3 %v61_v1  ;;  %v57_v3 = vld [vmem:[%s5680_s1 + $0x58] sm:$0xff]  ;;  %v60_v6 = vld [vmem:[%s5680_s1 + $0x70] sm:$0xff] }
   0x7   :  { %v50_v4 = vld [vmem:[%s5680_s1 + $0x20] sm:$0xff]  ;;  %v53_v5 = vld [vmem:[%s5680_s1 + $0x38] sm:$0xff]  ;;  %v56_v7 = vld [vmem:[%s5680_s1 + $0x50] sm:$0xff]  ;;  %191 = vmatpush.msra.mxu2 %v60_v6 }
   0x8   :  { %110 = vmatpush.msra.mxu0 %v54_v2  ;;  %233 = vmatpush.msra.mxu3 %v57_v3  ;;  %v46_v8 = vld [vmem:[%s5680_s1] sm:$0xff]  ;;  %v49_v9 = vld [vmem:[%s5680_s1 + $0x18] sm:$0xff]  ;;  %v59_v10 = vld [vmem:[%s5680_s1 + $0x68] sm:$0xff] }
   0x9   :  { %v38_v11 = vld [vmem:[%s5679_s0] sm:$0xff]  ;;  %192 = vmatpush.msra.mxu2 %v56_v7  ;;  %v52_v12 = vld [vmem:[%s5680_s1 + $0x30] sm:$0xff]  ;;  %150 = vmatpush.msra.mxu1 %v59_v10  ;;  %v55_v13 = vld [vmem:[%s5680_s1 + $0x48] sm:$0xff] }
   0xa   :  { %111 = vmatpush.msra.mxu0 %v50_v4  ;;  %234 = vmatpush.msra.mxu3 %v53_v5  ;;  %v3532_v14 = vld [vmem:[#allocation4 + $0x1e0] sm:$0xff]  ;;  %v3534_v15 = vld [vmem:[#allocation4 + $0x1f8] sm:$0xff]  ;;  %v48_v16 = vld [vmem:[%s5680_s1 + $0x10] sm:$0xff] }
   0xb   :  { %5938 = vst [vmem:[#allocation7_spill] sm:$0xff] %v3532_v14  ;;  %v51_v17 = vld [vmem:[%s5680_s1 + $0x28] sm:$0xff]  ;;  %193 = vmatpush.msra.mxu2 %v52_v12  ;;  %151 = vmatpush.msra.mxu1 %v55_v13  ;;  %v3544_v18 = vld [vmem:[#allocation4 + $0x1c0] sm:$0xff]  ;;  %v3551_v20 = vld [vmem:[#allocation4 + $0x1d8] sm:$0xff] }
   0xc   :  { %112 = vmatpush.msra.mxu0 %v46_v8  ;;  %235 = vmatpush.msra.mxu3 %v49_v9  ;;  %5939 = vst [vmem:[#allocation8_spill] sm:$0xff] %v3544_v18  ;;  %v47_v19 = vld [vmem:[%s5680_s1 + $0x8] sm:$0xff]  ;;  %v3553_v21 = vld [vmem:[#allocation4 + $0x1a0] sm:$0xff]  ;;  %v3559_v23 = vld [vmem:[#allocation4 + $0x1b8] sm:$0xff] }
   0xd   :  { %2963 = vmatmul.msk.f32.vlgmr.msra.gmra.mxu0 %vm72_vm0, %v38_v11  ;;  %2987 = vmatmul.msk.f32.vlgmr.msra.gmra.mxu3 %vm72_vm0, %v38_v11  ;;  %5940 = vst [vmem:[#allocation9_spill] sm:$0xff] %v3551_v20  ;;  %v3556_v22 = vld [vmem:[#allocation4 + $0x1e8] sm:$0xff]  ;;  %v3569_v26 = vld [vmem:[#allocation4 + $0x180] sm:$0xff]  ;;  %v3573_v27 = vld [vmem:[#allocation4 + $0x1f0] sm:$0xff] }
   0xe   :  { %410 = vmatpush.msrb.mxu0 %v3532_v14  ;;  %470 = vmatpush.msrb.mxu3 %v3534_v15  ;;  %v39_v24 = vld [vmem:[%s5679_s0 + $0x8] sm:$0xff]  ;;  %v3575_v28 = vld [vmem:[#allocation4 + $0x198] sm:$0xff]  ;;  %v3581_v30 = vld [vmem:[#allocation4 + $0x160] sm:$0xff] }
   0xf   :  { %194 = vmatpush.msra.mxu2 %v48_v16  ;;  %152 = vmatpush.msra.mxu1 %v51_v17  ;;  %v3566_v25 = vld [vmem:[#allocation4 + $0x1c8] sm:$0xff]  ;;  %5941 = vst [vmem:[#allocation10_spill] sm:$0xff] %v3581_v30  ;;  %v3585_v31 = vld [vmem:[#allocation4 + $0x178] sm:$0xff]  ;;  %v3591_v33 = vld [vmem:[#allocation4 + $0x1d0] sm:$0xff] }
  0x10   :  { %2979 = vmatmul.msk.f32.vlgmr.msra.gmra.mxu2 %vm72_vm0, %v38_v11  ;;  %411 = vmatpush.msrb.mxu0 %v3544_v18  ;;  %v3579_v29 = vld [vmem:[#allocation4 + $0x1a8] sm:$0xff]  ;;  %5942 = vst [vmem:[#allocation11_spill] sm:$0xff] %v3585_v31  ;;  %v3595_v34 = vld [vmem:[#allocation4 + $0x140] sm:$0xff]  ;;  %v40_v36 = vld [vmem:[%s5679_s0 + $0x10] sm:$0xff] }
  0x11   :  { %153 = vmatpush.msra.mxu1 %v47_v19  ;;  %471 = vmatpush.msrb.mxu3 %v3551_v20  ;;  %v3587_v32 = vld [vmem:[#allocation4 + $0x188] sm:$0xff]  ;;  %5944 = vst [vmem:[#allocation13_spill] sm:$0xff] %v3595_v34  ;;  %v41_v38 = vld [vmem:[%s5679_s0 + $0x18] sm:$0xff]  ;;  %v42_v39 = vld [vmem:[%s5679_s0 + $0x20] sm:$0xff] }
  0x12   :  { %2971 = vmatmul.msk.f32.vlgmr.msra.gmra.mxu1 %vm72_vm0, %v38_v11  ;;  %412 = vmatpush.msrb.mxu0 %v3553_v21  ;;  %5943 = vst [vmem:[#allocation12_spill] sm:$0xff] %v3587_v32  ;;  %v3598_v35 = vld [vmem:[#allocation4 + $0x168] sm:$0xff]  ;;  %v3630_v40 = vld [vmem:[#allocation4 + $0x1b0] sm:$0xff]  ;;  %v3645_v44 = vld [vmem:[#allocation4 + $0x158] sm:$0xff] }
  0x13   :  { %430 = vmatpush.msrb.mxu1 %v3556_v22  ;;  %472 = vmatpush.msrb.mxu3 %v3559_v23  ;;  %v3608_v37 = vld [vmem:[#allocation4 + $0x148] sm:$0xff]  ;;  %v3633_v41 = vld [vmem:[#allocation4 + $0x190] sm:$0xff]  ;;  %5946 = vst [vmem:[#allocation15_spill] sm:$0xff] %v3645_v44  ;;  %v3652_v46 = vld [vmem:[#allocation4 + $0x120] sm:$0xff] }
  0x14   :  { %413 = vmatpush.msrb.mxu0 %v3569_v26  ;;  %450 = vmatpush.msrb.mxu2 %v3573_v27  ;;  %5945 = vst [vmem:[#allocation14_spill] sm:$0xff] %v3608_v37  ;;  %v43_v42 = vld [vmem:[%s5679_s0 + $0x28] sm:$0xff]  ;;  %v3639_v43 = vld [vmem:[#allocation4 + $0x170] sm:$0xff]  ;;  %v3656_v48 = vld [vmem:[#allocation4 + $0x138] sm:$0xff] }
  0x15   :  { %2964 = vmatmul.msk.f32.gmra.mxu0 %vm72_vm0, %v39_v24  ;;  %2988 = vmatmul.msk.f32.gmra.mxu3 %vm72_vm0, %v39_v24  ;;  %v3647_v45 = vld [vmem:[#allocation4 + $0x150] sm:$0xff]  ;;  %v3654_v47 = vld [vmem:[#allocation4 + $0x128] sm:$0xff]  ;;  %5947 = vst [vmem:[#allocation16_spill] sm:$0xff] %v3656_v48  ;;  %v3662_v50 = vld [vmem:[#allocation4 + $0x100] sm:$0xff] }
  0x16   :  { %431 = vmatpush.msrb.mxu1 %v3566_v25  ;;  %473 = vmatpush.msrb.mxu3 %v3575_v28  ;;  %v3660_v49 = vld [vmem:[#allocation4 + $0x130] sm:$0xff]  ;;  %v3664_v51 = vld [vmem:[#allocation4 + $0x108] sm:$0xff]  ;;  %v3667_v52 = vld [vmem:[#allocation4 + $0x118] sm:$0xff] }
  0x17   :  { %414 = vmatpush.msrb.mxu0 %v3581_v30  ;;  %451 = vmatpush.msrb.mxu2 %v3591_v33  ;;  %v3673_v53 = vld [vmem:[%s5683_s4] sm:$0xf]  ;;  %v3677_v54 = vld [vmem:[#allocation4 + $0x110] sm:$0xff]  ;;  %v3681_v56 = vld [vmem:[#allocation4 + $0xe8] sm:$0xff] }
  0x18   :  { %432 = vmatpush.msrb.mxu1 %v3579_v29  ;;  %2980 = vmatmul.msk.f32.gmra.mxu2 %vm72_vm0, %v39_v24  ;;  %5948 = vst [vmem:[#allocation17_spill] sm:$0xff] %v3673_v53  ;;  %v3679_v55 = vld [vmem:[#allocation4 + $0xe0] sm:$0xff]  ;;  %v3684_v57 = vld [vmem:[#allocation4 + $0xf8] sm:$0xff]  ;;  %v3689_v58 = vld [vmem:[#allocation4 + $0xf0] sm:$0xff]  ;;  %v3703_v63 = vperm.slane %v3673_v53, 0  ;;  %v3737_v12 = vperm.slane %v3673_v53, 3 }
  0x19   :  { %474 = vmatpush.msrb.mxu3 %v3585_v31  ;;  %415 = vmatpush.msrb.mxu0 %v3595_v34  ;;  %v44_v59 = vld [vmem:[%s5679_s0 + $0x30] sm:$0xff]  ;;  %v3694_v60 = vld [vmem:[#allocation4 + $0xc0] sm:$0xff]  ;;  %v3696_v61 = vld [vmem:[#allocation4 + $0xc8] sm:$0xff] }
  0x1a   :  { %433 = vmatpush.msrb.mxu1 %v3587_v32  ;;  %452 = vmatpush.msrb.mxu2 %v3630_v40  ;;  %v3699_v62 = vld [vmem:[#allocation4 + $0xd8] sm:$0xff]  ;;  %5950 = vst [vmem:[#allocation19_spill] sm:$0xff] %v3703_v63  ;;  %v3707_v0 = vld [vmem:[#allocation4 + $0xa0] sm:$0xff]  ;;  %v3709_v1 = vld [vmem:[#allocation4 + $0xa8] sm:$0xff] }
  0x1b   :  { %2972 = vmatmul.msk.f32.gmra.mxu1 %vm72_vm0, %v39_v24  ;;  %475 = vmatpush.msrb.mxu3 %v3645_v44  ;;  %5949 = vst [vmem:[#allocation18_spill] sm:$0xff] %v3699_v62  ;;  %v3712_v2 = vld [vmem:[#allocation4 + $0xb8] sm:$0xff]  ;;  %v3717_v4 = vld [vmem:[#allocation4 + $0x80] sm:$0xff]  ;;  %v3719_v5 = vld [vmem:[#allocation4 + $0x88] sm:$0xff] }
  0x1c   :  { %434 = vmatpush.msrb.mxu1 %v3598_v35  ;;  %453 = vmatpush.msrb.mxu2 %v3633_v41  ;;  %5951 = vst [vmem:[#allocation20_spill] sm:$0xff] %v3707_v0  ;;  %v3726_v7 = vld [vmem:[#allocation4 + $0x98] sm:$0xff]  ;;  %v3728_v8 = vld [vmem:[#allocation4 + $0xd0] sm:$0xff]  ;;  %v3732_v9 = vld [vmem:[#allocation4 + $0x60] sm:$0xff] }
  0x1d   :  { %2965 = vmatmul.msk.f32.gmra.mxu0 %vm72_vm0, %v40_v36  ;;  %2989 = vmatmul.msk.f32.gmra.mxu3 %vm72_vm0, %v40_v36  ;;  %5952 = vst [vmem:[#allocation21_spill] sm:$0xff] %v3709_v1  ;;  %v3734_v10 = vld [vmem:[#allocation4 + $0x68] sm:$0xff]  ;;  %v3741_v13 = vld [vmem:[#allocation4 + $0xb0] sm:$0xff]  ;;  %v3743_v16 = vld [vmem:[#allocation4 + $0x78] sm:$0xff] }
  0x1e   :  { %435 = vmatpush.msrb.mxu1 %v3608_v37  ;;  %454 = vmatpush.msrb.mxu2 %v3639_v43  ;;  %5953 = vst [vmem:[#allocation22_spill] sm:$0xff] %v3712_v2  ;;  %v3747_v17 = vld [vmem:[#allocation4 + $0x40] sm:$0xff]  ;;  %v3749_v19 = vld [vmem:[#allocation4 + $0x48] sm:$0xff]  ;;  %v45_v24 = vld [vmem:[%s5679_s0 + $0x38] sm:$0xff] }
  0x1f   :  { %416 = vmatpush.msrb.mxu0 %v3652_v46  ;;  %476 = vmatpush.msrb.mxu3 %v3656_v48  ;;  %5954 = vst [vmem:[#allocation23_spill] sm:$0xff] %v3717_v4 }
  0x20   :  { %2981 = vmatmul.msk.f32.gmra.mxu2 %vm72_vm0, %v40_v36  ;;  %436 = vmatpush.msrb.mxu1 %v3654_v47  ;;  %5955 = vst [vmem:[#allocation24_spill] sm:$0xff] %v3719_v5 }
  0x21   :  { %455 = vmatpush.msrb.mxu2 %v3647_v45  ;;  %417 = vmatpush.msrb.mxu0 %v3662_v50  ;;  %5956 = vst [vmem:[#allocation25_spill] sm:$0xff] %v3726_v7 }
  0x22   :  { %437 = vmatpush.msrb.mxu1 %v3664_v51  ;;  %477 = vmatpush.msrb.mxu3 %v3667_v52  ;;  %5957 = vst [vmem:[#allocation26_spill] sm:$0xff] %v3732_v9 }
  0x23   :  { %2973 = vmatmul.msk.f32.gmra.mxu1 %vm72_vm0, %v40_v36  ;;  %456 = vmatpush.msrb.mxu2 %v3660_v49  ;;  %5958 = vst [vmem:[#allocation27_spill] sm:$0xff] %v3734_v10  ;;  %v3756_v36 = vld [vmem:[#allocation4 + $0x90] sm:$0xff] }
  0x24   :  { %418 = vmatpush.msrb.mxu0 %v3679_v55  ;;  %438 = vmatpush.msrb.mxu1 %v3681_v56  ;;  %5959 = vst [vmem:[#allocation28_spill] sm:$0xff] %v3737_v12 }
  0x25   :  { %2966 = vmatmul.msk.f32.gmra.mxu0 %vm72_vm0, %v41_v38  ;;  %2990 = vmatmul.msk.f32.gmra.mxu3 %vm72_vm0, %v41_v38  ;;  %5960 = vst [vmem:[#allocation29_spill] sm:$0xff] %v3741_v13 }
  0x26   :  { %457 = vmatpush.msrb.mxu2 %v3677_v54  ;;  %478 = vmatpush.msrb.mxu3 %v3684_v57  ;;  %5961 = vst [vmem:[#allocation30_spill] sm:$0xff] %v3743_v16 }
  0x27   :  { %419 = vmatpush.msrb.mxu0 %v3694_v60  ;;  %439 = vmatpush.msrb.mxu1 %v3696_v61  ;;  %5962 = vst [vmem:[#allocation31_spill] sm:$0xff] %v3747_v17 }
  0x28   :  { %2982 = vmatmul.msk.f32.gmra.mxu2 %vm72_vm0, %v41_v38  ;;  %479 = vmatpush.msrb.mxu3 %v3699_v62  ;;  %5963 = vst [vmem:[#allocation32_spill] sm:$0xff] %v3749_v19 }
  0x29   :  { %458 = vmatpush.msrb.mxu2 %v3689_v58  ;;  %420 = vmatpush.msrb.mxu0 %v3707_v0  ;;  %5964 = vst [vmem:[#allocation33_spill] sm:$0xff] %v3756_v36 }
  0x2a   :  { %440 = vmatpush.msrb.mxu1 %v3709_v1  ;;  %480 = vmatpush.msrb.mxu3 %v3712_v2 }
  0x2b   :  { %2974 = vmatmul.msk.f32.gmra.mxu1 %vm72_vm0, %v41_v38  ;;  %421 = vmatpush.msrb.mxu0 %v3717_v4 }
  0x2c   :  { %441 = vmatpush.msrb.mxu1 %v3719_v5  ;;  %481 = vmatpush.msrb.mxu3 %v3726_v7 }
  0x2d   :  { %2967 = vmatmul.msk.f32.gmra.mxu0 %vm72_vm0, %v42_v39  ;;  %2991 = vmatmul.msk.f32.gmra.mxu3 %vm72_vm0, %v42_v39 }
  0x2e   :  { %422 = vmatpush.msrb.mxu0 %v3732_v9  ;;  %442 = vmatpush.msrb.mxu1 %v3734_v10 }
  0x2f   :  { %459 = vmatpush.msrb.mxu2 %v3728_v8  ;;  %482 = vmatpush.msrb.mxu3 %v3743_v16 }
  0x30   :  { %2983 = vmatmul.msk.f32.gmra.mxu2 %vm72_vm0, %v42_v39  ;;  %423 = vmatpush.msrb.mxu0 %v3747_v17 }
  0x31   :  { %443 = vmatpush.msrb.mxu1 %v3749_v19  ;;  %460 = vmatpush.msrb.mxu2 %v3741_v13 }
  0x33   :  { %2975 = vmatmul.msk.f32.gmra.mxu1 %vm72_vm0, %v42_v39  ;;  %v3760_v39 = vld [vmem:[#allocation4 + $0x20] sm:$0xff]  ;;  %461 = vmatpush.msrb.mxu2 %v3756_v36 }
  0x34   :  { %5965 = vst [vmem:[#allocation34_spill] sm:$0xff] %v3760_v39  ;;  %424 = vmatpush.msrb.mxu0 %v3760_v39 }
  0x35   :  { %2968 = vmatmul.msk.f32.gmra.mxu0 %vm72_vm0, %v43_v42  ;;  %2992 = vmatmul.msk.f32.gmra.mxu3 %vm72_vm0, %v43_v42 }
  0x38   :  { %2984 = vmatmul.msk.f32.gmra.mxu2 %vm72_vm0, %v43_v42 }
  0x3b   :  { %2976 = vmatmul.msk.f32.gmra.mxu1 %vm72_vm0, %v43_v42  ;;  %v3762_v42 = vld [vmem:[#allocation4 + $0x28] sm:$0xff] }
  0x3c   :  { %5966 = vst [vmem:[#allocation35_spill] sm:$0xff] %v3762_v42  ;;  %444 = vmatpush.msrb.mxu1 %v3762_v42 }
  0x3d   :  { %2969 = vmatmul.msk.f32.gmra.mxu0 %vm72_vm0, %v44_v59  ;;  %2993 = vmatmul.msk.f32.gmra.mxu3 %vm72_vm0, %v44_v59 }
  0x40   :  { %2985 = vmatmul.msk.f32.gmra.mxu2 %vm72_vm0, %v44_v59 }
  0x43   :  { %2977 = vmatmul.msk.f32.gmra.mxu1 %vm72_vm0, %v44_v59  ;;  %v3764_v59 = vld [vmem:[#allocation4 + $0x58] sm:$0xff] }
  0x44   :  { %5967 = vst [vmem:[#allocation36_spill] sm:$0xff] %v3764_v59  ;;  %483 = vmatpush.msrb.mxu3 %v3764_v59  ;;  %v3790_v59 = vld [vmem:[#allocation4 + $0x30] sm:$0xff] }
  0x45   :  { %2970 = vmatmul.msk.f32.gmra.mxu0 %vm72_vm0, %v45_v24  ;;  %2994 = vmatmul.msk.f32.gmra.mxu3 %vm72_vm0, %v45_v24  ;;  %5974 = vst [vmem:[#allocation43_spill] sm:$0xff] %v3790_v59 }
  0x48   :  { %2986 = vmatmul.msk.f32.gmra.mxu2 %vm72_vm0, %v45_v24 }
  0x4b   :  { %2978 = vmatmul.msk.f32.gmra.mxu1 %vm72_vm0, %v45_v24  ;;  %v3798_v24 = vld [vmem:[#allocation4 + $0x10] sm:$0xff] }
  0x4c   :  { %5976 = vst [vmem:[#allocation45_spill] sm:$0xff] %v3798_v24 }
  0x8a   :  { %v114_v3 = vpop.f32.mrf.mxu0 }
  0x8b   :  { %v115_v6 = vadd.f32 %v114_v3, %v3703_v63  ;;  %v3773_v63 = vld [vmem:[#allocation4] sm:$0xff] }
  0x8c   :  { %5969 = vst [vmem:[#allocation38_spill] sm:$0xff] %v3773_v63  ;;  %425 = vmatpush.msrb.mxu0 %v3773_v63 }
  0x8d   :  { %v2995_v11 = vmul.f32 -1.442695, %v115_v6 }
  0x8e   :  { %566 = vmatpush.msra.mxu0 %v3532_v14 }
  0x8f   :  { %3047 = vpow2.f32 %v2995_v11  ;;  %v155_v3 = vpop.f32.mrf.mxu1  ;;  %v3771_v11 = vld [vmem:[#allocation4 + $0x70] sm:$0xff] }
  0x90   :  { %v237_v38 = vpop.f32.mrf.mxu3  ;;  %5968 = vst [vmem:[#allocation37_spill] sm:$0xff] %v3771_v11  ;;  %v3777_v3 = vld [vmem:[#allocation4 + $0x8] sm:$0xff]  ;;  %462 = vmatpush.msrb.mxu2 %v3771_v11  ;;  %567 = vmatpush.msra.mxu0 %v3544_v18 }
  0x91   :  { %v238_v6 = vadd.f32 %v237_v38, %v3737_v12  ;;  %5970 = vst [vmem:[#allocation39_spill] sm:$0xff] %v3777_v3  ;;  %v3779_v38 = vld [vmem:[#allocation4 + $0x38] sm:$0xff]  ;;  %v3783_v12 = vld [vmem:[#allocation4 + $0x50] sm:$0xff]  ;;  %445 = vmatpush.msrb.mxu1 %v3777_v3 }
  0x92   :  { %5971 = vst [vmem:[#allocation40_spill] sm:$0xff] %v3779_v38  ;;  %484 = vmatpush.msrb.mxu3 %v3779_v38  ;;  %463 = vmatpush.msrb.mxu2 %v3783_v12 }
  0x93   :  { %v2996_v19 = vmul.f32 -1.442695, %v238_v6  ;;  %5972 = vst [vmem:[#allocation41_spill] sm:$0xff] %v3783_v12  ;;  %v3787_v6 = vld [vmem:[#allocation4 + $0x18] sm:$0xff]  ;;  %586 = vmatpush.msra.mxu1 %v3556_v22  ;;  %568 = vmatpush.msra.mxu0 %v3553_v21 }
  0x94   :  { %5973 = vst [vmem:[#allocation42_spill] sm:$0xff] %v3787_v6  ;;  %485 = vmatpush.msrb.mxu3 %v3787_v6  ;;  %464 = vmatpush.msrb.mxu2 %v3790_v59 }
  0x95   :  { %v3048_v42 = vpop.eup %3047  ;;  %3049 = vpow2.f32 %v2996_v19  ;;  %v3796_v19 = vperm.slane %v3673_v53, 2  ;;  %587 = vmatpush.msra.mxu1 %v3566_v25  ;;  %569 = vmatpush.msra.mxu0 %v3569_v26 }
  0x96   :  { %v363_v39 = vadd.f32 1.0, %v3048_v42  ;;  %v196_v42 = vpop.f32.mrf.mxu2  ;;  %626 = vmatpush.msra.mxu3 %v3534_v15  ;;  %465 = vmatpush.msrb.mxu2 %v3798_v24 }
  0x97   :  { %5975 = vst [vmem:[#allocation44_spill] sm:$0xff] %v3796_v19  ;;  %v197_v6 = vadd.f32 %v196_v42, %v3796_v19  ;;  %588 = vmatpush.msra.mxu1 %v3579_v29  ;;  %570 = vmatpush.msra.mxu0 %v3581_v30 }
  0x98   :  { %3051 = vrcp.f32 %v363_v39  ;;  %627 = vmatpush.msra.mxu3 %v3551_v20  ;;  %606 = vmatpush.msra.mxu2 %v3573_v27  ;;  %v375_v42 = vand.u32 2147483648, %v363_v39  ;;  %vm369_vm2 = vweird.f32 %v363_v39 }
  0x99   :  { %589 = vmatpush.msra.mxu1 %v3587_v32  ;;  %571 = vmatpush.msra.mxu0 %v3595_v34  ;;  %v373_v32 = vand.u32 2147483647, %v363_v39 }
  0x9a   :  { %628 = vmatpush.msra.mxu3 %v3559_v23  ;;  %607 = vmatpush.msra.mxu2 %v3591_v33  ;;  %v376_v34 = vor.u32 1.1754944e-38, %v375_v42 }
  0x9b   :  { %v3050_v14 = vpop.eup %3049  ;;  %590 = vmatpush.msra.mxu1 %v3598_v35  ;;  %572 = vmatpush.msra.mxu0 %v3652_v46  ;;  %vm374_vm4 = vcmp.eq.f32.partialorder %v373_v32, 8.507059e+37 }
  0x9c   :  { %v3808_v53 = vadd.f32 1.0, %v3050_v14  ;;  %629 = vmatpush.msra.mxu3 %v3575_v28  ;;  %608 = vmatpush.msra.mxu2 %v3630_v40 }
  0x9d   :  { %591 = vmatpush.msra.mxu1 %v3608_v37  ;;  %573 = vmatpush.msra.mxu0 %v3662_v50 }
  0x9e   :  { %v3052_v18 = vpop.eup %3051  ;;  %3053 = vrcp.f32 %v3808_v53  ;;  %630 = vmatpush.msra.mxu3 %v3585_v31  ;;  %609 = vmatpush.msra.mxu2 %v3633_v41  ;;  %vm389_vm6 = vweird.f32 %v3808_v53  ;;  %v393_v32 = vand.u32 2147483647, %v3808_v53 }
  0x9f   :  { %v365_v20 = vmul.f32 %v3052_v18, %v363_v39  ;;  %3055 = vtanh.f32 %v197_v6  ;;  %vm370_vm1 = vweird.f32 %v3052_v18  ;;  %592 = vmatpush.msra.mxu1 %v3654_v47  ;;  %574 = vmatpush.msra.mxu0 %v3679_v55 }
  0xa0   :  { %631 = vmatpush.msra.mxu3 %v3645_v44  ;;  %610 = vmatpush.msra.mxu2 %v3639_v43  ;;  %vm371_vm3 = vmor %vm369_vm2, %vm370_vm1  ;;  %vm394_vm8 = vcmp.eq.f32.partialorder %v393_v32, 8.507059e+37  ;;  %v5985_v32 = vld [vmem:[#allocation9_spill] sm:$0xff] }
  0xa1   :  { %v366_v14 = vsub.f32 1.0, %v365_v20  ;;  %593 = vmatpush.msra.mxu1 %v3664_v51  ;;  %575 = vmatpush.msra.mxu0 %v3694_v60 }
  0xa2   :  { %632 = vmatpush.msra.mxu3 %v3656_v48  ;;  %611 = vmatpush.msra.mxu2 %v3647_v45 }
  0xa3   :  { %v367_v19 = vmul.f32 %v3052_v18, %v366_v14  ;;  %594 = vmatpush.msra.mxu1 %v3681_v56  ;;  %576 = vmatpush.msra.mxu0 %v3707_v0 }
  0xa4   :  { %v3054_v6 = vpop.eup %3053  ;;  %633 = vmatpush.msra.mxu3 %v3667_v52  ;;  %612 = vmatpush.msra.mxu2 %v3660_v49 }
  0xa5   :  { %v385_v20 = vmul.f32 %v3054_v6, %v3808_v53  ;;  %v368_v31 = vadd.f32 %v3052_v18, %v367_v19  ;;  %v3056_v14 = vpop.eup %3055  ;;  %vm390_vm5 = vweird.f32 %v3054_v6  ;;  %595 = vmatpush.msra.mxu1 %v3696_v61  ;;  %577 = vmatpush.msra.mxu0 %v3717_v4 }
  0xa6   :  { %634 = vmatpush.msra.mxu3 %v3684_v57  ;;  %613 = vmatpush.msra.mxu2 %v3677_v54  ;;  %vm391_vm7 = vmor %vm389_vm6, %vm390_vm5 }
  0xa7   :  { %v386_v44 = vsub.f32 1.0, %v385_v20  ;;  %v372_v37 = vsel %vm371_vm3, %v3052_v18, %v368_v31  ;;  %v395_v31 = vand.u32 2147483648, %v3808_v53  ;;  %596 = vmatpush.msra.mxu1 %v3709_v1  ;;  %578 = vmatpush.msra.mxu0 %v3732_v9  ;;  %v5979_v20 = vld [vmem:[#allocation36_spill] sm:$0xff] }
  0xa8   :  { %v377_v19 = vsel %vm374_vm4, %v376_v34, %v372_v37  ;;  %635 = vmatpush.msra.mxu3 %v3699_v62  ;;  %614 = vmatpush.msra.mxu2 %v3689_v58 }
  0xa9   :  { %v387_v39 = vmul.f32 %v3054_v6, %v386_v44  ;;  %v3839_v48 = vmul.f32 %v3056_v14, %v377_v19  ;;  %v396_v37 = vor.u32 1.1754944e-38, %v395_v31  ;;  %597 = vmatpush.msra.mxu1 %v3719_v5  ;;  %579 = vmatpush.msra.mxu0 %v3747_v17  ;;  %v5980_v14 = vld [vmem:[#allocation34_spill] sm:$0xff]  ;;  %v5981_v19 = vld [vmem:[#allocation35_spill] sm:$0xff]  ;;  %v5984_v31 = vld [vmem:[#allocation8_spill] sm:$0xff] }
  0xaa   :  { %636 = vmatpush.msra.mxu3 %v3712_v2  ;;  %615 = vmatpush.msra.mxu2 %v3728_v8 }
  0xab   :  { %v388_v18 = vadd.f32 %v3054_v6, %v387_v39  ;;  %3057 = vtanh.f32 %v3839_v48  ;;  %598 = vmatpush.msra.mxu1 %v3734_v10  ;;  %580 = vmatpush.msra.mxu0 %v5980_v14  ;;  %v5982_v39 = vld [vmem:[#allocation42_spill] sm:$0xff] }
  0xac   :  { %637 = vmatpush.msra.mxu3 %v3726_v7  ;;  %616 = vmatpush.msra.mxu2 %v3741_v13 }
  0xad   :  { %v392_v34 = vsel %vm391_vm7, %v3054_v6, %v388_v18  ;;  %v5978_v6 = vld [vmem:[#allocation32_spill] sm:$0xff]  ;;  %581 = vmatpush.msra.mxu0 %v3773_v63  ;;  %v5983_v18 = vld [vmem:[#allocation7_spill] sm:$0xff] }
  0xae   :  { %v397_v53 = vsel %vm394_vm8, %v396_v37, %v392_v34  ;;  %638 = vmatpush.msra.mxu3 %v3743_v16  ;;  %617 = vmatpush.msra.mxu2 %v3756_v36  ;;  %v5986_v34 = vld [vmem:[#allocation12_spill] sm:$0xff]  ;;  %v5987_v37 = vld [vmem:[#allocation11_spill] sm:$0xff] }
  0xaf   :  { %599 = vmatpush.msra.mxu1 %v5978_v6 }
  0xb0   :  { %639 = vmatpush.msra.mxu3 %v5979_v20  ;;  %618 = vmatpush.msra.mxu2 %v3771_v11 }
  0xb1   :  { %v3058_v44 = vpop.eup %3057  ;;  %600 = vmatpush.msra.mxu1 %v5981_v19 }
  0xb2   :  { %v3863_v42 = vmul.f32 %v3058_v44, %v397_v53  ;;  %640 = vmatpush.msra.mxu3 %v3779_v38  ;;  %619 = vmatpush.msra.mxu2 %v3783_v12  ;;  %v5988_v44 = vld [vmem:[#allocation13_spill] sm:$0xff]  ;;  %v5989_v53 = vld [vmem:[#allocation14_spill] sm:$0xff] }
  0xb3   :  { %601 = vmatpush.msra.mxu1 %v3777_v3 }
  0xb4   :  { %5977 = vst [vmem:[#allocation46_spill] sm:$0xff] %v3863_v42  ;;  %426 = vmatmul.f32.vlgmr.msrb.gmra.mxu0 %v3863_v42  ;;  %446 = vmatmul.f32.vlgmr.msrb.gmra.mxu1 %v3863_v42 }
  0xb5   :  { %466 = vmatmul.f32.vlgmr.msrb.gmra.mxu2 %v3863_v42  ;;  %486 = vmatmul.f32.vlgmr.msrb.gmra.mxu3 %v3863_v42  ;;  %v5990_v42 = vld [vmem:[#allocation15_spill] sm:$0xff] }
  0xb6   :  { %641 = vmatpush.msra.mxu3 %v5982_v39  ;;  %620 = vmatpush.msra.mxu2 %v3790_v59 }
  0xb7   :  { %722 = vmatpush.msrb.mxu0 %v5983_v18  ;;  %742 = vmatpush.msrb.mxu1 %v3556_v22 }
  0xb8   :  { %782 = vmatpush.msrb.mxu3 %v3534_v15  ;;  %621 = vmatpush.msra.mxu2 %v3798_v24 }
  0xb9   :  { %723 = vmatpush.msrb.mxu0 %v5984_v31  ;;  %743 = vmatpush.msrb.mxu1 %v3566_v25 }
  0xba   :  { %762 = vmatpush.msrb.mxu2 %v3573_v27  ;;  %783 = vmatpush.msrb.mxu3 %v5985_v32 }
  0xbb   :  { %724 = vmatpush.msrb.mxu0 %v3553_v21  ;;  %744 = vmatpush.msrb.mxu1 %v3579_v29 }
  0xbc   :  { %763 = vmatpush.msrb.mxu2 %v3591_v33  ;;  %784 = vmatpush.msrb.mxu3 %v3559_v23 }
  0xbd   :  { %725 = vmatpush.msrb.mxu0 %v3569_v26  ;;  %745 = vmatpush.msrb.mxu1 %v5986_v34 }
  0xbe   :  { %764 = vmatpush.msrb.mxu2 %v3630_v40  ;;  %785 = vmatpush.msrb.mxu3 %v3575_v28 }
  0xbf   :  { %726 = vmatpush.msrb.mxu0 %v3581_v30  ;;  %746 = vmatpush.msrb.mxu1 %v3598_v35  ;;  %v5991_v30 = vld [vmem:[#allocation16_spill] sm:$0xff] }
  0xc0   :  { %765 = vmatpush.msrb.mxu2 %v3633_v41  ;;  %786 = vmatpush.msrb.mxu3 %v5987_v37 }
  0xc1   :  { %727 = vmatpush.msrb.mxu0 %v5988_v44  ;;  %747 = vmatpush.msrb.mxu1 %v5989_v53 }
  0xc2   :  { %766 = vmatpush.msrb.mxu2 %v3639_v43  ;;  %787 = vmatpush.msrb.mxu3 %v5990_v42 }
  0xc3   :  { %728 = vmatpush.msrb.mxu0 %v3652_v46  ;;  %748 = vmatpush.msrb.mxu1 %v3654_v47 }
  0xc4   :  { %767 = vmatpush.msrb.mxu2 %v3647_v45  ;;  %788 = vmatpush.msrb.mxu3 %v5991_v30 }
  0xc5   :  { %729 = vmatpush.msrb.mxu0 %v3662_v50  ;;  %749 = vmatpush.msrb.mxu1 %v3664_v51 }
  0xc6   :  { %768 = vmatpush.msrb.mxu2 %v3660_v49  ;;  %789 = vmatpush.msrb.mxu3 %v3667_v52 }
  0xc7   :  { %730 = vmatpush.msrb.mxu0 %v3679_v55  ;;  %750 = vmatpush.msrb.mxu1 %v3681_v56 }
  0xc8   :  { %769 = vmatpush.msrb.mxu2 %v3677_v54  ;;  %790 = vmatpush.msrb.mxu3 %v3684_v57 }
  0xc9   :  { %731 = vmatpush.msrb.mxu0 %v3694_v60  ;;  %751 = vmatpush.msrb.mxu1 %v3696_v61 }
  0xca   :  { %770 = vmatpush.msrb.mxu2 %v3689_v58  ;;  %791 = vmatpush.msrb.mxu3 %v3699_v62 }
  0xcb   :  { %732 = vmatpush.msrb.mxu0 %v3707_v0  ;;  %752 = vmatpush.msrb.mxu1 %v3709_v1 }
  0xcc   :  { %771 = vmatpush.msrb.mxu2 %v3728_v8  ;;  %792 = vmatpush.msrb.mxu3 %v3712_v2 }
  0xcd   :  { %733 = vmatpush.msrb.mxu0 %v3717_v4  ;;  %753 = vmatpush.msrb.mxu1 %v3719_v5 }
  0xce   :  { %772 = vmatpush.msrb.mxu2 %v3741_v13  ;;  %793 = vmatpush.msrb.mxu3 %v3726_v7 }
  0xcf   :  { %734 = vmatpush.msrb.mxu0 %v3732_v9  ;;  %754 = vmatpush.msrb.mxu1 %v3734_v10 }
  0xd0   :  { %773 = vmatpush.msrb.mxu2 %v3756_v36  ;;  %794 = vmatpush.msrb.mxu3 %v3743_v16 }
  0xd1   :  { %735 = vmatpush.msrb.mxu0 %v3747_v17  ;;  %755 = vmatpush.msrb.mxu1 %v5978_v6  ;;  %v117_v6 = vpop.f32.mrf.mxu0  ;;  %v240_v17 = vpop.f32.mrf.mxu3 }
  0xd2   :  { %774 = vmatpush.msrb.mxu2 %v3771_v11  ;;  %795 = vmatpush.msrb.mxu3 %v5979_v20  ;;  %v158_v20 = vpop.f32.mrf.mxu1 }
  0xd3   :  { %736 = vmatpush.msrb.mxu0 %v5980_v14  ;;  %756 = vmatpush.msrb.mxu1 %v5981_v19  ;;  %v199_v19 = vpop.f32.mrf.mxu2 }
  0xd4   :  { %775 = vmatpush.msrb.mxu2 %v3783_v12  ;;  %796 = vmatpush.msrb.mxu3 %v3779_v38 }
  0xd5   :  { %737 = vmatpush.msrb.mxu0 %v3773_v63  ;;  %757 = vmatpush.msrb.mxu1 %v3777_v3 }
  0xd6   :  { %776 = vmatpush.msrb.mxu2 %v3790_v59  ;;  %797 = vmatpush.msrb.mxu3 %v5982_v39 }
  0xd8   :  { %777 = vmatpush.msrb.mxu2 %v3798_v24 }
  0xd9   :  { %v3947_v14 = vpop.f32.mrf.mxu0  ;;  %v3951_v16 = vpop.f32.mrf.mxu3 }
  0xda   :  { %5992 = vst [vmem:[#allocation7_spill] sm:$0xff] %v3947_v14  ;;  %v3949_v12 = vpop.f32.mrf.mxu1 }
  0xdb   :  { %5993 = vst [vmem:[#allocation8_spill] sm:$0xff] %v3949_v12  ;;  %v3957_v59 = vpop.f32.mrf.mxu2 }
  0xdc   :  { %5994 = vst [vmem:[#allocation9_spill] sm:$0xff] %v3951_v16 }
  0xdd   :  { %5997 = vst [vmem:[#allocation13_spill] sm:$0xff] %v3957_v59 }
  0xe1   :  { %v3953_v38 = vpop.f32.mrf.mxu0  ;;  %v3959_v3 = vpop.f32.mrf.mxu3 }
  0xe2   :  { %5995 = vst [vmem:[#allocation12_spill] sm:$0xff] %v3953_v38  ;;  %v3955_v63 = vpop.f32.mrf.mxu1 }
  0xe3   :  { %5996 = vst [vmem:[#allocation11_spill] sm:$0xff] %v3955_v63  ;;  %v3965_v11 = vpop.f32.mrf.mxu2 }
  0xe4   :  { %5998 = vst [vmem:[#allocation14_spill] sm:$0xff] %v3959_v3 }
  0xe5   :  { %6001 = vst [vmem:[#allocation47_spill] sm:$0xff] %v3965_v11 }
  0xe9   :  { %v3961_v39 = vpop.f32.mrf.mxu0  ;;  %v3967_v14 = vpop.f32.mrf.mxu3 }
  0xea   :  { %5999 = vst [vmem:[#allocation15_spill] sm:$0xff] %v3961_v39  ;;  %v3963_v24 = vpop.f32.mrf.mxu1 }
  0xeb   :  { %6000 = vst [vmem:[#allocation16_spill] sm:$0xff] %v3963_v24  ;;  %v3973_v16 = vpop.f32.mrf.mxu2 }
  0xec   :  { %6002 = vst [vmem:[#allocation48_spill] sm:$0xff] %v3967_v14  ;;  %v6013_v14 = vld [vmem:[#allocation17_spill] sm:$0xff] }
  0xed   :  { %6005 = vst [vmem:[#allocation51_spill] sm:$0xff] %v3973_v16 }
  0xf1   :  { %v3969_v12 = vpop.f32.mrf.mxu0  ;;  %v3975_v38 = vpop.f32.mrf.mxu3 }
  0xf2   :  { %6003 = vst [vmem:[#allocation49_spill] sm:$0xff] %v3969_v12  ;;  %v3971_v10 = vpop.f32.mrf.mxu1  ;;  %v3990_v12 = vperm.slane %v6013_v14, 1 }
  0xf3   :  { %6004 = vst [vmem:[#allocation50_spill] sm:$0xff] %v3971_v10  ;;  %v3981_v3 = vpop.f32.mrf.mxu2 }
  0xf4   :  { %6006 = vst [vmem:[#allocation52_spill] sm:$0xff] %v3975_v38  ;;  %v6017_v38 = vld [vmem:[#allocation19_spill] sm:$0xff] }
  0xf5   :  { %6009 = vst [vmem:[#allocation55_spill] sm:$0xff] %v3981_v3  ;;  %v118_v9 = vadd.f32 %v117_v6, %v6017_v38 }
  0xf6   :  { %6014 = vst [vmem:[#allocation17_spill] sm:$0xff] %v3990_v12 }
  0xf9   :  { %v3977_v63 = vpop.f32.mrf.mxu0  ;;  %v3983_v39 = vpop.f32.mrf.mxu3 }
  0xfa   :  { %6007 = vst [vmem:[#allocation53_spill] sm:$0xff] %v3977_v63  ;;  %v3979_v59 = vpop.f32.mrf.mxu1  ;;  %v159_v63 = vadd.f32 %v158_v20, %v3990_v12 }
  0xfb   :  { %6008 = vst [vmem:[#allocation54_spill] sm:$0xff] %v3979_v59  ;;  %v3992_v10 = vpop.f32.mrf.mxu2 }
  0xfc   :  { %6010 = vst [vmem:[#allocation56_spill] sm:$0xff] %v3983_v39 }
  0xfd   :  { %6015 = vst [vmem:[#allocation59_spill] sm:$0xff] %v3992_v10 }
 0x101   :  { %v3985_v24 = vpop.f32.mrf.mxu0  ;;  %v3994_v16 = vpop.f32.mrf.mxu3 }
 0x102   :  { %6011 = vst [vmem:[#allocation57_spill] sm:$0xff] %v3985_v24  ;;  %v3987_v11 = vpop.f32.mrf.mxu1  ;;  %v6018_v24 = vld [vmem:[#allocation28_spill] sm:$0xff] }
 0x103   :  { %6012 = vst [vmem:[#allocation58_spill] sm:$0xff] %v3987_v11  ;;  %v241_v11 = vadd.f32 %v240_v17, %v6018_v24  ;;  %v3999_v14 = vpop.f32.mrf.mxu2 }
 0x104   :  { %6016 = vst [vmem:[#allocation60_spill] sm:$0xff] %v3994_v16 }
 0x105   :  { %6019 = vst [vmem:[#allocation61_spill] sm:$0xff] %v3999_v14 }
 0x131   :  { %v427_v59 = vpop.f32.mrf.mxu0  ;;  %v447_v7 = vpop.f32.mrf.mxu1 }
 0x132   :  { %v490_v3 = vadd.f32 %v427_v59, %v118_v9  ;;  %v491_v36 = vadd.f32 %v447_v7, %v159_v63  ;;  %v6020_v7 = vld [vmem:[#allocation44_spill] sm:$0xff] }
 0x134   :  { %v2997_v39 = vmul.f32 -1.442695, %v490_v3  ;;  %v2998_v5 = vmul.f32 -1.442695, %v491_v36  ;;  %v200_v36 = vadd.f32 %v199_v19, %v6020_v7 }
 0x136   :  { %3059 = vpow2.f32 %v2997_v39 }
 0x137   :  { %3061 = vpow2.f32 %v2998_v5 }
 0x138   :  { %v487_v4 = vpop.f32.mrf.mxu3  ;;  %v467_v9 = vpop.f32.mrf.mxu2 }
 0x139   :  { %v493_v10 = vadd.f32 %v487_v4, %v241_v11  ;;  %v492_v17 = vadd.f32 %v467_v9, %v200_v36 }
 0x13b   :  { %v2999_v2 = vmul.f32 -1.442695, %v493_v10 }
 0x13c   :  { %v3060_v16 = vpop.eup %3059 }
 0x13d   :  { %v3062_v13 = vpop.eup %3061  ;;  %v500_v6 = vadd.f32 1.0, %v3060_v16  ;;  %3063 = vpow2.f32 %v2999_v2 }
 0x13e   :  { %v501_v20 = vadd.f32 1.0, %v3062_v13 }
 0x13f   :  { %3065 = vrcp.f32 %v500_v6  ;;  %v513_v11 = vand.u32 2147483648, %v500_v6  ;;  %v511_v13 = vand.u32 2147483647, %v500_v6  ;;  %vm507_vm11 = vweird.f32 %v500_v6 }
 0x140   :  { %3067 = vrcp.f32 %v501_v20  ;;  %v528_v16 = vand.u32 2147483648, %v501_v20  ;;  %v526_v12 = vand.u32 2147483647, %v501_v20  ;;  %vm522_vm12 = vweird.f32 %v501_v20 }
 0x141   :  { %v514_v9 = vor.u32 1.1754944e-38, %v513_v11  ;;  %vm512_vm15 = vcmp.eq.f32.partialorder %v511_v13, 8.507059e+37 }
 0x142   :  { %vm527_vm0 = vcmp.eq.f32.partialorder %v526_v12, 8.507059e+37 }
 0x143   :  { %v3064_v63 = vpop.eup %3063 }
 0x144   :  { %v536_v59 = vadd.f32 1.0, %v3064_v63 }
 0x145   :  { %v3066_v3 = vpop.eup %3065 }
 0x146   :  { %v3068_v5 = vpop.eup %3067  ;;  %v503_v39 = vmul.f32 %v3066_v3, %v500_v6  ;;  %3069 = vrcp.f32 %v536_v59  ;;  %vm508_vm9 = vweird.f32 %v3066_v3  ;;  %vm542_vm2 = vweird.f32 %v536_v59 }
 0x147   :  { %v518_v14 = vmul.f32 %v3068_v5, %v501_v20  ;;  %3071 = vtanh.f32 %v492_v17  ;;  %vm523_vm10 = vweird.f32 %v3068_v5  ;;  %vm509_vm13 = vmor %vm507_vm11, %vm508_vm9 }
 0x148   :  { %v504_v4 = vsub.f32 1.0, %v503_v39  ;;  %vm524_vm14 = vmor %vm522_vm12, %vm523_vm10  ;;  %v529_v39 = vor.u32 1.1754944e-38, %v528_v16 }
 0x149   :  { %v519_v10 = vsub.f32 1.0, %v518_v14 }
 0x14a   :  { %v505_v2 = vmul.f32 %v3066_v3, %v504_v4 }
 0x14b   :  { %v520_v24 = vmul.f32 %v3068_v5, %v519_v10 }
 0x14c   :  { %v3070_v38 = vpop.eup %3069  ;;  %v506_v19 = vadd.f32 %v3066_v3, %v505_v2 }
 0x14d   :  { %v521_v63 = vadd.f32 %v3068_v5, %v520_v24  ;;  %v538_v36 = vmul.f32 %v3070_v38, %v536_v59  ;;  %v3072_v17 = vpop.eup %3071  ;;  %vm543_vm1 = vweird.f32 %v3070_v38  ;;  %v548_v24 = vand.u32 2147483648, %v536_v59 }
 0x14e   :  { %v510_v14 = vsel %vm509_vm13, %v3066_v3, %v506_v19  ;;  %v546_v3 = vand.u32 2147483647, %v536_v59  ;;  %vm544_vm3 = vmor %vm542_vm2, %vm543_vm1 }
 0x14f   :  { %v515_v7 = vsel %vm512_vm15, %v514_v9, %v510_v14  ;;  %v525_v4 = vsel %vm524_vm14, %v3068_v5, %v521_v63  ;;  %v539_v1 = vsub.f32 1.0, %v538_v36  ;;  %v549_v16 = vor.u32 1.1754944e-38, %v548_v24  ;;  %v6054_v14 = vld [vmem:[#allocation44_spill] sm:$0xff] }
 0x150   :  { %v530_v10 = vsel %vm527_vm0, %v529_v39, %v525_v4  ;;  %v553_v0 = vmul.f32 %v3072_v17, %v515_v7  ;;  %vm547_vm4 = vcmp.eq.f32.partialorder %v546_v3, 8.507059e+37  ;;  %v6055_v17 = vld [vmem:[#allocation13_spill] sm:$0xff] }
 0x151   :  { %v552_v62 = vmul.f32 %v530_v10, %v3839_v48  ;;  %v540_v2 = vmul.f32 %v3070_v38, %v539_v1  ;;  %v6040_v48 = vld [vmem:[#allocation34_spill] sm:$0xff]  ;;  %v203_v4 = vadd.f32 %v6055_v17, %v6054_v14  ;;  %v4124_v17 = vld [vmem:[#allocation4 + $0x1b0] sm:$0xff] }
 0x153   :  { %v4003_v6 = vadd.f32 %v553_v0, %v552_v62  ;;  %v541_v20 = vadd.f32 %v3070_v38, %v540_v2  ;;  %v6051_v62 = vld [vmem:[#allocation8_spill] sm:$0xff] }
 0x155   :  { %3073 = vtanh.f32 %v4003_v6  ;;  %v545_v11 = vsel %vm544_vm3, %v3070_v38, %v541_v20 }
 0x156   :  { %v550_v5 = vsel %vm547_vm4, %v549_v16, %v545_v11 }
 0x15b   :  { %v3074_v12 = vpop.eup %3073 }
 0x15c   :  { %v4006_v13 = vmul.f32 %v3074_v12, %v550_v5 }
 0x15e   :  { %6021 = vst [vmem:[#allocation62_spill] sm:$0xff] %v4006_v13  ;;  %582 = vmatmul.f32.vlgmr.msra.gmra.mxu0 %v4006_v13  ;;  %602 = vmatmul.f32.vlgmr.msra.gmra.mxu1 %v4006_v13 }
 0x15f   :  { %622 = vmatmul.f32.vlgmr.msra.gmra.mxu2 %v4006_v13  ;;  %642 = vmatmul.f32.vlgmr.msra.gmra.mxu3 %v4006_v13  ;;  %v4243_v13 = vld [vmem:[#allocation4 + $0x78] sm:$0xff] }
 0x160   :  { %878 = vmatpush.msra.mxu0 %v5983_v18  ;;  %898 = vmatpush.msra.mxu1 %v3556_v22  ;;  %v6024_v22 = vld [vmem:[#allocation20_spill] sm:$0xff] }
 0x161   :  { %918 = vmatpush.msra.mxu2 %v3573_v27  ;;  %938 = vmatpush.msra.mxu3 %v3534_v15  ;;  %v6022_v15 = vld [vmem:[#allocation10_spill] sm:$0xff]  ;;  %v6028_v27 = vld [vmem:[#allocation23_spill] sm:$0xff] }
 0x162   :  { %879 = vmatpush.msra.mxu0 %v5984_v31  ;;  %899 = vmatpush.msra.mxu1 %v3566_v25  ;;  %v6026_v25 = vld [vmem:[#allocation29_spill] sm:$0xff] }
 0x163   :  { %919 = vmatpush.msra.mxu2 %v3591_v33  ;;  %939 = vmatpush.msra.mxu3 %v5985_v32  ;;  %v6032_v33 = vld [vmem:[#allocation26_spill] sm:$0xff]  ;;  %v6052_v32 = vld [vmem:[#allocation28_spill] sm:$0xff] }
 0x164   :  { %880 = vmatpush.msra.mxu0 %v3553_v21  ;;  %900 = vmatpush.msra.mxu1 %v3579_v29  ;;  %v6023_v21 = vld [vmem:[#allocation18_spill] sm:$0xff]  ;;  %v6030_v29 = vld [vmem:[#allocation33_spill] sm:$0xff] }
 0x165   :  { %920 = vmatpush.msra.mxu2 %v3630_v40  ;;  %940 = vmatpush.msra.mxu3 %v3559_v23  ;;  %v6025_v23 = vld [vmem:[#allocation21_spill] sm:$0xff] }
 0x166   :  { %881 = vmatpush.msra.mxu0 %v3569_v26  ;;  %901 = vmatpush.msra.mxu1 %v5986_v34  ;;  %v6027_v26 = vld [vmem:[#allocation22_spill] sm:$0xff]  ;;  %v6034_v40 = vld [vmem:[#allocation37_spill] sm:$0xff] }
 0x167   :  { %921 = vmatpush.msra.mxu2 %v3633_v41  ;;  %941 = vmatpush.msra.mxu3 %v3575_v28  ;;  %v6029_v28 = vld [vmem:[#allocation24_spill] sm:$0xff]  ;;  %v6035_v41 = vld [vmem:[#allocation30_spill] sm:$0xff]  ;;  %v6053_v34 = vld [vmem:[#allocation9_spill] sm:$0xff]  ;;  %6068 = vst [vmem:[#allocation37_spill] sm:$0xff] %v4243_v13 }
 0x168   :  { %882 = vmatpush.msra.mxu0 %v6022_v15  ;;  %902 = vmatpush.msra.mxu1 %v3598_v35  ;;  %v6033_v35 = vld [vmem:[#allocation27_spill] sm:$0xff] }
 0x169   :  { %922 = vmatpush.msra.mxu2 %v3639_v43  ;;  %942 = vmatpush.msra.mxu3 %v5987_v37  ;;  %v6036_v43 = vld [vmem:[#allocation31_spill] sm:$0xff]  ;;  %v244_v37 = vadd.f32 %v6053_v34, %v6052_v32 }
 0x16a   :  { %883 = vmatpush.msra.mxu0 %v5988_v44  ;;  %903 = vmatpush.msra.mxu1 %v5989_v53 }
 0x16b   :  { %923 = vmatpush.msra.mxu2 %v3647_v45  ;;  %943 = vmatpush.msra.mxu3 %v5990_v42  ;;  %v6037_v45 = vld [vmem:[#allocation32_spill] sm:$0xff] }
 0x16c   :  { %884 = vmatpush.msra.mxu0 %v3652_v46  ;;  %904 = vmatpush.msra.mxu1 %v3654_v47  ;;  %v6038_v46 = vld [vmem:[#allocation41_spill] sm:$0xff]  ;;  %v6039_v47 = vld [vmem:[#allocation36_spill] sm:$0xff] }
 0x16d   :  { %924 = vmatpush.msra.mxu2 %v3660_v49  ;;  %944 = vmatpush.msra.mxu3 %v5991_v30  ;;  %v6031_v30 = vld [vmem:[#allocation25_spill] sm:$0xff]  ;;  %v6041_v49 = vld [vmem:[#allocation35_spill] sm:$0xff] }
 0x16e   :  { %885 = vmatpush.msra.mxu0 %v3662_v50  ;;  %905 = vmatpush.msra.mxu1 %v3664_v51  ;;  %v6042_v50 = vld [vmem:[#allocation43_spill] sm:$0xff]  ;;  %v6043_v51 = vld [vmem:[#allocation40_spill] sm:$0xff] }
 0x16f   :  { %925 = vmatpush.msra.mxu2 %v3677_v54  ;;  %945 = vmatpush.msra.mxu3 %v3667_v52  ;;  %v6044_v52 = vld [vmem:[#allocation38_spill] sm:$0xff]  ;;  %v6045_v54 = vld [vmem:[#allocation39_spill] sm:$0xff] }
 0x170   :  { %886 = vmatpush.msra.mxu0 %v3679_v55  ;;  %906 = vmatpush.msra.mxu1 %v3681_v56  ;;  %v6046_v55 = vld [vmem:[#allocation45_spill] sm:$0xff]  ;;  %v6047_v56 = vld [vmem:[#allocation42_spill] sm:$0xff] }
 0x171   :  { %926 = vmatpush.msra.mxu2 %v3689_v58  ;;  %946 = vmatpush.msra.mxu3 %v3684_v57  ;;  %v6048_v57 = vld [vmem:[#allocation19_spill] sm:$0xff] }
 0x172   :  { %887 = vmatpush.msra.mxu0 %v3694_v60  ;;  %907 = vmatpush.msra.mxu1 %v3696_v61  ;;  %v6049_v58 = vld [vmem:[#allocation7_spill] sm:$0xff]  ;;  %v6050_v61 = vld [vmem:[#allocation17_spill] sm:$0xff] }
 0x173   :  { %927 = vmatpush.msra.mxu2 %v3728_v8  ;;  %947 = vmatpush.msra.mxu3 %v6023_v21  ;;  %v121_v60 = vadd.f32 %v6049_v58, %v6048_v57  ;;  %v162_v0 = vadd.f32 %v6051_v62, %v6050_v61 }
 0x174   :  { %888 = vmatpush.msra.mxu0 %v6024_v22  ;;  %908 = vmatpush.msra.mxu1 %v6025_v23 }
 0x175   :  { %928 = vmatpush.msra.mxu2 %v6026_v25  ;;  %948 = vmatpush.msra.mxu3 %v6027_v26 }
 0x176   :  { %889 = vmatpush.msra.mxu0 %v6028_v27  ;;  %909 = vmatpush.msra.mxu1 %v6029_v28 }
 0x177   :  { %929 = vmatpush.msra.mxu2 %v6030_v29  ;;  %949 = vmatpush.msra.mxu3 %v6031_v30 }
 0x178   :  { %890 = vmatpush.msra.mxu0 %v6032_v33  ;;  %910 = vmatpush.msra.mxu1 %v6033_v35 }
 0x179   :  { %930 = vmatpush.msra.mxu2 %v6034_v40  ;;  %950 = vmatpush.msra.mxu3 %v6035_v41 }
 0x17a   :  { %891 = vmatpush.msra.mxu0 %v6036_v43  ;;  %911 = vmatpush.msra.mxu1 %v6037_v45 }
 0x17b   :  { %931 = vmatpush.msra.mxu2 %v6038_v46  ;;  %951 = vmatpush.msra.mxu3 %v6039_v47 }
 0x17c   :  { %892 = vmatpush.msra.mxu0 %v6040_v48  ;;  %912 = vmatpush.msra.mxu1 %v6041_v49 }
 0x17d   :  { %932 = vmatpush.msra.mxu2 %v6042_v50  ;;  %952 = vmatpush.msra.mxu3 %v6043_v51 }
 0x17e   :  { %893 = vmatpush.msra.mxu0 %v6044_v52  ;;  %913 = vmatpush.msra.mxu1 %v6045_v54 }
 0x17f   :  { %933 = vmatpush.msra.mxu2 %v6046_v55  ;;  %953 = vmatpush.msra.mxu3 %v6047_v56 }
 0x1db   :  { %v583_v1 = vpop.f32.mrf.mxu0  ;;  %v603_v8 = vpop.f32.mrf.mxu1 }
 0x1dc   :  { %v646_v38 = vadd.f32 %v583_v1, %v121_v60  ;;  %v647_v42 = vadd.f32 %v603_v8, %v162_v0 }
 0x1de   :  { %v3000_v18 = vmul.f32 -1.442695, %v646_v38  ;;  %v3001_v31 = vmul.f32 -1.442695, %v647_v42 }
 0x1e0   :  { %3075 = vpow2.f32 %v3000_v18 }
 0x1e1   :  { %3077 = vpow2.f32 %v3001_v31 }
 0x1e2   :  { %v643_v44 = vpop.f32.mrf.mxu3  ;;  %v623_v36 = vpop.f32.mrf.mxu2 }
 0x1e3   :  { %v649_v53 = vadd.f32 %v643_v44, %v244_v37  ;;  %v648_v20 = vadd.f32 %v623_v36, %v203_v4  ;;  %v4097_v44 = vld [vmem:[#allocation4 + $0x1e8] sm:$0xff]  ;;  %v4118_v36 = vld [vmem:[#allocation4 + $0x1a0] sm:$0xff]  ;;  %v4127_v4 = vld [vmem:[#allocation4 + $0x1b8] sm:$0xff] }
 0x1e5   :  { %v3002_v7 = vmul.f32 -1.442695, %v649_v53  ;;  %v4100_v53 = vld [vmem:[#allocation4 + $0x1f0] sm:$0xff] }
 0x1e6   :  { %v3076_v59 = vpop.eup %3075 }
 0x1e7   :  { %v3078_v19 = vpop.eup %3077  ;;  %v656_v9 = vadd.f32 1.0, %v3076_v59  ;;  %3079 = vpow2.f32 %v3002_v7  ;;  %v4103_v7 = vld [vmem:[#allocation4 + $0x1f8] sm:$0xff]  ;;  %v4106_v59 = vld [vmem:[#allocation4 + $0x1c0] sm:$0xff] }
 0x1e8   :  { %v657_v63 = vadd.f32 1.0, %v3078_v19  ;;  %v4109_v19 = vld [vmem:[#allocation4 + $0x1c8] sm:$0xff] }
 0x1e9   :  { %3081 = vrcp.f32 %v656_v9  ;;  %v669_v5 = vand.u32 2147483648, %v656_v9  ;;  %v667_v22 = vand.u32 2147483647, %v656_v9  ;;  %vm663_vm7 = vweird.f32 %v656_v9 }
 0x1ea   :  { %3083 = vrcp.f32 %v657_v63  ;;  %v684_v15 = vand.u32 2147483648, %v657_v63  ;;  %v682_v25 = vand.u32 2147483647, %v657_v63  ;;  %vm678_vm8 = vweird.f32 %v657_v63 }
 0x1eb   :  { %v670_v28 = vor.u32 1.1754944e-38, %v669_v5  ;;  %vm668_vm11 = vcmp.eq.f32.partialorder %v667_v22, 8.507059e+37  ;;  %v4154_v5 = vld [vmem:[#allocation4 + $0x140] sm:$0xff]  ;;  %v4163_v22 = vld [vmem:[#allocation4 + $0x158] sm:$0xff] }
 0x1ec   :  { %v685_v35 = vor.u32 1.1754944e-38, %v684_v15  ;;  %vm683_vm12 = vcmp.eq.f32.partialorder %v682_v25, 8.507059e+37  ;;  %v4157_v15 = vld [vmem:[#allocation4 + $0x148] sm:$0xff] }
 0x1ed   :  { %v3080_v39 = vpop.eup %3079  ;;  %v4169_v25 = vld [vmem:[#allocation4 + $0x128] sm:$0xff] }
 0x1ee   :  { %v692_v10 = vadd.f32 1.0, %v3080_v39  ;;  %v4121_v39 = vld [vmem:[#allocation4 + $0x1a8] sm:$0xff] }
 0x1ef   :  { %v3082_v2 = vpop.eup %3081 }
 0x1f0   :  { %v3084_v24 = vpop.eup %3083  ;;  %v659_v3 = vmul.f32 %v3082_v2, %v656_v9  ;;  %3085 = vrcp.f32 %v692_v10  ;;  %vm664_vm5 = vweird.f32 %v3082_v2  ;;  %v704_v8 = vand.u32 2147483648, %v692_v10  ;;  %v4112_v9 = vld [vmem:[#allocation4 + $0x1d0] sm:$0xff] }
 0x1f1   :  { %v674_v11 = vmul.f32 %v3084_v24, %v657_v63  ;;  %3087 = vtanh.f32 %v648_v20  ;;  %vm679_vm6 = vweird.f32 %v3084_v24  ;;  %vm665_vm9 = vmor %vm663_vm7, %vm664_vm5  ;;  %vm698_vm14 = vweird.f32 %v692_v10  ;;  %v4115_v63 = vld [vmem:[#allocation4 + $0x1d8] sm:$0xff]  ;;  %v4136_v20 = vld [vmem:[#allocation4 + $0x190] sm:$0xff] }
 0x1f2   :  { %v660_v16 = vsub.f32 1.0, %v659_v3  ;;  %vm680_vm10 = vmor %vm678_vm8, %vm679_vm6  ;;  %v702_v38 = vand.u32 2147483647, %v692_v10  ;;  %v705_v18 = vor.u32 1.1754944e-38, %v704_v8  ;;  %v4142_v3 = vld [vmem:[#allocation4 + $0x160] sm:$0xff]  ;;  %v4220_v8 = vld [vmem:[#allocation4 + $0xb0] sm:$0xff] }
 0x1f3   :  { %v675_v12 = vsub.f32 1.0, %v674_v11  ;;  %v4145_v11 = vld [vmem:[#allocation4 + $0x168] sm:$0xff]  ;;  %6061 = vst [vmem:[#allocation22_spill] sm:$0xff] %v4220_v8 }
 0x1f4   :  { %v661_v21 = vmul.f32 %v3082_v2, %v660_v16  ;;  %vm703_vm0 = vcmp.eq.f32.partialorder %v702_v38, 8.507059e+37  ;;  %v4148_v16 = vld [vmem:[#allocation4 + $0x170] sm:$0xff]  ;;  %v4223_v38 = vld [vmem:[#allocation4 + $0xb8] sm:$0xff] }
 0x1f5   :  { %v676_v23 = vmul.f32 %v3084_v24, %v675_v12  ;;  %v4151_v12 = vld [vmem:[#allocation4 + $0x178] sm:$0xff]  ;;  %6062 = vst [vmem:[#allocation23_spill] sm:$0xff] %v4223_v38 }
 0x1f6   :  { %v3086_v26 = vpop.eup %3085  ;;  %v662_v27 = vadd.f32 %v3082_v2, %v661_v21  ;;  %v4160_v21 = vld [vmem:[#allocation4 + $0x150] sm:$0xff] }
 0x1f7   :  { %v677_v30 = vadd.f32 %v3084_v24, %v676_v23  ;;  %v694_v33 = vmul.f32 %v3086_v26, %v692_v10  ;;  %v3088_v43 = vpop.eup %3087  ;;  %vm699_vm13 = vweird.f32 %v3086_v26  ;;  %v4130_v10 = vld [vmem:[#allocation4 + $0x180] sm:$0xff] }
 0x1f8   :  { %v666_v41 = vsel %vm665_vm9, %v3082_v2, %v662_v27  ;;  %vm700_vm15 = vmor %vm698_vm14, %vm699_vm13  ;;  %v4133_v2 = vld [vmem:[#allocation4 + $0x188] sm:$0xff]  ;;  %v4166_v23 = vld [vmem:[#allocation4 + $0x120] sm:$0xff] }
 0x1f9   :  { %v671_v45 = vsel %vm668_vm11, %v670_v28, %v666_v41  ;;  %v681_v47 = vsel %vm680_vm10, %v3084_v24, %v677_v30  ;;  %v695_v48 = vsub.f32 1.0, %v694_v33  ;;  %v4139_v24 = vld [vmem:[#allocation4 + $0x198] sm:$0xff]  ;;  %v4178_v28 = vld [vmem:[#allocation4 + $0x100] sm:$0xff]  ;;  %v4181_v30 = vld [vmem:[#allocation4 + $0x108] sm:$0xff] }
 0x1fa   :  { %v686_v49 = vsel %vm683_vm12, %v685_v35, %v681_v47  ;;  %v709_v58 = vmul.f32 %v3088_v43, %v671_v45  ;;  %v4175_v27 = vld [vmem:[#allocation4 + $0x138] sm:$0xff]  ;;  %v4184_v33 = vld [vmem:[#allocation4 + $0x110] sm:$0xff]  ;;  %v4190_v41 = vld [vmem:[#allocation4 + $0xe0] sm:$0xff] }
 0x1fb   :  { %v708_v60 = vmul.f32 %v686_v49, %v4003_v6  ;;  %v696_v62 = vmul.f32 %v3086_v26, %v695_v48  ;;  %v4094_v6 = vld [vmem:[#allocation4 + $0x1e0] sm:$0xff]  ;;  %v4187_v35 = vld [vmem:[#allocation4 + $0x118] sm:$0xff]  ;;  %v4193_v43 = vld [vmem:[#allocation4 + $0xe8] sm:$0xff] }
 0x1fc   :  { %v4196_v45 = vld [vmem:[#allocation4 + $0xf0] sm:$0xff]  ;;  %v4199_v47 = vld [vmem:[#allocation4 + $0xf8] sm:$0xff]  ;;  %v4202_v48 = vld [vmem:[#allocation4 + $0xc0] sm:$0xff] }
 0x1fd   :  { %v4085_v0 = vadd.f32 %v709_v58, %v708_v60  ;;  %v697_v1 = vadd.f32 %v3086_v26, %v696_v62  ;;  %v4205_v49 = vld [vmem:[#allocation4 + $0xc8] sm:$0xff]  ;;  %v4208_v58 = vld [vmem:[#allocation4 + $0xd0] sm:$0xff]  ;;  %v4211_v60 = vld [vmem:[#allocation4 + $0xd8] sm:$0xff] }
 0x1fe   :  { %6057 = vst [vmem:[#allocation18_spill] sm:$0xff] %v4208_v58  ;;  %v4214_v62 = vld [vmem:[#allocation4 + $0xa0] sm:$0xff] }
 0x1ff   :  { %3089 = vtanh.f32 %v4085_v0  ;;  %v701_v42 = vsel %vm700_vm15, %v3086_v26, %v697_v1  ;;  %v4172_v26 = vld [vmem:[#allocation4 + $0x130] sm:$0xff]  ;;  %6058 = vst [vmem:[#allocation20_spill] sm:$0xff] %v4211_v60  ;;  %v4217_v1 = vld [vmem:[#allocation4 + $0xa8] sm:$0xff] }
 0x200   :  { %v706_v34 = vsel %vm703_vm0, %v705_v18, %v701_v42  ;;  %6059 = vst [vmem:[#allocation21_spill] sm:$0xff] %v4214_v62  ;;  %v4226_v42 = vld [vmem:[#allocation4 + $0x80] sm:$0xff]  ;;  %v4229_v18 = vld [vmem:[#allocation4 + $0x88] sm:$0xff] }
 0x201   :  { %6060 = vst [vmem:[#allocation29_spill] sm:$0xff] %v4217_v1 }
 0x202   :  { %6063 = vst [vmem:[#allocation24_spill] sm:$0xff] %v4226_v42 }
 0x203   :  { %6064 = vst [vmem:[#allocation33_spill] sm:$0xff] %v4229_v18 }
 0x205   :  { %v3090_v31 = vpop.eup %3089 }
 0x206   :  { %v4088_v37 = vmul.f32 %v3090_v31, %v706_v34  ;;  %v4233_v31 = vld [vmem:[#allocation4 + $0x98] sm:$0xff]  ;;  %v4236_v34 = vld [vmem:[#allocation4 + $0x60] sm:$0xff] }
 0x207   :  { %6065 = vst [vmem:[#allocation25_spill] sm:$0xff] %v4233_v31 }
 0x208   :  { %6056 = vst [vmem:[#allocation10_spill] sm:$0xff] %v4088_v37  ;;  %738 = vmatmul.f32.vlgmr.msrb.gmra.mxu0 %v4088_v37  ;;  %758 = vmatmul.f32.vlgmr.msrb.gmra.mxu1 %v4088_v37 }
 0x209   :  { %778 = vmatmul.f32.vlgmr.msrb.gmra.mxu2 %v4088_v37  ;;  %798 = vmatmul.f32.vlgmr.msrb.gmra.mxu3 %v4088_v37  ;;  %6066 = vst [vmem:[#allocation26_spill] sm:$0xff] %v4236_v34  ;;  %v4239_v37 = vld [vmem:[#allocation4 + $0x68] sm:$0xff] }
 0x20a   :  { %1034 = vmatpush.msrb.mxu0 %v4094_v6  ;;  %1054 = vmatpush.msrb.mxu1 %v4097_v44  ;;  %6067 = vst [vmem:[#allocation27_spill] sm:$0xff] %v4239_v37 }
 0x20b   :  { %1074 = vmatpush.msrb.mxu2 %v4100_v53  ;;  %1094 = vmatpush.msrb.mxu3 %v4103_v7 }
 0x20c   :  { %1035 = vmatpush.msrb.mxu0 %v4106_v59  ;;  %1055 = vmatpush.msrb.mxu1 %v4109_v19 }
 0x20d   :  { %1075 = vmatpush.msrb.mxu2 %v4112_v9  ;;  %1095 = vmatpush.msrb.mxu3 %v4115_v63 }
 0x20e   :  { %1036 = vmatpush.msrb.mxu0 %v4118_v36  ;;  %1056 = vmatpush.msrb.mxu1 %v4121_v39 }
 0x20f   :  { %1076 = vmatpush.msrb.mxu2 %v4124_v17  ;;  %1096 = vmatpush.msrb.mxu3 %v4127_v4 }
 0x210   :  { %1037 = vmatpush.msrb.mxu0 %v4130_v10  ;;  %1057 = vmatpush.msrb.mxu1 %v4133_v2 }
 0x211   :  { %1077 = vmatpush.msrb.mxu2 %v4136_v20  ;;  %1097 = vmatpush.msrb.mxu3 %v4139_v24 }
 0x212   :  { %1038 = vmatpush.msrb.mxu0 %v4142_v3  ;;  %1058 = vmatpush.msrb.mxu1 %v4145_v11 }
 0x213   :  { %1078 = vmatpush.msrb.mxu2 %v4148_v16  ;;  %1098 = vmatpush.msrb.mxu3 %v4151_v12 }
 0x214   :  { %1039 = vmatpush.msrb.mxu0 %v4154_v5  ;;  %1059 = vmatpush.msrb.mxu1 %v4157_v15 }
 0x215   :  { %1079 = vmatpush.msrb.mxu2 %v4160_v21  ;;  %1099 = vmatpush.msrb.mxu3 %v4163_v22 }
 0x216   :  { %1040 = vmatpush.msrb.mxu0 %v4166_v23  ;;  %1060 = vmatpush.msrb.mxu1 %v4169_v25 }
 0x217   :  { %1080 = vmatpush.msrb.mxu2 %v4172_v26  ;;  %1100 = vmatpush.msrb.mxu3 %v4175_v27 }
 0x218   :  { %1041 = vmatpush.msrb.mxu0 %v4178_v28  ;;  %1061 = vmatpush.msrb.mxu1 %v4181_v30 }
 0x219   :  { %1081 = vmatpush.msrb.mxu2 %v4184_v33  ;;  %1101 = vmatpush.msrb.mxu3 %v4187_v35 }
 0x21a   :  { %1042 = vmatpush.msrb.mxu0 %v4190_v41  ;;  %1062 = vmatpush.msrb.mxu1 %v4193_v43 }
 0x21b   :  { %1082 = vmatpush.msrb.mxu2 %v4196_v45  ;;  %1102 = vmatpush.msrb.mxu3 %v4199_v47 }
 0x21c   :  { %1043 = vmatpush.msrb.mxu0 %v4202_v48  ;;  %1063 = vmatpush.msrb.mxu1 %v4205_v49 }
 0x21d   :  { %1083 = vmatpush.msrb.mxu2 %v4208_v58  ;;  %1103 = vmatpush.msrb.mxu3 %v4211_v60 }
 0x21e   :  { %1044 = vmatpush.msrb.mxu0 %v4214_v62  ;;  %1064 = vmatpush.msrb.mxu1 %v4217_v1 }
 0x21f   :  { %1084 = vmatpush.msrb.mxu2 %v4220_v8  ;;  %1104 = vmatpush.msrb.mxu3 %v4223_v38 }
 0x220   :  { %1045 = vmatpush.msrb.mxu0 %v4226_v42  ;;  %1065 = vmatpush.msrb.mxu1 %v4229_v18  ;;  %v4246_v18 = vld [vmem:[#allocation4 + $0x40] sm:$0xff] }
 0x221   :  { %1085 = vmatpush.msrb.mxu2 %v6030_v29  ;;  %1105 = vmatpush.msrb.mxu3 %v4233_v31  ;;  %6069 = vst [vmem:[#allocation30_spill] sm:$0xff] %v4246_v18  ;;  %v4249_v29 = vld [vmem:[#allocation4 + $0x48] sm:$0xff] }
 0x222   :  { %1046 = vmatpush.msrb.mxu0 %v4236_v34  ;;  %1066 = vmatpush.msrb.mxu1 %v4239_v37  ;;  %6070 = vst [vmem:[#allocation31_spill] sm:$0xff] %v4249_v29  ;;  %v4253_v34 = vld [vmem:[#allocation4 + $0x58] sm:$0xff]  ;;  %v4256_v37 = vld [vmem:[#allocation4 + $0x20] sm:$0xff] }
 0x223   :  { %1086 = vmatpush.msrb.mxu2 %v6034_v40  ;;  %1106 = vmatpush.msrb.mxu3 %v4243_v13  ;;  %6071 = vst [vmem:[#allocation32_spill] sm:$0xff] %v4253_v34  ;;  %v4259_v40 = vld [vmem:[#allocation4 + $0x28] sm:$0xff] }
 0x224   :  { %1047 = vmatpush.msrb.mxu0 %v4246_v18  ;;  %1067 = vmatpush.msrb.mxu1 %v4249_v29  ;;  %6072 = vst [vmem:[#allocation41_spill] sm:$0xff] %v4256_v37 }
 0x225   :  { %1087 = vmatpush.msrb.mxu2 %v6038_v46  ;;  %1107 = vmatpush.msrb.mxu3 %v4253_v34  ;;  %6073 = vst [vmem:[#allocation36_spill] sm:$0xff] %v4259_v40  ;;  %v6074_v46 = vld [vmem:[#allocation12_spill] sm:$0xff] }
 0x226   :  { %1048 = vmatpush.msrb.mxu0 %v4256_v37  ;;  %1068 = vmatpush.msrb.mxu1 %v4259_v40  ;;  %v124_v34 = vadd.f32 %v6074_v46, %v6048_v57  ;;  %v6075_v37 = vld [vmem:[#allocation11_spill] sm:$0xff] }
 0x227   :  { %1088 = vmatpush.msrb.mxu2 %v6042_v50  ;;  %1108 = vmatpush.msrb.mxu3 %v6043_v51  ;;  %v165_v29 = vadd.f32 %v6075_v37, %v6050_v61 }
 0x228   :  { %1049 = vmatpush.msrb.mxu0 %v6044_v52  ;;  %1069 = vmatpush.msrb.mxu1 %v6045_v54  ;;  %v6076_v52 = vld [vmem:[#allocation14_spill] sm:$0xff] }
 0x229   :  { %1089 = vmatpush.msrb.mxu2 %v6046_v55  ;;  %1109 = vmatpush.msrb.mxu3 %v6047_v56  ;;  %v247_v54 = vadd.f32 %v6076_v52, %v6052_v32 }
 0x285   :  { %v739_v18 = vpop.f32.mrf.mxu0  ;;  %v759_v40 = vpop.f32.mrf.mxu1 }
 0x286   :  { %v802_v13 = vadd.f32 %v739_v18, %v124_v34  ;;  %v803_v50 = vadd.f32 %v759_v40, %v165_v29 }
 0x288   :  { %v3003_v31 = vmul.f32 -1.442695, %v802_v13  ;;  %v3004_v51 = vmul.f32 -1.442695, %v803_v50  ;;  %v6077_v13 = vld [vmem:[#allocation47_spill] sm:$0xff] }
 0x289   :  { %v206_v34 = vadd.f32 %v6077_v13, %v6054_v14 }
 0x28a   :  { %3091 = vpow2.f32 %v3003_v31 }
 0x28b   :  { %3093 = vpow2.f32 %v3004_v51 }
 0x28c   :  { %v799_v55 = vpop.f32.mrf.mxu3  ;;  %v779_v37 = vpop.f32.mrf.mxu2 }
 0x28d   :  { %v805_v42 = vadd.f32 %v799_v55, %v247_v54  ;;  %v804_v40 = vadd.f32 %v779_v37, %v206_v34 }
 0x28f   :  { %v3005_v56 = vmul.f32 -1.442695, %v805_v42 }
 0x290   :  { %v3092_v38 = vpop.eup %3091 }
 0x291   :  { %v3094_v8 = vpop.eup %3093  ;;  %v812_v46 = vadd.f32 1.0, %v3092_v38  ;;  %3095 = vpow2.f32 %v3005_v56 }
 0x292   :  { %v813_v57 = vadd.f32 1.0, %v3094_v8 }
 0x293   :  { %3097 = vrcp.f32 %v812_v46  ;;  %v825_v55 = vand.u32 2147483648, %v812_v46  ;;  %v823_v56 = vand.u32 2147483647, %v812_v46  ;;  %vm819_vm3 = vweird.f32 %v812_v46 }
 0x294   :  { %3099 = vrcp.f32 %v813_v57  ;;  %v840_v38 = vand.u32 2147483648, %v813_v57  ;;  %v838_v61 = vand.u32 2147483647, %v813_v57  ;;  %vm834_vm4 = vweird.f32 %v813_v57 }
 0x295   :  { %v826_v37 = vor.u32 1.1754944e-38, %v825_v55  ;;  %vm824_vm7 = vcmp.eq.f32.partialorder %v823_v56, 8.507059e+37 }
 0x296   :  { %vm839_vm8 = vcmp.eq.f32.partialorder %v838_v61, 8.507059e+37 }
 0x297   :  { %v3096_v18 = vpop.eup %3095 }
 0x298   :  { %v848_v31 = vadd.f32 1.0, %v3096_v18 }
 0x299   :  { %v3098_v29 = vpop.eup %3097 }
 0x29a   :  { %v3100_v50 = vpop.eup %3099  ;;  %v815_v51 = vmul.f32 %v3098_v29, %v812_v46  ;;  %3101 = vrcp.f32 %v848_v31  ;;  %vm820_vm1 = vweird.f32 %v3098_v29  ;;  %vm854_vm10 = vweird.f32 %v848_v31 }
 0x29b   :  { %v830_v52 = vmul.f32 %v3100_v50, %v813_v57  ;;  %3103 = vtanh.f32 %v804_v40  ;;  %vm835_vm2 = vweird.f32 %v3100_v50  ;;  %vm821_vm5 = vmor %vm819_vm3, %vm820_vm1 }
 0x29c   :  { %v816_v42 = vsub.f32 1.0, %v815_v51  ;;  %vm836_vm6 = vmor %vm834_vm4, %vm835_vm2  ;;  %v841_v51 = vor.u32 1.1754944e-38, %v840_v38 }
 0x29d   :  { %v831_v54 = vsub.f32 1.0, %v830_v52 }
 0x29e   :  { %v817_v8 = vmul.f32 %v3098_v29, %v816_v42 }
 0x29f   :  { %v832_v32 = vmul.f32 %v3100_v50, %v831_v54 }
 0x2a0   :  { %v3102_v1 = vpop.eup %3101  ;;  %v818_v13 = vadd.f32 %v3098_v29, %v817_v8 }
 0x2a1   :  { %v833_v18 = vadd.f32 %v3100_v50, %v832_v32  ;;  %v850_v34 = vmul.f32 %v3102_v1, %v848_v31  ;;  %v3104_v40 = vpop.eup %3103  ;;  %vm855_vm9 = vweird.f32 %v3102_v1  ;;  %v860_v32 = vand.u32 2147483648, %v848_v31 }
 0x2a2   :  { %v822_v52 = vsel %vm821_vm5, %v3098_v29, %v818_v13  ;;  %v858_v29 = vand.u32 2147483647, %v848_v31  ;;  %vm856_vm11 = vmor %vm854_vm10, %vm855_vm9  ;;  %v6085_v31 = vld [vmem:[#allocation24_spill] sm:$0xff]  ;;  %v6086_v13 = vld [vmem:[#allocation33_spill] sm:$0xff] }
 0x2a3   :  { %v827_v14 = vsel %vm824_vm7, %v826_v37, %v822_v52  ;;  %v837_v42 = vsel %vm836_vm6, %v3100_v50, %v833_v18  ;;  %v851_v62 = vsub.f32 1.0, %v850_v34  ;;  %v861_v38 = vor.u32 1.1754944e-38, %v860_v32  ;;  %v4332_v37 = vld [vmem:[#allocation4 + $0x90] sm:$0xff]  ;;  %v6089_v34 = vld [vmem:[#allocation26_spill] sm:$0xff] }
 0x2a4   :  { %v842_v54 = vsel %vm839_vm8, %v841_v51, %v837_v42  ;;  %v865_v60 = vmul.f32 %v3104_v40, %v827_v14  ;;  %vm859_vm12 = vcmp.eq.f32.partialorder %v858_v29, 8.507059e+37  ;;  %v6079_v14 = vld [vmem:[#allocation18_spill] sm:$0xff]  ;;  %6087 = vst [vmem:[#allocation35_spill] sm:$0xff] %v4332_v37  ;;  %v6088_v18 = vld [vmem:[#allocation25_spill] sm:$0xff]  ;;  %v6090_v51 = vld [vmem:[#allocation27_spill] sm:$0xff] }
 0x2a5   :  { %v864_v58 = vmul.f32 %v842_v54, %v4085_v0  ;;  %v852_v8 = vmul.f32 %v3102_v1, %v851_v62  ;;  %v6080_v0 = vld [vmem:[#allocation20_spill] sm:$0xff]  ;;  %v6083_v62 = vld [vmem:[#allocation22_spill] sm:$0xff]  ;;  %v4338_v52 = vld [vmem:[#allocation4 + $0x70] sm:$0xff] }
 0x2a6   :  { %6091 = vst [vmem:[#allocation43_spill] sm:$0xff] %v4338_v52  ;;  %v6092_v40 = vld [vmem:[#allocation37_spill] sm:$0xff]  ;;  %v6093_v42 = vld [vmem:[#allocation30_spill] sm:$0xff]  ;;  %v6094_v54 = vld [vmem:[#allocation31_spill] sm:$0xff] }
 0x2a7   :  { %v4277_v46 = vadd.f32 %v865_v60, %v864_v58  ;;  %v853_v57 = vadd.f32 %v3102_v1, %v852_v8  ;;  %v6081_v58 = vld [vmem:[#allocation21_spill] sm:$0xff]  ;;  %v6098_v29 = vld [vmem:[#allocation36_spill] sm:$0xff] }
 0x2a8   :  { %v6082_v60 = vld [vmem:[#allocation29_spill] sm:$0xff] }
 0x2a9   :  { %3105 = vtanh.f32 %v4277_v46  ;;  %v857_v55 = vsel %vm856_vm11, %v3102_v1, %v853_v57  ;;  %v6084_v1 = vld [vmem:[#allocation23_spill] sm:$0xff]  ;;  %v4344_v8 = vld [vmem:[#allocation4 + $0x50] sm:$0xff]  ;;  %v6096_v57 = vld [vmem:[#allocation32_spill] sm:$0xff] }
 0x2aa   :  { %v862_v50 = vsel %vm859_vm12, %v861_v38, %v857_v55  ;;  %6095 = vst [vmem:[#allocation40_spill] sm:$0xff] %v4344_v8  ;;  %v6097_v32 = vld [vmem:[#allocation41_spill] sm:$0xff]  ;;  %v4353_v38 = vld [vmem:[#allocation4 + $0x38] sm:$0xff] }
 0x2ab   :  { %v4350_v55 = vld [vmem:[#allocation4 + $0x30] sm:$0xff]  ;;  %6100 = vst [vmem:[#allocation39_spill] sm:$0xff] %v4353_v38 }
 0x2ac   :  { %6099 = vst [vmem:[#allocation38_spill] sm:$0xff] %v4350_v55 }
 0x2af   :  { %v3106_v61 = vpop.eup %3105 }
 0x2b0   :  { %v4280_v56 = vmul.f32 %v3106_v61, %v862_v50  ;;  %v4356_v61 = vld [vmem:[#allocation4] sm:$0xff]  ;;  %v4359_v50 = vld [vmem:[#allocation4 + $0x8] sm:$0xff] }
 0x2b1   :  { %6101 = vst [vmem:[#allocation45_spill] sm:$0xff] %v4356_v61 }
 0x2b2   :  { %6078 = vst [vmem:[#allocation34_spill] sm:$0xff] %v4280_v56  ;;  %894 = vmatmul.f32.vlgmr.msra.gmra.mxu0 %v4280_v56  ;;  %914 = vmatmul.f32.vlgmr.msra.gmra.mxu1 %v4280_v56 }
 0x2b3   :  { %934 = vmatmul.f32.vlgmr.msra.gmra.mxu2 %v4280_v56  ;;  %954 = vmatmul.f32.vlgmr.msra.gmra.mxu3 %v4280_v56  ;;  %6102 = vst [vmem:[#allocation42_spill] sm:$0xff] %v4359_v50  ;;  %v4362_v56 = vld [vmem:[#allocation4 + $0x10] sm:$0xff] }
 0x2b4   :  { %1190 = vmatpush.msra.mxu0 %v4094_v6  ;;  %1210 = vmatpush.msra.mxu1 %v4097_v44  ;;  %6103 = vst [vmem:[#allocation7_spill] sm:$0xff] %v4362_v56 }
 0x2b5   :  { %1230 = vmatpush.msra.mxu2 %v4100_v53  ;;  %1250 = vmatpush.msra.mxu3 %v4103_v7 }
 0x2b6   :  { %1191 = vmatpush.msra.mxu0 %v4106_v59  ;;  %1211 = vmatpush.msra.mxu1 %v4109_v19 }
 0x2b7   :  { %1231 = vmatpush.msra.mxu2 %v4112_v9  ;;  %1251 = vmatpush.msra.mxu3 %v4115_v63 }
 0x2b8   :  { %1192 = vmatpush.msra.mxu0 %v4118_v36  ;;  %1212 = vmatpush.msra.mxu1 %v4121_v39 }
 0x2b9   :  { %1232 = vmatpush.msra.mxu2 %v4124_v17  ;;  %1252 = vmatpush.msra.mxu3 %v4127_v4 }
 0x2ba   :  { %1193 = vmatpush.msra.mxu0 %v4130_v10  ;;  %1213 = vmatpush.msra.mxu1 %v4133_v2 }
 0x2bb   :  { %1233 = vmatpush.msra.mxu2 %v4136_v20  ;;  %1253 = vmatpush.msra.mxu3 %v4139_v24 }
 0x2bc   :  { %1194 = vmatpush.msra.mxu0 %v4142_v3  ;;  %1214 = vmatpush.msra.mxu1 %v4145_v11 }
 0x2bd   :  { %1234 = vmatpush.msra.mxu2 %v4148_v16  ;;  %1254 = vmatpush.msra.mxu3 %v4151_v12 }
 0x2be   :  { %1195 = vmatpush.msra.mxu0 %v4154_v5  ;;  %1215 = vmatpush.msra.mxu1 %v4157_v15 }
 0x2bf   :  { %1235 = vmatpush.msra.mxu2 %v4160_v21  ;;  %1255 = vmatpush.msra.mxu3 %v4163_v22 }
 0x2c0   :  { %1196 = vmatpush.msra.mxu0 %v4166_v23  ;;  %1216 = vmatpush.msra.mxu1 %v4169_v25 }
 0x2c1   :  { %1236 = vmatpush.msra.mxu2 %v4172_v26  ;;  %1256 = vmatpush.msra.mxu3 %v4175_v27 }
 0x2c2   :  { %1197 = vmatpush.msra.mxu0 %v4178_v28  ;;  %1217 = vmatpush.msra.mxu1 %v4181_v30 }
 0x2c3   :  { %1237 = vmatpush.msra.mxu2 %v4184_v33  ;;  %1257 = vmatpush.msra.mxu3 %v4187_v35 }
 0x2c4   :  { %1198 = vmatpush.msra.mxu0 %v4190_v41  ;;  %1218 = vmatpush.msra.mxu1 %v4193_v43 }
 0x2c5   :  { %1238 = vmatpush.msra.mxu2 %v4196_v45  ;;  %1258 = vmatpush.msra.mxu3 %v4199_v47 }
 0x2c6   :  { %1199 = vmatpush.msra.mxu0 %v4202_v48  ;;  %1219 = vmatpush.msra.mxu1 %v4205_v49 }
 0x2c7   :  { %1239 = vmatpush.msra.mxu2 %v6079_v14  ;;  %1259 = vmatpush.msra.mxu3 %v6080_v0 }
 0x2c8   :  { %1200 = vmatpush.msra.mxu0 %v6081_v58  ;;  %1220 = vmatpush.msra.mxu1 %v6082_v60 }
 0x2c9   :  { %1240 = vmatpush.msra.mxu2 %v6083_v62  ;;  %1260 = vmatpush.msra.mxu3 %v6084_v1 }
 0x2ca   :  { %1201 = vmatpush.msra.mxu0 %v6085_v31  ;;  %1221 = vmatpush.msra.mxu1 %v6086_v13 }
 0x2cb   :  { %1241 = vmatpush.msra.mxu2 %v4332_v37  ;;  %1261 = vmatpush.msra.mxu3 %v6088_v18  ;;  %v6110_v18 = vld [vmem:[#allocation48_spill] sm:$0xff] }
 0x2cc   :  { %1202 = vmatpush.msra.mxu0 %v6089_v34  ;;  %1222 = vmatpush.msra.mxu1 %v6090_v51  ;;  %v6109_v34 = vld [vmem:[#allocation28_spill] sm:$0xff] }
 0x2cd   :  { %1242 = vmatpush.msra.mxu2 %v4338_v52  ;;  %1262 = vmatpush.msra.mxu3 %v6092_v40 }
 0x2ce   :  { %1203 = vmatpush.msra.mxu0 %v6093_v42  ;;  %1223 = vmatpush.msra.mxu1 %v6094_v54 }
 0x2cf   :  { %1243 = vmatpush.msra.mxu2 %v4344_v8  ;;  %1263 = vmatpush.msra.mxu3 %v6096_v57  ;;  %v6108_v8 = vld [vmem:[#allocation16_spill] sm:$0xff] }
 0x2d0   :  { %1204 = vmatpush.msra.mxu0 %v6097_v32  ;;  %1224 = vmatpush.msra.mxu1 %v6098_v29  ;;  %v4365_v29 = vld [vmem:[#allocation4 + $0x18] sm:$0xff]  ;;  %v6106_v32 = vld [vmem:[#allocation15_spill] sm:$0xff] }
 0x2d1   :  { %1244 = vmatpush.msra.mxu2 %v4350_v55  ;;  %1264 = vmatpush.msra.mxu3 %v4353_v38  ;;  %6104 = vst [vmem:[#allocation8_spill] sm:$0xff] %v4365_v29  ;;  %v6105_v55 = vld [vmem:[#allocation19_spill] sm:$0xff]  ;;  %v6107_v38 = vld [vmem:[#allocation17_spill] sm:$0xff] }
 0x2d2   :  { %1205 = vmatpush.msra.mxu0 %v4356_v61  ;;  %1225 = vmatpush.msra.mxu1 %v4359_v50  ;;  %v127_v57 = vadd.f32 %v6106_v32, %v6105_v55  ;;  %v168_v54 = vadd.f32 %v6108_v8, %v6107_v38 }
 0x2d3   :  { %1245 = vmatpush.msra.mxu2 %v4362_v56  ;;  %1265 = vmatpush.msra.mxu3 %v4365_v29  ;;  %v250_v56 = vadd.f32 %v6110_v18, %v6109_v34 }
 0x32f   :  { %v895_v42 = vpop.f32.mrf.mxu0  ;;  %v915_v61 = vpop.f32.mrf.mxu1 }
 0x330   :  { %v958_v40 = vadd.f32 %v895_v42, %v127_v57  ;;  %v959_v52 = vadd.f32 %v915_v61, %v168_v54  ;;  %v6111_v54 = vld [vmem:[#allocation44_spill] sm:$0xff] }
 0x332   :  { %v3006_v51 = vmul.f32 -1.442695, %v958_v40  ;;  %v3007_v50 = vmul.f32 -1.442695, %v959_v52  ;;  %v6112_v40 = vld [vmem:[#allocation51_spill] sm:$0xff] }
 0x333   :  { %v209_v52 = vadd.f32 %v6112_v40, %v6111_v54 }
 0x334   :  { %3107 = vpow2.f32 %v3006_v51 }
 0x335   :  { %3109 = vpow2.f32 %v3007_v50 }
 0x336   :  { %v955_v37 = vpop.f32.mrf.mxu3  ;;  %v935_v8 = vpop.f32.mrf.mxu2 }
 0x337   :  { %v961_v13 = vadd.f32 %v955_v37, %v250_v56  ;;  %v960_v61 = vadd.f32 %v935_v8, %v209_v52 }
 0x339   :  { %v3008_v29 = vmul.f32 -1.442695, %v961_v13 }
 0x33a   :  { %v3108_v31 = vpop.eup %3107 }
 0x33b   :  { %v3110_v1 = vpop.eup %3109  ;;  %v968_v32 = vadd.f32 1.0, %v3108_v31  ;;  %3111 = vpow2.f32 %v3008_v29 }
 0x33c   :  { %v969_v55 = vadd.f32 1.0, %v3110_v1 }
 0x33d   :  { %3113 = vrcp.f32 %v968_v32  ;;  %v981_v34 = vand.u32 2147483648, %v968_v32  ;;  %v979_v29 = vand.u32 2147483647, %v968_v32  ;;  %vm975_vm15 = vweird.f32 %v968_v32 }
 0x33e   :  { %3115 = vrcp.f32 %v969_v55  ;;  %v996_v31 = vand.u32 2147483648, %v969_v55  ;;  %v994_v62 = vand.u32 2147483647, %v969_v55  ;;  %vm990_vm0 = vweird.f32 %v969_v55 }
 0x33f   :  { %v982_v8 = vor.u32 1.1754944e-38, %v981_v34  ;;  %vm980_vm3 = vcmp.eq.f32.partialorder %v979_v29, 8.507059e+37 }
 0x340   :  { %vm995_vm4 = vcmp.eq.f32.partialorder %v994_v62, 8.507059e+37 }
 0x341   :  { %v3112_v42 = vpop.eup %3111 }
 0x342   :  { %v1004_v51 = vadd.f32 1.0, %v3112_v42 }
 0x343   :  { %v3114_v57 = vpop.eup %3113 }
 0x344   :  { %v3116_v18 = vpop.eup %3115  ;;  %v971_v50 = vmul.f32 %v3114_v57, %v968_v32  ;;  %3117 = vrcp.f32 %v1004_v51  ;;  %vm976_vm13 = vweird.f32 %v3114_v57  ;;  %v1016_v34 = vand.u32 2147483648, %v1004_v51 }
 0x345   :  { %v986_v56 = vmul.f32 %v3116_v18, %v969_v55  ;;  %3119 = vtanh.f32 %v960_v61  ;;  %vm991_vm14 = vweird.f32 %v3116_v18  ;;  %vm977_vm1 = vmor %vm975_vm15, %vm976_vm13  ;;  %vm1010_vm6 = vweird.f32 %v1004_v51 }
 0x346   :  { %v972_v13 = vsub.f32 1.0, %v971_v50  ;;  %vm992_vm2 = vmor %vm990_vm0, %vm991_vm14  ;;  %v997_v50 = vor.u32 1.1754944e-38, %v996_v31  ;;  %v1017_v31 = vor.u32 1.1754944e-38, %v1016_v34 }
 0x347   :  { %v987_v37 = vsub.f32 1.0, %v986_v56 }
 0x348   :  { %v973_v1 = vmul.f32 %v3114_v57, %v972_v13 }
 0x349   :  { %v988_v38 = vmul.f32 %v3116_v18, %v987_v37 }
 0x34a   :  { %v3118_v60 = vpop.eup %3117  ;;  %v974_v40 = vadd.f32 %v3114_v57, %v973_v1 }
 0x34b   :  { %v989_v42 = vadd.f32 %v3116_v18, %v988_v38  ;;  %v1006_v52 = vmul.f32 %v3118_v60, %v1004_v51  ;;  %v3120_v61 = vpop.eup %3119  ;;  %vm1011_vm5 = vweird.f32 %v3118_v60  ;;  %v1014_v38 = vand.u32 2147483647, %v1004_v51 }
 0x34c   :  { %v978_v56 = vsel %vm977_vm1, %v3114_v57, %v974_v40  ;;  %vm1012_vm7 = vmor %vm1010_vm6, %vm1011_vm5 }
 0x34d   :  { %v983_v54 = vsel %vm980_vm3, %v982_v8, %v978_v56  ;;  %v993_v13 = vsel %vm992_vm2, %v3116_v18, %v989_v42  ;;  %v1007_v58 = vsub.f32 1.0, %v1006_v52  ;;  %vm1015_vm8 = vcmp.eq.f32.partialorder %v1014_v38, 8.507059e+37  ;;  %v6145_v56 = vld [vmem:[#allocation44_spill] sm:$0xff] }
 0x34e   :  { %v998_v37 = vsel %vm995_vm4, %v997_v50, %v993_v13  ;;  %v1021_v0 = vmul.f32 %v3120_v61, %v983_v54  ;;  %v6146_v61 = vld [vmem:[#allocation55_spill] sm:$0xff] }
 0x34f   :  { %v1020_v14 = vmul.f32 %v998_v37, %v4277_v46  ;;  %v1008_v1 = vmul.f32 %v3118_v60, %v1007_v58  ;;  %v6143_v46 = vld [vmem:[#allocation28_spill] sm:$0xff]  ;;  %v212_v13 = vadd.f32 %v6146_v61, %v6145_v56  ;;  %v6147_v61 = vld [vmem:[#allocation53_spill] sm:$0xff] }
 0x351   :  { %v4377_v32 = vadd.f32 %v1021_v0, %v1020_v14  ;;  %v1009_v55 = vadd.f32 %v3118_v60, %v1008_v1  ;;  %v6144_v14 = vld [vmem:[#allocation52_spill] sm:$0xff] }
 0x352   :  { %v253_v0 = vadd.f32 %v6144_v14, %v6143_v46  ;;  %v1557_v14 = vld [vmem:[%s5681_s2 + $0x1a0] sm:$0xff] }
 0x353   :  { %3121 = vtanh.f32 %v4377_v32  ;;  %v1013_v57 = vsel %vm1012_vm7, %v3118_v60, %v1009_v55 }
 0x354   :  { %v1018_v18 = vsel %vm1015_vm8, %v1017_v31, %v1013_v57 }
 0x359   :  { %v3122_v62 = vpop.eup %3121 }
 0x35a   :  { %v4380_v29 = vmul.f32 %v3122_v62, %v1018_v18 }
 0x35c   :  { %1050 = vmatmul.f32.vlgmr.msrb.gmra.mxu0 %v4380_v29  ;;  %1070 = vmatmul.f32.vlgmr.msrb.gmra.mxu1 %v4380_v29 }
 0x35d   :  { %1090 = vmatmul.f32.vlgmr.msrb.gmra.mxu2 %v4380_v29  ;;  %1110 = vmatmul.f32.vlgmr.msrb.gmra.mxu3 %v4380_v29 }
 0x35e   :  { %1346 = vmatpush.msrb.mxu0 %v4094_v6  ;;  %1366 = vmatpush.msrb.mxu1 %v4097_v44  ;;  %v6113_v6 = vld [vmem:[#allocation18_spill] sm:$0xff]  ;;  %v6114_v44 = vld [vmem:[#allocation20_spill] sm:$0xff] }
 0x35f   :  { %1386 = vmatpush.msrb.mxu2 %v4100_v53  ;;  %1406 = vmatpush.msrb.mxu3 %v4103_v7  ;;  %v6115_v53 = vld [vmem:[#allocation21_spill] sm:$0xff] }
 0x360   :  { %1347 = vmatpush.msrb.mxu0 %v4106_v59  ;;  %1367 = vmatpush.msrb.mxu1 %v4109_v19  ;;  %v6116_v7 = vld [vmem:[#allocation29_spill] sm:$0xff]  ;;  %v6117_v59 = vld [vmem:[#allocation22_spill] sm:$0xff]  ;;  %v6118_v19 = vld [vmem:[#allocation23_spill] sm:$0xff] }
 0x361   :  { %1387 = vmatpush.msrb.mxu2 %v4112_v9  ;;  %1407 = vmatpush.msrb.mxu3 %v4115_v63  ;;  %v6119_v9 = vld [vmem:[#allocation24_spill] sm:$0xff]  ;;  %v6120_v63 = vld [vmem:[#allocation33_spill] sm:$0xff] }
 0x362   :  { %1348 = vmatpush.msrb.mxu0 %v4118_v36  ;;  %1368 = vmatpush.msrb.mxu1 %v4121_v39  ;;  %v6121_v36 = vld [vmem:[#allocation35_spill] sm:$0xff]  ;;  %v6122_v39 = vld [vmem:[#allocation25_spill] sm:$0xff] }
 0x363   :  { %1388 = vmatpush.msrb.mxu2 %v4124_v17  ;;  %1408 = vmatpush.msrb.mxu3 %v4127_v4  ;;  %v6123_v17 = vld [vmem:[#allocation26_spill] sm:$0xff]  ;;  %v6124_v4 = vld [vmem:[#allocation27_spill] sm:$0xff] }
 0x364   :  { %1349 = vmatpush.msrb.mxu0 %v4130_v10  ;;  %1369 = vmatpush.msrb.mxu1 %v4133_v2  ;;  %v6125_v10 = vld [vmem:[#allocation43_spill] sm:$0xff]  ;;  %v6126_v2 = vld [vmem:[#allocation37_spill] sm:$0xff] }
 0x365   :  { %1389 = vmatpush.msrb.mxu2 %v4136_v20  ;;  %1409 = vmatpush.msrb.mxu3 %v4139_v24  ;;  %v6127_v20 = vld [vmem:[#allocation30_spill] sm:$0xff]  ;;  %v6128_v24 = vld [vmem:[#allocation31_spill] sm:$0xff] }
 0x366   :  { %1350 = vmatpush.msrb.mxu0 %v4142_v3  ;;  %1370 = vmatpush.msrb.mxu1 %v4145_v11  ;;  %v6129_v3 = vld [vmem:[#allocation40_spill] sm:$0xff] }
 0x367   :  { %1390 = vmatpush.msrb.mxu2 %v4148_v16  ;;  %1410 = vmatpush.msrb.mxu3 %v4151_v12  ;;  %v6130_v11 = vld [vmem:[#allocation32_spill] sm:$0xff]  ;;  %v6131_v16 = vld [vmem:[#allocation41_spill] sm:$0xff] }
 0x368   :  { %1351 = vmatpush.msrb.mxu0 %v4154_v5  ;;  %1371 = vmatpush.msrb.mxu1 %v4157_v15  ;;  %v6132_v12 = vld [vmem:[#allocation36_spill] sm:$0xff]  ;;  %v6133_v5 = vld [vmem:[#allocation38_spill] sm:$0xff]  ;;  %v6134_v15 = vld [vmem:[#allocation39_spill] sm:$0xff] }
 0x369   :  { %1391 = vmatpush.msrb.mxu2 %v4160_v21  ;;  %1411 = vmatpush.msrb.mxu3 %v4163_v22  ;;  %v6135_v21 = vld [vmem:[#allocation45_spill] sm:$0xff]  ;;  %v6136_v22 = vld [vmem:[#allocation42_spill] sm:$0xff] }
 0x36a   :  { %1352 = vmatpush.msrb.mxu0 %v4166_v23  ;;  %1372 = vmatpush.msrb.mxu1 %v4169_v25  ;;  %v6137_v23 = vld [vmem:[#allocation7_spill] sm:$0xff]  ;;  %v6138_v25 = vld [vmem:[#allocation8_spill] sm:$0xff] }
 0x36b   :  { %1392 = vmatpush.msrb.mxu2 %v4172_v26  ;;  %1412 = vmatpush.msrb.mxu3 %v4175_v27  ;;  %v6139_v26 = vld [vmem:[#allocation19_spill] sm:$0xff]  ;;  %v6140_v27 = vld [vmem:[#allocation49_spill] sm:$0xff] }
 0x36c   :  { %1353 = vmatpush.msrb.mxu0 %v4178_v28  ;;  %1373 = vmatpush.msrb.mxu1 %v4181_v30  ;;  %v130_v28 = vadd.f32 %v6140_v27, %v6139_v26  ;;  %v6141_v30 = vld [vmem:[#allocation17_spill] sm:$0xff] }
 0x36d   :  { %1393 = vmatpush.msrb.mxu2 %v4184_v33  ;;  %1413 = vmatpush.msrb.mxu3 %v4187_v35  ;;  %v6142_v33 = vld [vmem:[#allocation50_spill] sm:$0xff] }
 0x36e   :  { %1354 = vmatpush.msrb.mxu0 %v4190_v41  ;;  %1374 = vmatpush.msrb.mxu1 %v4193_v43  ;;  %v171_v35 = vadd.f32 %v6142_v33, %v6141_v30 }
 0x36f   :  { %1394 = vmatpush.msrb.mxu2 %v4196_v45  ;;  %1414 = vmatpush.msrb.mxu3 %v4199_v47 }
 0x370   :  { %1355 = vmatpush.msrb.mxu0 %v4202_v48  ;;  %1375 = vmatpush.msrb.mxu1 %v4205_v49 }
 0x371   :  { %1395 = vmatpush.msrb.mxu2 %v6113_v6  ;;  %1415 = vmatpush.msrb.mxu3 %v6114_v44 }
 0x372   :  { %1356 = vmatpush.msrb.mxu0 %v6115_v53  ;;  %1376 = vmatpush.msrb.mxu1 %v6116_v7 }
 0x373   :  { %1396 = vmatpush.msrb.mxu2 %v6117_v59  ;;  %1416 = vmatpush.msrb.mxu3 %v6118_v19 }
 0x374   :  { %1357 = vmatpush.msrb.mxu0 %v6119_v9  ;;  %1377 = vmatpush.msrb.mxu1 %v6120_v63 }
 0x375   :  { %1397 = vmatpush.msrb.mxu2 %v6121_v36  ;;  %1417 = vmatpush.msrb.mxu3 %v6122_v39 }
 0x376   :  { %1358 = vmatpush.msrb.mxu0 %v6123_v17  ;;  %1378 = vmatpush.msrb.mxu1 %v6124_v4 }
 0x377   :  { %1398 = vmatpush.msrb.mxu2 %v6125_v10  ;;  %1418 = vmatpush.msrb.mxu3 %v6126_v2 }
 0x378   :  { %1359 = vmatpush.msrb.mxu0 %v6127_v20  ;;  %1379 = vmatpush.msrb.mxu1 %v6128_v24 }
 0x379   :  { %1399 = vmatpush.msrb.mxu2 %v6129_v3  ;;  %1419 = vmatpush.msrb.mxu3 %v6130_v11 }
 0x37a   :  { %1360 = vmatpush.msrb.mxu0 %v6131_v16  ;;  %1380 = vmatpush.msrb.mxu1 %v6132_v12 }
 0x37b   :  { %1400 = vmatpush.msrb.mxu2 %v6133_v5  ;;  %1420 = vmatpush.msrb.mxu3 %v6134_v15 }
 0x37c   :  { %1361 = vmatpush.msrb.mxu0 %v6135_v21  ;;  %1381 = vmatpush.msrb.mxu1 %v6136_v22 }
 0x37d   :  { %1401 = vmatpush.msrb.mxu2 %v6137_v23  ;;  %1421 = vmatpush.msrb.mxu3 %v6138_v25 }
 0x3d9   :  { %v1051_v41 = vpop.f32.mrf.mxu0  ;;  %v1071_v43 = vpop.f32.mrf.mxu1 }
 0x3da   :  { %v1114_v45 = vadd.f32 %v1051_v41, %v130_v28  ;;  %v1115_v47 = vadd.f32 %v1071_v43, %v171_v35  ;;  %v1566_v35 = vld [vmem:[%s5681_s2 + $0x1e8] sm:$0xff]  ;;  %v1567_v41 = vld [vmem:[%s5681_s2 + $0x1f0] sm:$0xff]  ;;  %v1568_v43 = vld [vmem:[%s5681_s2 + $0x1f8] sm:$0xff] }
 0x3dc   :  { %v3009_v48 = vmul.f32 -1.442695, %v1114_v45  ;;  %v3010_v49 = vmul.f32 -1.442695, %v1115_v47  ;;  %v1561_v45 = vld [vmem:[%s5681_s2 + $0x1c0] sm:$0xff]  ;;  %v1562_v47 = vld [vmem:[%s5681_s2 + $0x1c8] sm:$0xff] }
 0x3de   :  { %3123 = vpow2.f32 %v3009_v48  ;;  %v1563_v48 = vld [vmem:[%s5681_s2 + $0x1d0] sm:$0xff] }
 0x3df   :  { %3125 = vpow2.f32 %v3010_v49  ;;  %v1564_v49 = vld [vmem:[%s5681_s2 + $0x1d8] sm:$0xff] }
 0x3e0   :  { %v1111_v58 = vpop.f32.mrf.mxu3  ;;  %v1091_v52 = vpop.f32.mrf.mxu2 }
 0x3e1   :  { %v1117_v60 = vadd.f32 %v1111_v58, %v253_v0  ;;  %v1116_v55 = vadd.f32 %v1091_v52, %v212_v13  ;;  %v1558_v0 = vld [vmem:[%s5681_s2 + $0x1a8] sm:$0xff]  ;;  %v1559_v58 = vld [vmem:[%s5681_s2 + $0x1b0] sm:$0xff]  ;;  %v133_v13 = vadd.f32 %v6147_v61, %v6139_v26 }
 0x3e2   :  { %v1550_v52 = vld [vmem:[%s5681_s2 + $0x168] sm:$0xff] }
 0x3e3   :  { %v3011_v54 = vmul.f32 -1.442695, %v1117_v60  ;;  %v1560_v60 = vld [vmem:[%s5681_s2 + $0x1b8] sm:$0xff] }
 0x3e4   :  { %v3124_v51 = vpop.eup %3123 }
 0x3e5   :  { %v3126_v40 = vpop.eup %3125  ;;  %v1124_v8 = vadd.f32 1.0, %v3124_v51  ;;  %3127 = vpow2.f32 %v3011_v54  ;;  %v1553_v54 = vld [vmem:[%s5681_s2 + $0x180] sm:$0xff]  ;;  %v1554_v51 = vld [vmem:[%s5681_s2 + $0x188] sm:$0xff] }
 0x3e6   :  { %v1125_v42 = vadd.f32 1.0, %v3126_v40  ;;  %v1555_v40 = vld [vmem:[%s5681_s2 + $0x190] sm:$0xff] }
 0x3e7   :  { %3129 = vrcp.f32 %v1124_v8  ;;  %v1137_v18 = vand.u32 2147483648, %v1124_v8  ;;  %v1135_v53 = vand.u32 2147483647, %v1124_v8  ;;  %vm1131_vm11 = vweird.f32 %v1124_v8 }
 0x3e8   :  { %3131 = vrcp.f32 %v1125_v42  ;;  %v1152_v6 = vand.u32 2147483648, %v1125_v42  ;;  %v1150_v59 = vand.u32 2147483647, %v1125_v42  ;;  %vm1146_vm12 = vweird.f32 %v1125_v42 }
 0x3e9   :  { %v1138_v63 = vor.u32 1.1754944e-38, %v1137_v18  ;;  %vm1136_vm15 = vcmp.eq.f32.partialorder %v1135_v53, 8.507059e+37  ;;  %v1541_v53 = vld [vmem:[%s5681_s2 + $0x120] sm:$0xff] }
 0x3ea   :  { %v1153_v17 = vor.u32 1.1754944e-38, %v1152_v6  ;;  %vm1151_vm0 = vcmp.eq.f32.partialorder %v1150_v59, 8.507059e+37  ;;  %v1543_v59 = vld [vmem:[%s5681_s2 + $0x130] sm:$0xff] }
 0x3eb   :  { %v3128_v50 = vpop.eup %3127 }
 0x3ec   :  { %v1160_v37 = vadd.f32 1.0, %v3128_v50  ;;  %v1551_v50 = vld [vmem:[%s5681_s2 + $0x170] sm:$0xff] }
 0x3ed   :  { %v3130_v1 = vpop.eup %3129 }
 0x3ee   :  { %v3132_v34 = vpop.eup %3131  ;;  %v1127_v38 = vmul.f32 %v3130_v1, %v1124_v8  ;;  %3133 = vrcp.f32 %v1160_v37  ;;  %vm1132_vm9 = vweird.f32 %v3130_v1  ;;  %v1172_v21 = vand.u32 2147483648, %v1160_v37  ;;  %v1556_v8 = vld [vmem:[%s5681_s2 + $0x198] sm:$0xff] }
 0x3ef   :  { %v1142_v57 = vmul.f32 %v3132_v34, %v1125_v42  ;;  %3135 = vtanh.f32 %v1116_v55  ;;  %vm1147_vm10 = vweird.f32 %v3132_v34  ;;  %vm1133_vm13 = vmor %vm1131_vm11, %vm1132_vm9  ;;  %vm1166_vm2 = vweird.f32 %v1160_v37  ;;  %v1549_v42 = vld [vmem:[%s5681_s2 + $0x160] sm:$0xff]  ;;  %v1552_v55 = vld [vmem:[%s5681_s2 + $0x178] sm:$0xff] }
 0x3f0   :  { %v1128_v31 = vsub.f32 1.0, %v1127_v38  ;;  %vm1148_vm14 = vmor %vm1146_vm12, %vm1147_vm10  ;;  %v1170_v22 = vand.u32 2147483647, %v1160_v37  ;;  %v1173_v25 = vor.u32 1.1754944e-38, %v1172_v21  ;;  %v1530_v21 = vld [vmem:[%s5681_s2 + $0xc8] sm:$0xff] }
 0x3f1   :  { %v1143_v62 = vsub.f32 1.0, %v1142_v57  ;;  %v1545_v57 = vld [vmem:[%s5681_s2 + $0x140] sm:$0xff] }
 0x3f2   :  { %v1129_v44 = vmul.f32 %v3130_v1, %v1128_v31  ;;  %vm1171_vm4 = vcmp.eq.f32.partialorder %v1170_v22, 8.507059e+37  ;;  %v1546_v31 = vld [vmem:[%s5681_s2 + $0x148] sm:$0xff]  ;;  %v1531_v22 = vld [vmem:[%s5681_s2 + $0xd0] sm:$0xff] }
 0x3f3   :  { %v1144_v7 = vmul.f32 %v3132_v34, %v1143_v62  ;;  %v1547_v62 = vld [vmem:[%s5681_s2 + $0x150] sm:$0xff] }
 0x3f4   :  { %v3134_v19 = vpop.eup %3133  ;;  %v1130_v9 = vadd.f32 %v3130_v1, %v1129_v44  ;;  %v1548_v44 = vld [vmem:[%s5681_s2 + $0x158] sm:$0xff] }
 0x3f5   :  { %v1145_v36 = vadd.f32 %v3132_v34, %v1144_v7  ;;  %v1162_v39 = vmul.f32 %v3134_v19, %v1160_v37  ;;  %v3136_v10 = vpop.eup %3135  ;;  %vm1167_vm1 = vweird.f32 %v3134_v19  ;;  %v6148_v37 = vld [vmem:[#allocation54_spill] sm:$0xff]  ;;  %v1542_v7 = vld [vmem:[%s5681_s2 + $0x128] sm:$0xff] }
 0x3f6   :  { %v1134_v4 = vsel %vm1133_vm13, %v3130_v1, %v1130_v9  ;;  %vm1168_vm3 = vmor %vm1166_vm2, %vm1167_vm1  ;;  %v174_v1 = vadd.f32 %v6148_v37, %v6141_v30  ;;  %v1511_v37 = vld [vmem:[%s5681_s2 + $0x30] sm:$0xff] }
 0x3f7   :  { %v1139_v2 = vsel %vm1136_vm15, %v1138_v63, %v1134_v4  ;;  %v1149_v20 = vsel %vm1148_vm14, %v3132_v34, %v1145_v36  ;;  %v1163_v24 = vsub.f32 1.0, %v1162_v39  ;;  %v1544_v63 = vld [vmem:[%s5681_s2 + $0x138] sm:$0xff]  ;;  %v1537_v36 = vld [vmem:[%s5681_s2 + $0x100] sm:$0xff]  ;;  %v1538_v39 = vld [vmem:[%s5681_s2 + $0x108] sm:$0xff] }
 0x3f8   :  { %v1154_v3 = vsel %vm1151_vm0, %v1153_v17, %v1149_v20  ;;  %v1177_v11 = vmul.f32 %v3136_v10, %v1139_v2  ;;  %v1539_v17 = vld [vmem:[%s5681_s2 + $0x110] sm:$0xff]  ;;  %v1540_v4 = vld [vmem:[%s5681_s2 + $0x118] sm:$0xff]  ;;  %v6149_v10 = vld [vmem:[#allocation56_spill] sm:$0xff] }
 0x3f9   :  { %v1176_v16 = vmul.f32 %v1154_v3, %v4377_v32  ;;  %v1164_v12 = vmul.f32 %v3134_v19, %v1163_v24  ;;  %v1565_v32 = vld [vmem:[%s5681_s2 + $0x1e0] sm:$0xff]  ;;  %v256_v2 = vadd.f32 %v6149_v10, %v6143_v46  ;;  %v1534_v24 = vld [vmem:[%s5681_s2 + $0xe8] sm:$0xff]  ;;  %v1535_v3 = vld [vmem:[%s5681_s2 + $0xf0] sm:$0xff] }
 0x3fa   :  { %v1533_v20 = vld [vmem:[%s5681_s2 + $0xe0] sm:$0xff] }
 0x3fb   :  { %v4459_v5 = vadd.f32 %v1177_v11, %v1176_v16  ;;  %v1165_v15 = vadd.f32 %v3134_v19, %v1164_v12  ;;  %v1536_v16 = vld [vmem:[%s5681_s2 + $0xf8] sm:$0xff] }
 0x3fd   :  { %3137 = vtanh.f32 %v4459_v5  ;;  %v1169_v23 = vsel %vm1168_vm3, %v3134_v19, %v1165_v15  ;;  %v1529_v15 = vld [vmem:[%s5681_s2 + $0xc0] sm:$0xff] }
 0x3fe   :  { %v1174_v28 = vsel %vm1171_vm4, %v1173_v25, %v1169_v23  ;;  %v1532_v23 = vld [vmem:[%s5681_s2 + $0xd8] sm:$0xff] }
 0x403   :  { %v3138_v27 = vpop.eup %3137 }
 0x404   :  { %v4462_v33 = vmul.f32 %v3138_v27, %v1174_v28  ;;  %v1525_v27 = vld [vmem:[%s5681_s2 + $0xa0] sm:$0xff]  ;;  %v1526_v28 = vld [vmem:[%s5681_s2 + $0xa8] sm:$0xff] }
 0x406   :  { %1206 = vmatmul.f32.vlgmr.msra.gmra.mxu0 %v4462_v33  ;;  %1226 = vmatmul.f32.vlgmr.msra.gmra.mxu1 %v4462_v33 }
 0x407   :  { %1246 = vmatmul.f32.vlgmr.msra.gmra.mxu2 %v4462_v33  ;;  %1266 = vmatmul.f32.vlgmr.msra.gmra.mxu3 %v4462_v33 }
 0x408   :  { %1580 = vmatpush.msra.mxu0 %v1565_v32  ;;  %1621 = vmatpush.msra.mxu1 %v1566_v35  ;;  %v1527_v32 = vld [vmem:[%s5681_s2 + $0xb0] sm:$0xff] }
 0x409   :  { %1662 = vmatpush.msra.mxu2 %v1567_v41  ;;  %1703 = vmatpush.msra.mxu3 %v1568_v43  ;;  %v1528_v41 = vld [vmem:[%s5681_s2 + $0xb8] sm:$0xff]  ;;  %v1521_v43 = vld [vmem:[%s5681_s2 + $0x80] sm:$0xff] }
 0x40a   :  { %1581 = vmatpush.msra.mxu0 %v1561_v45  ;;  %1622 = vmatpush.msra.mxu1 %v1562_v47  ;;  %v1522_v45 = vld [vmem:[%s5681_s2 + $0x88] sm:$0xff] }
 0x40b   :  { %1663 = vmatpush.msra.mxu2 %v1563_v48  ;;  %1704 = vmatpush.msra.mxu3 %v1564_v49  ;;  %v1523_v49 = vld [vmem:[%s5681_s2 + $0x90] sm:$0xff] }
 0x40c   :  { %1582 = vmatpush.msra.mxu0 %v1557_v14  ;;  %1623 = vmatpush.msra.mxu1 %v1558_v0  ;;  %v1524_v14 = vld [vmem:[%s5681_s2 + $0x98] sm:$0xff] }
 0x40d   :  { %1664 = vmatpush.msra.mxu2 %v1559_v58  ;;  %1705 = vmatpush.msra.mxu3 %v1560_v60  ;;  %v1517_v58 = vld [vmem:[%s5681_s2 + $0x60] sm:$0xff]  ;;  %v1518_v60 = vld [vmem:[%s5681_s2 + $0x68] sm:$0xff] }
 0x40e   :  { %1583 = vmatpush.msra.mxu0 %v1553_v54  ;;  %1624 = vmatpush.msra.mxu1 %v1554_v51  ;;  %v1519_v54 = vld [vmem:[%s5681_s2 + $0x70] sm:$0xff]  ;;  %v1520_v51 = vld [vmem:[%s5681_s2 + $0x78] sm:$0xff] }
 0x40f   :  { %1665 = vmatpush.msra.mxu2 %v1555_v40  ;;  %1706 = vmatpush.msra.mxu3 %v1556_v8  ;;  %v1513_v40 = vld [vmem:[%s5681_s2 + $0x40] sm:$0xff]  ;;  %v1514_v8 = vld [vmem:[%s5681_s2 + $0x48] sm:$0xff] }
 0x410   :  { %1584 = vmatpush.msra.mxu0 %v1549_v42  ;;  %1625 = vmatpush.msra.mxu1 %v1550_v52  ;;  %v1515_v42 = vld [vmem:[%s5681_s2 + $0x50] sm:$0xff]  ;;  %v1516_v52 = vld [vmem:[%s5681_s2 + $0x58] sm:$0xff] }
 0x411   :  { %1666 = vmatpush.msra.mxu2 %v1551_v50  ;;  %1707 = vmatpush.msra.mxu3 %v1552_v55  ;;  %v1509_v50 = vld [vmem:[%s5681_s2 + $0x20] sm:$0xff] }
 0x412   :  { %1585 = vmatpush.msra.mxu0 %v1545_v57  ;;  %1626 = vmatpush.msra.mxu1 %v1546_v31  ;;  %v1505_v57 = vld [vmem:[%s5681_s2] sm:$0xff]  ;;  %v1506_v31 = vld [vmem:[%s5681_s2 + $0x8] sm:$0xff] }
 0x413   :  { %1667 = vmatpush.msra.mxu2 %v1547_v62  ;;  %1708 = vmatpush.msra.mxu3 %v1548_v44 }
 0x414   :  { %1586 = vmatpush.msra.mxu0 %v1541_v53  ;;  %1627 = vmatpush.msra.mxu1 %v1542_v7 }
 0x415   :  { %1668 = vmatpush.msra.mxu2 %v1543_v59  ;;  %1709 = vmatpush.msra.mxu3 %v1544_v63 }
 0x416   :  { %1587 = vmatpush.msra.mxu0 %v1537_v36  ;;  %1628 = vmatpush.msra.mxu1 %v1538_v39 }
 0x417   :  { %1669 = vmatpush.msra.mxu2 %v1539_v17  ;;  %1710 = vmatpush.msra.mxu3 %v1540_v4 }
 0x418   :  { %1588 = vmatpush.msra.mxu0 %v1533_v20  ;;  %1629 = vmatpush.msra.mxu1 %v1534_v24 }
 0x419   :  { %1670 = vmatpush.msra.mxu2 %v1535_v3  ;;  %1711 = vmatpush.msra.mxu3 %v1536_v16 }
 0x41a   :  { %1589 = vmatpush.msra.mxu0 %v1529_v15  ;;  %1630 = vmatpush.msra.mxu1 %v1530_v21 }
 0x41b   :  { %1671 = vmatpush.msra.mxu2 %v1531_v22  ;;  %1712 = vmatpush.msra.mxu3 %v1532_v23 }
 0x41c   :  { %1590 = vmatpush.msra.mxu0 %v1525_v27  ;;  %1631 = vmatpush.msra.mxu1 %v1526_v28 }
 0x41d   :  { %1672 = vmatpush.msra.mxu2 %v1527_v32  ;;  %1713 = vmatpush.msra.mxu3 %v1528_v41 }
 0x41e   :  { %1591 = vmatpush.msra.mxu0 %v1521_v43  ;;  %1632 = vmatpush.msra.mxu1 %v1522_v45 }
 0x41f   :  { %1673 = vmatpush.msra.mxu2 %v1523_v49  ;;  %1714 = vmatpush.msra.mxu3 %v1524_v14 }
 0x420   :  { %1592 = vmatpush.msra.mxu0 %v1517_v58  ;;  %1633 = vmatpush.msra.mxu1 %v1518_v60  ;;  %v6152_v60 = vld [vmem:[#allocation62_spill] sm:$0xff] }
 0x421   :  { %1674 = vmatpush.msra.mxu2 %v1519_v54  ;;  %1715 = vmatpush.msra.mxu3 %v1520_v51  ;;  %v6153_v54 = vld [vmem:[#allocation10_spill] sm:$0xff]  ;;  %v4698_v51 = vld [vmem:[#allocation4 + $0x3e0] sm:$0xff] }
 0x422   :  { %1593 = vmatpush.msra.mxu0 %v1513_v40  ;;  %1634 = vmatpush.msra.mxu1 %v1514_v8  ;;  %6154 = vst [vmem:[#allocation9_spill] sm:$0xff] %v4698_v51  ;;  %v4700_v40 = vld [vmem:[#allocation4 + $0x3e8] sm:$0xff]  ;;  %v4702_v8 = vld [vmem:[#allocation4 + $0x3c0] sm:$0xff] }
 0x423   :  { %1675 = vmatpush.msra.mxu2 %v1515_v42  ;;  %1716 = vmatpush.msra.mxu3 %v1516_v52  ;;  %6155 = vst [vmem:[#allocation13_spill] sm:$0xff] %v4702_v8  ;;  %v4706_v42 = vld [vmem:[#allocation4 + $0x3c8] sm:$0xff]  ;;  %v4708_v52 = vld [vmem:[#allocation4 + $0x3f8] sm:$0xff] }
 0x424   :  { %1594 = vmatpush.msra.mxu0 %v1509_v50  ;;  %6156 = vst [vmem:[#allocation12_spill] sm:$0xff] %v4708_v52  ;;  %v4711_v50 = vld [vmem:[#allocation4 + $0x3a0] sm:$0xff] }
 0x425   :  { %1676 = vmatpush.msra.mxu2 %v1511_v37  ;;  %6157 = vst [vmem:[#allocation11_spill] sm:$0xff] %v4711_v50  ;;  %v6159_v37 = vld [vmem:[#allocation34_spill] sm:$0xff] }
 0x426   :  { %1595 = vmatpush.msra.mxu0 %v1505_v57  ;;  %v4751_v57 = vld [vmem:[#allocation4 + $0x368] sm:$0xff] }
 0x483   :  { %v1207_v34 = vpop.f32.mrf.mxu0  ;;  %v1227_v38 = vpop.f32.mrf.mxu1 }
 0x484   :  { %v1270_v18 = vadd.f32 %v1207_v34, %v133_v13  ;;  %v1271_v6 = vadd.f32 %v1227_v38, %v174_v1  ;;  %v1510_v13 = vld [vmem:[%s5681_s2 + $0x28] sm:$0xff]  ;;  %v1512_v1 = vld [vmem:[%s5681_s2 + $0x38] sm:$0xff]  ;;  %v6150_v34 = vld [vmem:[#allocation59_spill] sm:$0xff] }
 0x485   :  { %v215_v38 = vadd.f32 %v6150_v34, %v6145_v56  ;;  %1635 = vmatpush.msra.mxu1 %v1510_v13  ;;  %1717 = vmatpush.msra.mxu3 %v1512_v1  ;;  %v4715_v13 = vld [vmem:[#allocation4 + $0x3d8] sm:$0xff]  ;;  %v4734_v1 = vld [vmem:[#allocation4 + $0x3f0] sm:$0xff] }
 0x486   :  { %v3012_v19 = vmul.f32 -1.442695, %v1270_v18  ;;  %v3013_v9 = vmul.f32 -1.442695, %v1271_v6  ;;  %v1507_v18 = vld [vmem:[%s5681_s2 + $0x10] sm:$0xff]  ;;  %v1508_v6 = vld [vmem:[%s5681_s2 + $0x18] sm:$0xff] }
 0x487   :  { %1636 = vmatpush.msra.mxu1 %v1506_v31  ;;  %1677 = vmatpush.msra.mxu2 %v1507_v18  ;;  %6158 = vst [vmem:[#allocation14_spill] sm:$0xff] %v4715_v13  ;;  %v4739_v34 = vld [vmem:[#allocation4 + $0x3b8] sm:$0xff]  ;;  %v4759_v18 = vld [vmem:[#allocation4 + $0x390] sm:$0xff] }
 0x488   :  { %3139 = vpow2.f32 %v3012_v19  ;;  %1718 = vmatpush.msra.mxu3 %v1508_v6  ;;  %v4753_v31 = vld [vmem:[#allocation4 + $0x398] sm:$0xff] }
 0x489   :  { %3141 = vpow2.f32 %v3013_v9  ;;  %v4763_v6 = vld [vmem:[#allocation4 + $0x378] sm:$0xff] }
 0x48a   :  { %v1267_v11 = vpop.f32.mrf.mxu3  ;;  %v1247_v61 = vpop.f32.mrf.mxu2 }
 0x48b   :  { %v1273_v12 = vadd.f32 %v1267_v11, %v256_v2  ;;  %v1272_v53 = vadd.f32 %v1247_v61, %v215_v38  ;;  %v4713_v61 = vld [vmem:[#allocation4 + $0x3a8] sm:$0xff] }
 0x48c   :  { %v4744_v38 = vld [vmem:[#allocation4 + $0x388] sm:$0xff] }
 0x48d   :  { %v3014_v25 = vmul.f32 -1.442695, %v1273_v12 }
 0x48e   :  { %v3140_v35 = vpop.eup %3139 }
 0x48f   :  { %v3142_v47 = vpop.eup %3141  ;;  %v4612_v48 = vadd.f32 1.0, %v3140_v35  ;;  %3143 = vpow2.f32 %v3014_v25 }
 0x490   :  { %v4620_v0 = vadd.f32 1.0, %v3142_v47 }
 0x491   :  { %3145 = vrcp.f32 %v4612_v48  ;;  %v1293_v36 = vand.u32 2147483648, %v4612_v48  ;;  %v1291_v4 = vand.u32 2147483647, %v4612_v48  ;;  %vm1287_vm7 = vweird.f32 %v4612_v48 }
 0x492   :  { %3147 = vrcp.f32 %v4620_v0  ;;  %v1308_v39 = vand.u32 2147483648, %v4620_v0  ;;  %v1306_v2 = vand.u32 2147483647, %v4620_v0  ;;  %vm1302_vm8 = vweird.f32 %v4620_v0 }
 0x493   :  { %v1294_v3 = vor.u32 1.1754944e-38, %v1293_v36  ;;  %vm1292_vm11 = vcmp.eq.f32.partialorder %v1291_v4, 8.507059e+37  ;;  %v4773_v36 = vld [vmem:[#allocation4 + $0x340] sm:$0xff] }
 0x494   :  { %v1309_v12 = vor.u32 1.1754944e-38, %v1308_v39  ;;  %vm1307_vm12 = vcmp.eq.f32.partialorder %v1306_v2, 8.507059e+37  ;;  %v4775_v39 = vld [vmem:[#allocation4 + $0x348] sm:$0xff]  ;;  %v4789_v2 = vld [vmem:[#allocation4 + $0x320] sm:$0xff] }
 0x495   :  { %v3144_v55 = vpop.eup %3143 }
 0x496   :  { %v1316_v62 = vadd.f32 1.0, %v3144_v55  ;;  %v4737_v55 = vld [vmem:[#allocation4 + $0x3d0] sm:$0xff] }
 0x497   :  { %v3146_v44 = vpop.eup %3145  ;;  %6160 = vst [vmem:[#allocation47_spill] sm:$0xff] %v4737_v55 }
 0x498   :  { %v3148_v7 = vpop.eup %3147  ;;  %v1283_v59 = vmul.f32 %v3146_v44, %v4612_v48  ;;  %3149 = vrcp.f32 %v1316_v62  ;;  %vm1288_vm5 = vweird.f32 %v3146_v44  ;;  %v1328_v45 = vand.u32 2147483648, %v1316_v62 }
 0x499   :  { %v1298_v19 = vmul.f32 %v3148_v7, %v4620_v0  ;;  %3151 = vtanh.f32 %v1272_v53  ;;  %vm1303_vm6 = vweird.f32 %v3148_v7  ;;  %vm1289_vm9 = vmor %vm1287_vm7, %vm1288_vm5  ;;  %vm1322_vm14 = vweird.f32 %v1316_v62  ;;  %v6162_v53 = vld [vmem:[#allocation57_spill] sm:$0xff] }
 0x49a   :  { %v1284_v9 = vsub.f32 1.0, %v1283_v59  ;;  %vm1304_vm10 = vmor %vm1302_vm8, %vm1303_vm6  ;;  %v1326_v47 = vand.u32 2147483647, %v1316_v62  ;;  %v1329_v49 = vor.u32 1.1754944e-38, %v1328_v45  ;;  %v6163_v59 = vld [vmem:[#allocation58_spill] sm:$0xff]  ;;  %v4828_v45 = vld [vmem:[#allocation4 + $0x2f0] sm:$0xff] }
 0x49b   :  { %v1299_v63 = vsub.f32 1.0, %v1298_v19  ;;  %v177_v19 = vadd.f32 %v6163_v59, %v6141_v30  ;;  %v4787_v30 = vld [vmem:[#allocation4 + $0x350] sm:$0xff] }
 0x49c   :  { %v1285_v17 = vmul.f32 %v3146_v44, %v1284_v9  ;;  %vm1327_vm0 = vcmp.eq.f32.partialorder %v1326_v47, 8.507059e+37 }
 0x49d   :  { %v1300_v10 = vmul.f32 %v3148_v7, %v1299_v63 }
 0x49e   :  { %v3150_v20 = vpop.eup %3149  ;;  %v1286_v24 = vadd.f32 %v3146_v44, %v1285_v17  ;;  %v4777_v17 = vld [vmem:[#allocation4 + $0x358] sm:$0xff] }
 0x49f   :  { %v1301_v11 = vadd.f32 %v3148_v7, %v1300_v10  ;;  %v1318_v16 = vmul.f32 %v3150_v20, %v1316_v62  ;;  %v3152_v21 = vpop.eup %3151  ;;  %vm1323_vm13 = vweird.f32 %v3150_v20  ;;  %v4755_v62 = vld [vmem:[#allocation4 + $0x3b0] sm:$0xff] }
 0x4a0   :  { %v1290_v15 = vsel %vm1289_vm9, %v3146_v44, %v1286_v24  ;;  %vm1324_vm15 = vmor %vm1322_vm14, %vm1323_vm13  ;;  %v4766_v44 = vld [vmem:[#allocation4 + $0x370] sm:$0xff]  ;;  %v4794_v24 = vld [vmem:[#allocation4 + $0x338] sm:$0xff] }
 0x4a1   :  { %v1295_v22 = vsel %vm1292_vm11, %v1294_v3, %v1290_v15  ;;  %v1305_v23 = vsel %vm1304_vm10, %v3148_v7, %v1301_v11  ;;  %v1319_v25 = vsub.f32 1.0, %v1318_v16  ;;  %v136_v7 = vadd.f32 %v6162_v53, %v6139_v26  ;;  %v4783_v26 = vld [vmem:[%s5683_s4 + $0x4] sm:$0xf]  ;;  %v4799_v16 = vld [vmem:[#allocation4 + $0x330] sm:$0xff]  ;;  %v4803_v15 = vld [vmem:[#allocation4 + $0x308] sm:$0xff] }
 0x4a2   :  { %v1310_v27 = vsel %vm1307_vm12, %v1309_v12, %v1305_v23  ;;  %v1333_v28 = vmul.f32 %v3152_v21, %v1295_v22  ;;  %6164 = vst [vmem:[#allocation16_spill] sm:$0xff] %v4783_v26  ;;  %v4801_v12 = vld [vmem:[#allocation4 + $0x300] sm:$0xff]  ;;  %v4806_v21 = vld [vmem:[#allocation4 + $0x318] sm:$0xff]  ;;  %v4810_v22 = vperm.slane %v4783_v26, 0  ;;  %v4814_v23 = vld [vmem:[#allocation4 + $0x310] sm:$0xff] }
 0x4a3   :  { %v1332_v32 = vmul.f32 %v1310_v27, %v4459_v5  ;;  %v1320_v35 = vmul.f32 %v3150_v20, %v1319_v25  ;;  %v6151_v5 = vld [vmem:[#allocation46_spill] sm:$0xff]  ;;  %v6166_v25 = vld [vmem:[#allocation60_spill] sm:$0xff] }
 0x4a4   :  { %6165 = vst [vmem:[#allocation48_spill] sm:$0xff] %v4810_v22  ;;  %v259_v27 = vadd.f32 %v6166_v25, %v6143_v46  ;;  %v4848_v53 = vld [vmem:[#allocation4 + $0x288] sm:$0xff] }
 0x4a5   :  { %v4683_v41 = vadd.f32 %v1333_v28, %v1332_v32  ;;  %v1321_v43 = vadd.f32 %v3150_v20, %v1320_v35  ;;  %v4818_v28 = vld [vmem:[#allocation4 + $0x2e0] sm:$0xff]  ;;  %v4820_v32 = vld [vmem:[#allocation4 + $0x2e8] sm:$0xff]  ;;  %v4823_v35 = vld [vmem:[#allocation4 + $0x2f8] sm:$0xff]  ;;  %6168 = vst [vmem:[#allocation18_spill] sm:$0xff] %v4848_v53 }
 0x4a6   :  { %v4866_v25 = vld [vmem:[#allocation4 + $0x268] sm:$0xff] }
 0x4a7   :  { %3153 = vtanh.f32 %v4683_v41  ;;  %v1325_v48 = vsel %vm1324_vm15, %v3150_v20, %v1321_v43  ;;  %v4791_v20 = vld [vmem:[#allocation4 + $0x328] sm:$0xff]  ;;  %6173 = vst [vmem:[#allocation23_spill] sm:$0xff] %v4866_v25 }
 0x4a8   :  { %v1330_v0 = vsel %vm1327_vm0, %v1329_v49, %v1325_v48  ;;  %v4830_v49 = vld [vmem:[#allocation4 + $0x2c0] sm:$0xff] }
 0x4ad   :  { %v3154_v14 = vpop.eup %3153 }
 0x4ae   :  { %v1336_v58 = vmul.f32 %v3154_v14, %v1330_v0  ;;  %v4832_v14 = vld [vmem:[#allocation4 + $0x2c8] sm:$0xff]  ;;  %v4835_v0 = vld [vmem:[#allocation4 + $0x2d8] sm:$0xff] }
 0x4b0   :  { %1362 = vmatmul.f32.vlgmr.msrb.gmra.mxu0 %v1336_v58  ;;  %1382 = vmatmul.f32.vlgmr.msrb.gmra.mxu1 %v1336_v58 }
 0x4b1   :  { %1402 = vmatmul.f32.vlgmr.msrb.gmra.mxu2 %v1336_v58  ;;  %1422 = vmatmul.f32.vlgmr.msrb.gmra.mxu3 %v1336_v58 }
 0x4b2   :  { %1890 = vmatpush.msrb.mxu0 %v4698_v51  ;;  %1910 = vmatpush.msrb.mxu1 %v4700_v40 }
 0x4b3   :  { %1950 = vmatpush.msrb.mxu3 %v4708_v52  ;;  %1930 = vmatpush.msrb.mxu2 %v4734_v1 }
 0x4b4   :  { %1891 = vmatpush.msrb.mxu0 %v4702_v8  ;;  %1911 = vmatpush.msrb.mxu1 %v4706_v42 }
 0x4b5   :  { %1951 = vmatpush.msrb.mxu3 %v4715_v13  ;;  %1931 = vmatpush.msrb.mxu2 %v4737_v55 }
 0x4b6   :  { %1892 = vmatpush.msrb.mxu0 %v4711_v50  ;;  %1912 = vmatpush.msrb.mxu1 %v4713_v61 }
 0x4b7   :  { %1952 = vmatpush.msrb.mxu3 %v4739_v34  ;;  %1932 = vmatpush.msrb.mxu2 %v4755_v62 }
 0x4b8   :  { %1596 = vmatmul.f32.vlgmr.msra.gmra.mxu0 %v6151_v5  ;;  %1637 = vmatmul.f32.vlgmr.msra.gmra.mxu1 %v6151_v5 }
 0x4b9   :  { %1678 = vmatmul.f32.vlgmr.msra.gmra.mxu2 %v6151_v5  ;;  %1719 = vmatmul.f32.vlgmr.msra.gmra.mxu3 %v6151_v5  ;;  %v4841_v5 = vld [vmem:[#allocation4 + $0x2a0] sm:$0xff] }
 0x4ba   :  { %1913 = vmatpush.msrb.mxu1 %v4744_v38  ;;  %1953 = vmatpush.msrb.mxu3 %v4753_v31 }
 0x4bb   :  { %1933 = vmatpush.msrb.mxu2 %v4759_v18 }
 0x4bc   :  { %1914 = vmatpush.msrb.mxu1 %v4751_v57  ;;  %1954 = vmatpush.msrb.mxu3 %v4763_v6 }
 0x4bd   :  { %1934 = vmatpush.msrb.mxu2 %v4766_v44 }
 0x4be   :  { %1915 = vmatpush.msrb.mxu1 %v4775_v39  ;;  %1955 = vmatpush.msrb.mxu3 %v4777_v17 }
 0x4bf   :  { %1935 = vmatpush.msrb.mxu2 %v4787_v30 }
 0x4c0   :  { %1599 = vmatmul.f32.gmra.mxu0 %v6152_v60  ;;  %1640 = vmatmul.f32.gmra.mxu1 %v6152_v60 }
 0x4c1   :  { %1681 = vmatmul.f32.gmra.mxu2 %v6152_v60  ;;  %1722 = vmatmul.f32.gmra.mxu3 %v6152_v60  ;;  %v4843_v60 = vld [vmem:[#allocation4 + $0x2a8] sm:$0xff] }
 0x4c2   :  { %1916 = vmatpush.msrb.mxu1 %v4791_v20  ;;  %1956 = vmatpush.msrb.mxu3 %v4794_v24 }
 0x4c3   :  { %1936 = vmatpush.msrb.mxu2 %v4799_v16 }
 0x4c4   :  { %1917 = vmatpush.msrb.mxu1 %v4803_v15  ;;  %1957 = vmatpush.msrb.mxu3 %v4806_v21 }
 0x4c5   :  { %1937 = vmatpush.msrb.mxu2 %v4814_v23 }
 0x4c6   :  { %1918 = vmatpush.msrb.mxu1 %v4820_v32  ;;  %1958 = vmatpush.msrb.mxu3 %v4823_v35 }
 0x4c7   :  { %1938 = vmatpush.msrb.mxu2 %v4828_v45 }
 0x4c8   :  { %1602 = vmatmul.f32.gmra.mxu0 %v6153_v54  ;;  %1643 = vmatmul.f32.gmra.mxu1 %v6153_v54 }
 0x4c9   :  { %1684 = vmatmul.f32.gmra.mxu2 %v6153_v54  ;;  %1725 = vmatmul.f32.gmra.mxu3 %v6153_v54 }
 0x4ca   :  { %1919 = vmatpush.msrb.mxu1 %v4832_v14  ;;  %1959 = vmatpush.msrb.mxu3 %v4835_v0 }
 0x4cc   :  { %1920 = vmatpush.msrb.mxu1 %v4843_v60 }
 0x4ce   :  { %1921 = vmatpush.msrb.mxu1 %v4848_v53  ;;  %v4898_v53 = vld [vmem:[#allocation4 + $0x228] sm:$0xff] }
 0x4cf   :  { %6182 = vst [vmem:[#allocation30_spill] sm:$0xff] %v4898_v53 }
 0x4d0   :  { %1605 = vmatmul.f32.gmra.mxu0 %v6159_v37  ;;  %1646 = vmatmul.f32.gmra.mxu1 %v6159_v37 }
 0x4d1   :  { %1687 = vmatmul.f32.gmra.mxu2 %v6159_v37  ;;  %1728 = vmatmul.f32.gmra.mxu3 %v6159_v37  ;;  %v4846_v37 = vld [vmem:[#allocation4 + $0x280] sm:$0xff] }
 0x4d2   :  { %6167 = vst [vmem:[#allocation51_spill] sm:$0xff] %v4846_v37  ;;  %1922 = vmatpush.msrb.mxu1 %v4866_v25 }
 0x4d8   :  { %1608 = vmatmul.f32.gmra.mxu0 %v4380_v29  ;;  %1649 = vmatmul.f32.gmra.mxu1 %v4380_v29 }
 0x4d9   :  { %1690 = vmatmul.f32.gmra.mxu2 %v4380_v29  ;;  %1731 = vmatmul.f32.gmra.mxu3 %v4380_v29  ;;  %v4742_v29 = vld [vmem:[#allocation4 + $0x380] sm:$0xff] }
 0x4da   :  { %6161 = vst [vmem:[#allocation15_spill] sm:$0xff] %v4742_v29  ;;  %1893 = vmatpush.msrb.mxu0 %v4742_v29 }
 0x4e0   :  { %1611 = vmatmul.f32.gmra.mxu0 %v4462_v33  ;;  %1652 = vmatmul.f32.gmra.mxu1 %v4462_v33 }
 0x4e1   :  { %1693 = vmatmul.f32.gmra.mxu2 %v4462_v33  ;;  %1734 = vmatmul.f32.gmra.mxu3 %v4462_v33  ;;  %v4747_v33 = vld [vmem:[#allocation4 + $0x360] sm:$0xff] }
 0x4e2   :  { %1894 = vmatpush.msrb.mxu0 %v4747_v33 }
 0x4e4   :  { %1895 = vmatpush.msrb.mxu0 %v4773_v36 }
 0x4e6   :  { %1896 = vmatpush.msrb.mxu0 %v4789_v2 }
 0x4e8   :  { %1614 = vmatmul.f32.gmra.mxu0 %v1336_v58  ;;  %1655 = vmatmul.f32.gmra.mxu1 %v1336_v58 }
 0x4e9   :  { %1696 = vmatmul.f32.gmra.mxu2 %v1336_v58  ;;  %1737 = vmatmul.f32.gmra.mxu3 %v1336_v58 }
 0x4ea   :  { %1897 = vmatpush.msrb.mxu0 %v4801_v12 }
 0x4ec   :  { %1898 = vmatpush.msrb.mxu0 %v4818_v28 }
 0x4ee   :  { %1899 = vmatpush.msrb.mxu0 %v4830_v49 }
 0x4f0   :  { %1900 = vmatpush.msrb.mxu0 %v4841_v5 }
 0x4f2   :  { %1901 = vmatpush.msrb.mxu0 %v4846_v37  ;;  %v6184_v37 = vld [vmem:[#allocation61_spill] sm:$0xff] }
 0x52d   :  { %v1363_v9 = vpop.f32.mrf.mxu0  ;;  %v1383_v63 = vpop.f32.mrf.mxu1 }
 0x52e   :  { %v1426_v4 = vadd.f32 %v1363_v9, %v136_v7  ;;  %v1427_v10 = vadd.f32 %v1383_v63, %v177_v19  ;;  %v4850_v7 = vld [vmem:[#allocation4 + $0x2b8] sm:$0xff]  ;;  %v4856_v63 = vld [vmem:[#allocation4 + $0x2d0] sm:$0xff] }
 0x52f   :  { %6169 = vst [vmem:[#allocation20_spill] sm:$0xff] %v4850_v7  ;;  %v4854_v9 = vld [vmem:[#allocation4 + $0x298] sm:$0xff]  ;;  %1960 = vmatpush.msrb.mxu3 %v4850_v7  ;;  %1939 = vmatpush.msrb.mxu2 %v4856_v63  ;;  %v218_v7 = vadd.f32 %v6184_v37, %v6145_v56 }
 0x530   :  { %v3015_v3 = vmul.f32 -1.442695, %v1426_v4  ;;  %v3016_v11 = vmul.f32 -1.442695, %v1427_v10  ;;  %6170 = vst [vmem:[#allocation21_spill] sm:$0xff] %v4854_v9  ;;  %v4920_v56 = vld [vmem:[#allocation4 + $0x218] sm:$0xff] }
 0x531   :  { %1961 = vmatpush.msrb.mxu3 %v4854_v9  ;;  %v4896_v9 = vld [vmem:[#allocation4 + $0x220] sm:$0xff]  ;;  %6189 = vst [vmem:[#allocation38_spill] sm:$0xff] %v4920_v56 }
 0x532   :  { %3155 = vpow2.f32 %v3015_v3  ;;  %v4861_v3 = vperm.slane %v4783_v26, 3  ;;  %6181 = vst [vmem:[#allocation37_spill] sm:$0xff] %v4896_v9 }
 0x533   :  { %3157 = vpow2.f32 %v3016_v11  ;;  %v4864_v11 = vld [vmem:[#allocation4 + $0x260] sm:$0xff] }
 0x534   :  { %v1423_v43 = vpop.f32.mrf.mxu3  ;;  %6171 = vst [vmem:[#allocation29_spill] sm:$0xff] %v4861_v3  ;;  %1902 = vmatpush.msrb.mxu0 %v4864_v11 }
 0x535   :  { %v1429_v47 = vadd.f32 %v1423_v43, %v259_v27  ;;  %v1597_v46 = vpop.f32.mrf.mxu0  ;;  %v1638_v48 = vpop.f32.mrf.mxu1  ;;  %6172 = vst [vmem:[#allocation22_spill] sm:$0xff] %v4864_v11  ;;  %v4869_v27 = vld [vmem:[#allocation4 + $0x2b0] sm:$0xff] }
 0x536   :  { %v1598_v58 = vadd.f32 %v1597_v46, %v4810_v22  ;;  %6174 = vst [vmem:[#allocation24_spill] sm:$0xff] %v4869_v27  ;;  %v4877_v46 = vld [vmem:[#allocation4 + $0x290] sm:$0xff]  ;;  %v4881_v48 = vld [vmem:[#allocation4 + $0x240] sm:$0xff]  ;;  %1940 = vmatpush.msrb.mxu2 %v4869_v27 }
 0x537   :  { %v3017_v54 = vmul.f32 -1.442695, %v1429_v47  ;;  %v4875_v47 = vld [vmem:[#allocation4 + $0x278] sm:$0xff]  ;;  %6176 = vst [vmem:[#allocation35_spill] sm:$0xff] %v4877_v46  ;;  %1903 = vmatpush.msrb.mxu0 %v4881_v48  ;;  %v4902_v11 = vld [vmem:[#allocation4 + $0x250] sm:$0xff] }
 0x538   :  { %v3156_v59 = vpop.eup %3155  ;;  %v3019_v19 = vmul.f32 -1.442695, %v1598_v58  ;;  %6175 = vst [vmem:[#allocation33_spill] sm:$0xff] %v4875_v47  ;;  %v4883_v58 = vld [vmem:[#allocation4 + $0x248] sm:$0xff]  ;;  %1962 = vmatpush.msrb.mxu3 %v4875_v47  ;;  %1941 = vmatpush.msrb.mxu2 %v4877_v46  ;;  %v4912_v47 = vld [vmem:[#allocation4 + $0x238] sm:$0xff] }
 0x539   :  { %v3158_v4 = vpop.eup %3157  ;;  %v4858_v10 = vadd.f32 1.0, %v3156_v59  ;;  %3159 = vpow2.f32 %v3017_v54  ;;  %6177 = vst [vmem:[#allocation25_spill] sm:$0xff] %v4881_v48  ;;  %v1403_v54 = vpop.f32.mrf.mxu2  ;;  %1923 = vmatpush.msrb.mxu1 %v4883_v58  ;;  %1904 = vmatpush.msrb.mxu0 %v4896_v9 }
 0x53a   :  { %v4871_v43 = vadd.f32 1.0, %v3158_v4  ;;  %3161 = vpow2.f32 %v3019_v19  ;;  %6178 = vst [vmem:[#allocation26_spill] sm:$0xff] %v4883_v58  ;;  %v4889_v19 = vld [vmem:[#allocation4 + $0x270] sm:$0xff]  ;;  %v4891_v4 = vld [vmem:[#allocation4 + $0x258] sm:$0xff]  ;;  %v1428_v37 = vadd.f32 %v1403_v54, %v218_v7 }
 0x53b   :  { %3163 = vrcp.f32 %v4858_v10  ;;  %6179 = vst [vmem:[#allocation27_spill] sm:$0xff] %v4889_v19  ;;  %1942 = vmatpush.msrb.mxu2 %v4889_v19  ;;  %1963 = vmatpush.msrb.mxu3 %v4891_v4  ;;  %v4918_v58 = vld [vmem:[#allocation4 + $0x230] sm:$0xff]  ;;  %vm1443_vm3 = vweird.f32 %v4858_v10 }
 0x53c   :  { %3165 = vrcp.f32 %v4871_v43  ;;  %v1720_v59 = vpop.f32.mrf.mxu3  ;;  %6180 = vst [vmem:[#allocation43_spill] sm:$0xff] %v4891_v4  ;;  %1924 = vmatpush.msrb.mxu1 %v4898_v53  ;;  %v4935_v53 = vld [vmem:[#allocation4 + $0x210] sm:$0xff]  ;;  %vm1458_vm4 = vweird.f32 %v4871_v43 }
 0x53d   :  { %v1721_v22 = vadd.f32 %v1720_v59, %v4861_v3  ;;  %6183 = vst [vmem:[#allocation31_spill] sm:$0xff] %v4902_v11  ;;  %v4908_v59 = vld [vmem:[#allocation4 + $0x200] sm:$0xff]  ;;  %v4910_v3 = vld [vmem:[#allocation4 + $0x208] sm:$0xff]  ;;  %1943 = vmatpush.msrb.mxu2 %v4902_v11  ;;  %1964 = vmatpush.msrb.mxu3 %v4912_v47 }
 0x53e   :  { %6185 = vst [vmem:[#allocation40_spill] sm:$0xff] %v4908_v59  ;;  %1905 = vmatpush.msrb.mxu0 %v4908_v59  ;;  %1925 = vmatpush.msrb.mxu1 %v4910_v3  ;;  %v4947_v59 = vperm.slane %v4783_v26, 2  ;;  %v1462_v26 = vand.u32 2147483647, %v4871_v43 }
 0x53f   :  { %v3160_v25 = vpop.eup %3159  ;;  %v3020_v27 = vmul.f32 -1.442695, %v1721_v22  ;;  %6186 = vst [vmem:[#allocation32_spill] sm:$0xff] %v4910_v3  ;;  %1944 = vmatpush.msrb.mxu2 %v4918_v58  ;;  %1965 = vmatpush.msrb.mxu3 %v4920_v56  ;;  %v1449_v3 = vand.u32 2147483648, %v4858_v10  ;;  %v1464_v56 = vand.u32 2147483648, %v4871_v43 }
 0x540   :  { %6187 = vst [vmem:[#allocation41_spill] sm:$0xff] %v4912_v47  ;;  %v3162_v48 = vpop.eup %3161  ;;  %v4914_v46 = vadd.f32 1.0, %v3160_v25  ;;  %2041 = vmatpush.msra.mxu0 %v4698_v51  ;;  %2061 = vmatpush.msra.mxu1 %v4700_v40  ;;  %vm1463_vm8 = vcmp.eq.f32.partialorder %v1462_v26, 8.507059e+37 }
 0x541   :  { %6188 = vst [vmem:[#allocation36_spill] sm:$0xff] %v4918_v58  ;;  %v4922_v22 = vpop.eup %3163  ;;  %v4924_v4 = vadd.f32 1.0, %v3162_v48  ;;  %3167 = vpow2.f32 %v3020_v27  ;;  %v1447_v48 = vand.u32 2147483647, %v4858_v10  ;;  %1945 = vmatpush.msrb.mxu2 %v4935_v53  ;;  %2101 = vmatpush.msra.mxu3 %v4708_v52  ;;  %v1679_v51 = vpop.f32.mrf.mxu2 }
 0x542   :  { %v4928_v25 = vpop.eup %3165  ;;  %v1439_v9 = vmul.f32 %v4922_v22, %v4858_v10  ;;  %3169 = vrcp.f32 %v4914_v46  ;;  %6190 = vst [vmem:[#allocation39_spill] sm:$0xff] %v4935_v53  ;;  %vm1444_vm1 = vweird.f32 %v4922_v22  ;;  %2042 = vmatpush.msra.mxu0 %v4702_v8  ;;  %2062 = vmatpush.msra.mxu1 %v4706_v42  ;;  %vm1478_vm13 = vweird.f32 %v4914_v46 }
 0x543   :  { %v1454_v7 = vmul.f32 %v4928_v25, %v4871_v43  ;;  %3171 = vrcp.f32 %v4924_v4  ;;  %6191 = vst [vmem:[#allocation45_spill] sm:$0xff] %v4947_v59  ;;  %2081 = vmatpush.msra.mxu2 %v4734_v1  ;;  %vm1459_vm2 = vweird.f32 %v4928_v25  ;;  %2102 = vmatpush.msra.mxu3 %v4715_v13  ;;  %vm4966_vm5 = vcmp.eq.f32.partialorder %v1447_v48, 8.507059e+37  ;;  %vm4978_vm6 = vmor %vm1443_vm3, %vm1444_vm1 }
 0x544   :  { %v1440_v27 = vsub.f32 1.0, %v1439_v9  ;;  %3173 = vtanh.f32 %v1428_v37  ;;  %2043 = vmatpush.msra.mxu0 %v4711_v50  ;;  %v1450_v43 = vor.u32 1.1754944e-38, %v1449_v3  ;;  %2063 = vmatpush.msra.mxu1 %v4713_v61  ;;  %vm1460_vm7 = vmor %vm1458_vm4, %vm1459_vm2  ;;  %v1465_v50 = vor.u32 1.1754944e-38, %v1464_v56 }
 0x545   :  { %v1455_v54 = vsub.f32 1.0, %v1454_v7  ;;  %2082 = vmatpush.msra.mxu2 %v4737_v55  ;;  %2103 = vmatpush.msra.mxu3 %v4739_v34  ;;  %vm1853_vm11 = vweird.f32 %v4924_v4 }
 0x546   :  { %v1441_v9 = vmul.f32 %v4922_v22, %v1440_v27  ;;  %2044 = vmatpush.msra.mxu0 %v4742_v29  ;;  %2064 = vmatpush.msra.mxu1 %v4744_v38 }
 0x547   :  { %v3168_v7 = vpop.eup %3167  ;;  %v1456_v37 = vmul.f32 %v4928_v25, %v1455_v54  ;;  %2083 = vmatpush.msra.mxu2 %v4755_v62  ;;  %2104 = vmatpush.msra.mxu3 %v4753_v31 }
 0x548   :  { %v4962_v27 = vpop.eup %3169  ;;  %v1442_v52 = vadd.f32 %v4922_v22, %v1441_v9  ;;  %v4970_v54 = vadd.f32 1.0, %v3168_v7  ;;  %v1680_v7 = vadd.f32 %v1679_v51, %v4947_v59  ;;  %2045 = vmatpush.msra.mxu0 %v4747_v33  ;;  %2065 = vmatpush.msra.mxu1 %v4751_v57 }
 0x549   :  { %v4974_v10 = vpop.eup %3171  ;;  %v1457_v48 = vadd.f32 %v4928_v25, %v1456_v37  ;;  %v1474_v9 = vmul.f32 %v4962_v27, %v4914_v46  ;;  %2084 = vmatpush.msra.mxu2 %v4759_v18  ;;  %2105 = vmatpush.msra.mxu3 %v4763_v6  ;;  %vm1479_vm10 = vweird.f32 %v4962_v27 }
 0x54a   :  { %v1446_v55 = vsel %vm4978_vm6, %v4922_v22, %v1442_v52  ;;  %v1849_v3 = vmul.f32 %v4974_v10, %v4924_v4  ;;  %3175 = vrcp.f32 %v4970_v54  ;;  %v3174_v51 = vpop.eup %3173  ;;  %vm1854_vm9 = vweird.f32 %v4974_v10  ;;  %2046 = vmatpush.msra.mxu0 %v4773_v36  ;;  %2066 = vmatpush.msra.mxu1 %v4775_v39  ;;  %vm5041_vm15 = vmor %vm1478_vm13, %vm1479_vm10 }
 0x54b   :  { %v1451_v37 = vsel %vm4966_vm5, %v1450_v43, %v1446_v55  ;;  %v1461_v59 = vsel %vm1460_vm7, %v4928_v25, %v1457_v48  ;;  %v1475_v56 = vsub.f32 1.0, %v1474_v9  ;;  %v1859_v55 = vand.u32 2147483648, %v4924_v4  ;;  %2085 = vmatpush.msra.mxu2 %v4766_v44  ;;  %2106 = vmatpush.msra.mxu3 %v4777_v17  ;;  %vm1855_vm12 = vmor %vm1853_vm11, %vm1854_vm9 }
 0x54c   :  { %v1466_v52 = vsel %vm1463_vm8, %v1465_v50, %v1461_v59  ;;  %v1489_v13 = vmul.f32 %v3174_v51, %v1451_v37  ;;  %v1850_v22 = vsub.f32 1.0, %v1849_v3  ;;  %3177 = vtanh.f32 %v1680_v7  ;;  %2047 = vmatpush.msra.mxu0 %v4789_v2  ;;  %2067 = vmatpush.msra.mxu1 %v4791_v20  ;;  %v6204_v51 = vld [vmem:[#allocation22_spill] sm:$0xff] }
 0x54d   :  { %v1488_v29 = vmul.f32 %v1466_v52, %v4683_v41  ;;  %v1476_v8 = vmul.f32 %v4962_v27, %v1475_v56  ;;  %v1857_v50 = vand.u32 2147483647, %v4924_v4  ;;  %2086 = vmatpush.msra.mxu2 %v4787_v30  ;;  %v1860_v48 = vor.u32 1.1754944e-38, %v1859_v55  ;;  %2107 = vmatpush.msra.mxu3 %v4794_v24 }
 0x54e   :  { %v1851_v26 = vmul.f32 %v4974_v10, %v1850_v22  ;;  %v1482_v7 = vand.u32 2147483647, %v4914_v46  ;;  %2048 = vmatpush.msra.mxu0 %v4801_v12  ;;  %2068 = vmatpush.msra.mxu1 %v4803_v15  ;;  %vm1873_vm2 = vweird.f32 %v4970_v54 }
 0x54f   :  { %v1490_v59 = vadd.f32 %v1489_v13, %v1488_v29  ;;  %v1477_v43 = vadd.f32 %v4962_v27, %v1476_v8  ;;  %v1484_v29 = vand.u32 2147483648, %v4914_v46  ;;  %vm1858_vm14 = vcmp.eq.f32.partialorder %v1857_v50, 8.507059e+37  ;;  %2087 = vmatpush.msra.mxu2 %v4799_v16  ;;  %2108 = vmatpush.msra.mxu3 %v4806_v21 }
 0x550   :  { %v5016_v41 = vpop.eup %3175  ;;  %v1852_v25 = vadd.f32 %v4974_v10, %v1851_v26  ;;  %2049 = vmatpush.msra.mxu0 %v4818_v28  ;;  %2069 = vmatpush.msra.mxu1 %v4820_v32  ;;  %vm1483_vm0 = vcmp.eq.f32.partialorder %v1482_v7, 8.507059e+37  ;;  %v1879_v26 = vand.u32 2147483648, %v4970_v54  ;;  %v1877_v50 = vand.u32 2147483647, %v4970_v54  ;;  %v6202_v7 = vld [vmem:[#allocation35_spill] sm:$0xff] }
 0x551   :  { %3179 = vtanh.f32 %v1490_v59  ;;  %1496 = vst [vmem:[%s5685_s6] sm:$0xff] %v1490_v59  ;;  %v1869_v4 = vmul.f32 %v5016_v41, %v4970_v54  ;;  %v1481_v46 = vsel %vm5041_vm15, %v4962_v27, %v1477_v43  ;;  %2088 = vmatpush.msra.mxu2 %v4814_v23  ;;  %v1485_v52 = vor.u32 1.1754944e-38, %v1484_v29  ;;  %2109 = vmatpush.msra.mxu3 %v4823_v35  ;;  %v6199_v43 = vld [vmem:[#allocation20_spill] sm:$0xff] }
 0x552   :  { %v1856_v9 = vsel %vm1855_vm12, %v4974_v10, %v1852_v25  ;;  %v3178_v3 = vpop.eup %3177  ;;  %2050 = vmatpush.msra.mxu0 %v4830_v49  ;;  %2070 = vmatpush.msra.mxu1 %v4832_v14  ;;  %vm1874_vm1 = vweird.f32 %v5016_v41  ;;  %v6198_v25 = vld [vmem:[#allocation24_spill] sm:$0xff]  ;;  %vm1878_vm4 = vcmp.eq.f32.partialorder %v1877_v50, 8.507059e+37  ;;  %v6215_v50 = vld [vmem:[#allocation9_spill] sm:$0xff] }
 0x553   :  { %v1861_v37 = vsel %vm1858_vm14, %v1860_v48, %v1856_v9  ;;  %v1870_v56 = vsub.f32 1.0, %v1869_v4  ;;  %2089 = vmatpush.msra.mxu2 %v4828_v45  ;;  %v1486_v27 = vsel %vm1483_vm0, %v1485_v52, %v1481_v46  ;;  %2110 = vmatpush.msra.mxu3 %v4835_v0  ;;  %vm1875_vm3 = vmor %vm1873_vm2, %vm1874_vm1  ;;  %v1880_v48 = vor.u32 1.1754944e-38, %v1879_v26  ;;  %v6200_v4 = vld [vmem:[#allocation51_spill] sm:$0xff]  ;;  %v6201_v9 = vld [vmem:[#allocation18_spill] sm:$0xff] }
 0x554   :  { %v5047_v10 = vmul.f32 %v3178_v3, %v1861_v37  ;;  %2051 = vmatpush.msra.mxu0 %v4841_v5  ;;  %2071 = vmatpush.msra.mxu1 %v4843_v60  ;;  %v6203_v3 = vld [vmem:[#allocation21_spill] sm:$0xff]  ;;  %v6205_v37 = vld [vmem:[#allocation23_spill] sm:$0xff]  ;;  %v6208_v52 = vld [vmem:[#allocation26_spill] sm:$0xff] }
 0x555   :  { %v1871_v13 = vmul.f32 %v5016_v41, %v1870_v56  ;;  %2090 = vmatpush.msra.mxu2 %v4856_v63  ;;  %2111 = vmatpush.msra.mxu3 %v6199_v43  ;;  %v6206_v56 = vld [vmem:[#allocation33_spill] sm:$0xff]  ;;  %v6214_v26 = vld [vmem:[#allocation38_spill] sm:$0xff] }
 0x556   :  { %3181 = vtanh.f32 %v5047_v10  ;;  %2052 = vmatpush.msra.mxu0 %v6200_v4  ;;  %2072 = vmatpush.msra.mxu1 %v6201_v9  ;;  %v6207_v46 = vld [vmem:[#allocation25_spill] sm:$0xff] }
 0x557   :  { %v3180_v22 = vpop.eup %3179  ;;  %v1872_v55 = vadd.f32 %v5016_v41, %v1871_v13  ;;  %2091 = vmatpush.msra.mxu2 %v6198_v25  ;;  %2112 = vmatpush.msra.mxu3 %v6203_v3  ;;  %v6209_v13 = vld [vmem:[#allocation43_spill] sm:$0xff] }
 0x558   :  { %v1492_v8 = vmul.f32 %v3180_v22, %v1486_v27  ;;  %2053 = vmatpush.msra.mxu0 %v6204_v51  ;;  %2073 = vmatpush.msra.mxu1 %v6205_v37  ;;  %v6210_v22 = vld [vmem:[#allocation37_spill] sm:$0xff]  ;;  %v6211_v27 = vld [vmem:[#allocation30_spill] sm:$0xff] }
 0x559   :  { %v1876_v59 = vsel %vm1875_vm3, %v5016_v41, %v1872_v55  ;;  %2092 = vmatpush.msra.mxu2 %v6202_v7  ;;  %2113 = vmatpush.msra.mxu3 %v6206_v56  ;;  %v6213_v55 = vld [vmem:[#allocation32_spill] sm:$0xff] }
 0x55a   :  { %1495 = vst [vmem:[%s5684_s5] sm:$0xff] %v1492_v8  ;;  %1617 = vmatmul.f32.gmra.mxu0 %v1492_v8  ;;  %1658 = vmatmul.f32.gmra.mxu1 %v1492_v8  ;;  %v1881_v54 = vsel %vm1878_vm4, %v1880_v48, %v1876_v59  ;;  %v6216_v59 = vld [vmem:[#allocation12_spill] sm:$0xff]  ;;  %v6218_v48 = vld [vmem:[#allocation47_spill] sm:$0xff] }
 0x55b   :  { %1699 = vmatmul.f32.gmra.mxu2 %v1492_v8  ;;  %1740 = vmatmul.f32.gmra.mxu3 %v1492_v8  ;;  %v6212_v8 = vld [vmem:[#allocation40_spill] sm:$0xff] }
 0x55c   :  { %v3182_v29 = vpop.eup %3181  ;;  %2093 = vmatpush.msra.mxu2 %v4889_v19  ;;  %2054 = vmatpush.msra.mxu0 %v6207_v46 }
 0x55d   :  { %v1885_v41 = vmul.f32 %v3182_v29, %v1881_v54  ;;  %2074 = vmatpush.msra.mxu1 %v6208_v52  ;;  %2114 = vmatpush.msra.mxu3 %v6209_v13  ;;  %v6217_v29 = vld [vmem:[#allocation13_spill] sm:$0xff]  ;;  %v6219_v54 = vld [vmem:[#allocation14_spill] sm:$0xff] }
 0x55e   :  { %2094 = vmatpush.msra.mxu2 %v4902_v11  ;;  %2055 = vmatpush.msra.mxu0 %v6210_v22 }
 0x55f   :  { %2075 = vmatpush.msra.mxu1 %v6211_v27  ;;  %2115 = vmatpush.msra.mxu3 %v4912_v47 }
 0x560   :  { %2095 = vmatpush.msra.mxu2 %v4918_v58  ;;  %2056 = vmatpush.msra.mxu0 %v6212_v8 }
 0x561   :  { %2076 = vmatpush.msra.mxu1 %v6213_v55  ;;  %2116 = vmatpush.msra.mxu3 %v6214_v26 }
 0x562   :  { %1906 = vmatmul.f32.vlgmr.msrb.gmra.mxu0 %v1885_v41  ;;  %1926 = vmatmul.f32.vlgmr.msrb.gmra.mxu1 %v1885_v41 }
 0x563   :  { %1946 = vmatmul.f32.vlgmr.msrb.gmra.mxu2 %v1885_v41  ;;  %1966 = vmatmul.f32.vlgmr.msrb.gmra.mxu3 %v1885_v41  ;;  %v6220_v41 = vld [vmem:[#allocation11_spill] sm:$0xff] }
 0x564   :  { %2096 = vmatpush.msra.mxu2 %v4935_v53  ;;  %2192 = vmatpush.msrb.mxu0 %v6215_v50  ;;  %v1723_v50 = vpop.f32.mrf.mxu3 }
 0x565   :  { %2212 = vmatpush.msrb.mxu1 %v4700_v40  ;;  %2252 = vmatpush.msrb.mxu3 %v6216_v59  ;;  %v6221_v40 = vld [vmem:[#allocation15_spill] sm:$0xff] }
 0x566   :  { %2232 = vmatpush.msrb.mxu2 %v4734_v1  ;;  %2193 = vmatpush.msrb.mxu0 %v6217_v29 }
 0x567   :  { %2213 = vmatpush.msrb.mxu1 %v4706_v42  ;;  %2253 = vmatpush.msrb.mxu3 %v6219_v54  ;;  %v1600_v42 = vpop.f32.mrf.mxu0  ;;  %v1682_v54 = vpop.f32.mrf.mxu2 }
 0x568   :  { %2233 = vmatpush.msrb.mxu2 %v6218_v48  ;;  %2194 = vmatpush.msrb.mxu0 %v6220_v41 }
 0x569   :  { %2214 = vmatpush.msrb.mxu1 %v4713_v61  ;;  %2254 = vmatpush.msrb.mxu3 %v4739_v34  ;;  %v1641_v61 = vpop.f32.mrf.mxu1 }
 0x56a   :  { %2234 = vmatpush.msrb.mxu2 %v4755_v62  ;;  %2195 = vmatpush.msrb.mxu0 %v6221_v40 }
 0x56b   :  { %2215 = vmatpush.msrb.mxu1 %v4744_v38  ;;  %2255 = vmatpush.msrb.mxu3 %v4753_v31 }
 0x56c   :  { %2235 = vmatpush.msrb.mxu2 %v4759_v18  ;;  %2196 = vmatpush.msrb.mxu0 %v4747_v33  ;;  %v5165_v41 = vpop.f32.mrf.mxu3 }
 0x56d   :  { %2216 = vmatpush.msrb.mxu1 %v4751_v57  ;;  %2256 = vmatpush.msrb.mxu3 %v4763_v6  ;;  %6224 = vst [vmem:[#allocation8_spill] sm:$0xff] %v5165_v41 }
 0x56e   :  { %2236 = vmatpush.msrb.mxu2 %v4766_v44  ;;  %2197 = vmatpush.msrb.mxu0 %v4773_v36 }
 0x56f   :  { %2217 = vmatpush.msrb.mxu1 %v4775_v39  ;;  %2257 = vmatpush.msrb.mxu3 %v4777_v17  ;;  %v5161_v59 = vpop.f32.mrf.mxu0 }
 0x570   :  { %2237 = vmatpush.msrb.mxu2 %v4787_v30  ;;  %2198 = vmatpush.msrb.mxu0 %v4789_v2  ;;  %6222 = vst [vmem:[#allocation42_spill] sm:$0xff] %v5161_v59 }
 0x571   :  { %2218 = vmatpush.msrb.mxu1 %v4791_v20  ;;  %2258 = vmatpush.msrb.mxu3 %v4794_v24  ;;  %v5163_v29 = vpop.f32.mrf.mxu1 }
 0x572   :  { %2238 = vmatpush.msrb.mxu2 %v4799_v16  ;;  %2199 = vmatpush.msrb.mxu0 %v4801_v12  ;;  %6223 = vst [vmem:[#allocation7_spill] sm:$0xff] %v5163_v29 }
 0x573   :  { %2219 = vmatpush.msrb.mxu1 %v4803_v15  ;;  %2259 = vmatpush.msrb.mxu3 %v4806_v21 }
 0x574   :  { %2239 = vmatpush.msrb.mxu2 %v4814_v23  ;;  %2200 = vmatpush.msrb.mxu0 %v4818_v28 }
 0x575   :  { %2220 = vmatpush.msrb.mxu1 %v4820_v32  ;;  %2260 = vmatpush.msrb.mxu3 %v4823_v35 }
 0x576   :  { %2240 = vmatpush.msrb.mxu2 %v4828_v45  ;;  %2201 = vmatpush.msrb.mxu0 %v4830_v49 }
 0x577   :  { %2221 = vmatpush.msrb.mxu1 %v4832_v14  ;;  %2261 = vmatpush.msrb.mxu3 %v4835_v0 }
 0x578   :  { %2241 = vmatpush.msrb.mxu2 %v4856_v63  ;;  %2202 = vmatpush.msrb.mxu0 %v4841_v5 }
 0x579   :  { %2222 = vmatpush.msrb.mxu1 %v4843_v60  ;;  %2262 = vmatpush.msrb.mxu3 %v6199_v43 }
 0x57a   :  { %2242 = vmatpush.msrb.mxu2 %v6198_v25  ;;  %2203 = vmatpush.msrb.mxu0 %v6200_v4 }
 0x57b   :  { %2223 = vmatpush.msrb.mxu1 %v6201_v9  ;;  %2263 = vmatpush.msrb.mxu3 %v6203_v3 }
 0x57c   :  { %2243 = vmatpush.msrb.mxu2 %v6202_v7  ;;  %2204 = vmatpush.msrb.mxu0 %v6204_v51 }
 0x57d   :  { %2224 = vmatpush.msrb.mxu1 %v6205_v37  ;;  %2264 = vmatpush.msrb.mxu3 %v6206_v56 }
 0x57e   :  { %2244 = vmatpush.msrb.mxu2 %v4889_v19  ;;  %2205 = vmatpush.msrb.mxu0 %v6207_v46 }
 0x57f   :  { %2225 = vmatpush.msrb.mxu1 %v6208_v52  ;;  %2265 = vmatpush.msrb.mxu3 %v6209_v13 }
 0x580   :  { %2245 = vmatpush.msrb.mxu2 %v4902_v11  ;;  %2206 = vmatpush.msrb.mxu0 %v6210_v22 }
 0x581   :  { %2226 = vmatpush.msrb.mxu1 %v6211_v27  ;;  %2266 = vmatpush.msrb.mxu3 %v4912_v47  ;;  %v5169_v47 = vpop.f32.mrf.mxu1 }
 0x582   :  { %2246 = vmatpush.msrb.mxu2 %v4918_v58  ;;  %2207 = vmatpush.msrb.mxu0 %v6212_v8  ;;  %v5167_v58 = vpop.f32.mrf.mxu0  ;;  %6226 = vst [vmem:[#allocation49_spill] sm:$0xff] %v5169_v47  ;;  %v5171_v8 = vpop.f32.mrf.mxu2 }
 0x583   :  { %2227 = vmatpush.msrb.mxu1 %v6213_v55  ;;  %2267 = vmatpush.msrb.mxu3 %v6214_v26  ;;  %6225 = vst [vmem:[#allocation19_spill] sm:$0xff] %v5167_v58  ;;  %v5173_v55 = vpop.f32.mrf.mxu3 }
 0x584   :  { %2247 = vmatpush.msrb.mxu2 %v4935_v53  ;;  %6227 = vst [vmem:[#allocation17_spill] sm:$0xff] %v5171_v8 }
 0x585   :  { %6228 = vst [vmem:[#allocation50_spill] sm:$0xff] %v5173_v55 }
 0x589   :  { %v5177_v26 = vpop.f32.mrf.mxu1 }
 0x58a   :  { %v5175_v53 = vpop.f32.mrf.mxu0  ;;  %6230 = vst [vmem:[#allocation52_spill] sm:$0xff] %v5177_v26  ;;  %v5179_v27 = vpop.f32.mrf.mxu2 }
 0x58b   :  { %6229 = vst [vmem:[#allocation28_spill] sm:$0xff] %v5175_v53  ;;  %v5181_v59 = vpop.f32.mrf.mxu3 }
 0x58c   :  { %6231 = vst [vmem:[#allocation44_spill] sm:$0xff] %v5179_v27 }
 0x58d   :  { %6232 = vst [vmem:[#allocation55_spill] sm:$0xff] %v5181_v59  ;;  %v6243_v59 = vld [vmem:[#allocation16_spill] sm:$0xff] }
 0x591   :  { %v5185_v22 = vpop.f32.mrf.mxu1 }
 0x592   :  { %v5183_v29 = vpop.f32.mrf.mxu0  ;;  %6234 = vst [vmem:[#allocation54_spill] sm:$0xff] %v5185_v22  ;;  %v5187_v41 = vpop.f32.mrf.mxu2  ;;  %v6245_v22 = vld [vmem:[#allocation48_spill] sm:$0xff] }
 0x593   :  { %6233 = vst [vmem:[#allocation53_spill] sm:$0xff] %v5183_v29  ;;  %v5189_v58 = vpop.f32.mrf.mxu3  ;;  %v5204_v29 = vperm.slane %v6243_v59, 1  ;;  %v1601_v13 = vadd.f32 %v1600_v42, %v6245_v22 }
 0x594   :  { %6235 = vst [vmem:[#allocation56_spill] sm:$0xff] %v5187_v41 }
 0x595   :  { %6236 = vst [vmem:[#allocation59_spill] sm:$0xff] %v5189_v58  ;;  %v1642_v41 = vadd.f32 %v1641_v61, %v5204_v29 }
 0x596   :  { %6244 = vst [vmem:[#allocation60_spill] sm:$0xff] %v5204_v29 }
 0x599   :  { %v5193_v8 = vpop.f32.mrf.mxu1 }
 0x59a   :  { %v5191_v47 = vpop.f32.mrf.mxu0  ;;  %6238 = vst [vmem:[#allocation62_spill] sm:$0xff] %v5193_v8  ;;  %v5195_v55 = vpop.f32.mrf.mxu2 }
 0x59b   :  { %6237 = vst [vmem:[#allocation46_spill] sm:$0xff] %v5191_v47  ;;  %v5197_v53 = vpop.f32.mrf.mxu3 }
 0x59c   :  { %6239 = vst [vmem:[#allocation10_spill] sm:$0xff] %v5195_v55 }
 0x59d   :  { %6240 = vst [vmem:[#allocation34_spill] sm:$0xff] %v5197_v53 }
 0x5a2   :  { %v5208_v58 = vpop.f32.mrf.mxu2 }
 0x5a3   :  { %6246 = vst [vmem:[#allocation61_spill] sm:$0xff] %v5208_v58 }
 0x5d7   :  { %v5199_v26 = vpop.f32.mrf.mxu0  ;;  %v5201_v27 = vpop.f32.mrf.mxu1 }
 0x5d8   :  { %6241 = vst [vmem:[#allocation57_spill] sm:$0xff] %v5199_v26  ;;  %v6248_v26 = vld [vmem:[#allocation29_spill] sm:$0xff] }
 0x5d9   :  { %6242 = vst [vmem:[#allocation58_spill] sm:$0xff] %v5201_v27  ;;  %v1724_v27 = vadd.f32 %v1723_v50, %v6248_v26 }
 0x5de   :  { %v5210_v47 = vpop.f32.mrf.mxu3  ;;  %v5213_v59 = vpop.f32.mrf.mxu2 }
 0x5df   :  { %6247 = vst [vmem:[#allocation24_spill] sm:$0xff] %v5210_v47  ;;  %v1907_v8 = vpop.f32.mrf.mxu0  ;;  %v1927_v11 = vpop.f32.mrf.mxu1 }
 0x5e0   :  { %v1970_v55 = vadd.f32 %v1907_v8, %v1601_v13  ;;  %v1971_v52 = vadd.f32 %v1927_v11, %v1642_v41  ;;  %6249 = vst [vmem:[#allocation20_spill] sm:$0xff] %v5213_v59  ;;  %v6250_v8 = vld [vmem:[#allocation45_spill] sm:$0xff] }
 0x5e2   :  { %v3021_v53 = vmul.f32 -1.442695, %v1970_v55  ;;  %v3022_v46 = vmul.f32 -1.442695, %v1971_v52  ;;  %v1683_v52 = vadd.f32 %v1682_v54, %v6250_v8 }
 0x5e4   :  { %3183 = vpow2.f32 %v3021_v53 }
 0x5e5   :  { %3185 = vpow2.f32 %v3022_v46 }
 0x5e6   :  { %v1967_v56 = vpop.f32.mrf.mxu3  ;;  %v1947_v13 = vpop.f32.mrf.mxu2 }
 0x5e7   :  { %v1973_v42 = vadd.f32 %v1967_v56, %v1724_v27  ;;  %v1972_v50 = vadd.f32 %v1947_v13, %v1683_v52 }
 0x5e9   :  { %v3023_v22 = vmul.f32 -1.442695, %v1973_v42 }
 0x5ea   :  { %v3184_v61 = vpop.eup %3183 }
 0x5eb   :  { %v3186_v29 = vpop.eup %3185  ;;  %v1980_v58 = vadd.f32 1.0, %v3184_v61  ;;  %3187 = vpow2.f32 %v3023_v22 }
 0x5ec   :  { %v1981_v47 = vadd.f32 1.0, %v3186_v29 }
 0x5ed   :  { %3189 = vrcp.f32 %v1980_v58  ;;  %v1993_v42 = vand.u32 2147483648, %v1980_v58  ;;  %v1991_v29 = vand.u32 2147483647, %v1980_v58  ;;  %vm1987_vm7 = vweird.f32 %v1980_v58 }
 0x5ee   :  { %3191 = vrcp.f32 %v1981_v47  ;;  %v2008_v61 = vand.u32 2147483648, %v1981_v47  ;;  %v2006_v19 = vand.u32 2147483647, %v1981_v47  ;;  %vm2002_vm8 = vweird.f32 %v1981_v47 }
 0x5ef   :  { %v1994_v13 = vor.u32 1.1754944e-38, %v1993_v42  ;;  %vm1992_vm11 = vcmp.eq.f32.partialorder %v1991_v29, 8.507059e+37 }
 0x5f0   :  { %vm2007_vm12 = vcmp.eq.f32.partialorder %v2006_v19, 8.507059e+37 }
 0x5f1   :  { %v3188_v11 = vpop.eup %3187 }
 0x5f2   :  { %v2016_v53 = vadd.f32 1.0, %v3188_v11 }
 0x5f3   :  { %v3190_v55 = vpop.eup %3189 }
 0x5f4   :  { %v3192_v46 = vpop.eup %3191  ;;  %v1983_v41 = vmul.f32 %v3190_v55, %v1980_v58  ;;  %3193 = vrcp.f32 %v2016_v53  ;;  %vm1988_vm5 = vweird.f32 %v3190_v55  ;;  %vm2022_vm14 = vweird.f32 %v2016_v53 }
 0x5f5   :  { %v1998_v59 = vmul.f32 %v3192_v46, %v1981_v47  ;;  %3195 = vtanh.f32 %v1972_v50  ;;  %vm2003_vm6 = vweird.f32 %v3192_v46  ;;  %vm1989_vm9 = vmor %vm1987_vm7, %vm1988_vm5 }
 0x5f6   :  { %v1984_v56 = vsub.f32 1.0, %v1983_v41  ;;  %vm2004_vm10 = vmor %vm2002_vm8, %vm2003_vm6  ;;  %v2009_v41 = vor.u32 1.1754944e-38, %v2008_v61 }
 0x5f7   :  { %v1999_v27 = vsub.f32 1.0, %v1998_v59 }
 0x5f8   :  { %v1985_v22 = vmul.f32 %v3190_v55, %v1984_v56 }
 0x5f9   :  { %v2000_v26 = vmul.f32 %v3192_v46, %v1999_v27 }
 0x5fa   :  { %v3194_v37 = vpop.eup %3193  ;;  %v1986_v54 = vadd.f32 %v3190_v55, %v1985_v22 }
 0x5fb   :  { %v2001_v11 = vadd.f32 %v3192_v46, %v2000_v26  ;;  %v2018_v52 = vmul.f32 %v3194_v37, %v2016_v53  ;;  %v3196_v50 = vpop.eup %3195  ;;  %vm2023_vm13 = vweird.f32 %v3194_v37  ;;  %v2028_v26 = vand.u32 2147483648, %v2016_v53 }
 0x5fc   :  { %v1990_v59 = vsel %vm1989_vm9, %v3190_v55, %v1986_v54  ;;  %v2026_v55 = vand.u32 2147483647, %v2016_v53  ;;  %vm2024_vm15 = vmor %vm2022_vm14, %vm2023_vm13  ;;  %v5240_v53 = vld [vmem:[#allocation4 + $0x3a0] sm:$0xff] }
 0x5fd   :  { %v1995_v8 = vsel %vm1992_vm11, %v1994_v13, %v1990_v59  ;;  %v2005_v56 = vsel %vm2004_vm10, %v3192_v46, %v2001_v11  ;;  %v2019_v51 = vsub.f32 1.0, %v2018_v52  ;;  %v2029_v61 = vor.u32 1.1754944e-38, %v2028_v26  ;;  %v6275_v59 = vld [vmem:[#allocation45_spill] sm:$0xff] }
 0x5fe   :  { %v2010_v27 = vsel %vm2007_vm12, %v2009_v41, %v2005_v56  ;;  %v2033_v3 = vmul.f32 %v3196_v50, %v1995_v8  ;;  %vm2027_vm0 = vcmp.eq.f32.partialorder %v2026_v55, 8.507059e+37  ;;  %v5237_v8 = vld [vmem:[#allocation4 + $0x3d8] sm:$0xff]  ;;  %v6276_v50 = vld [vmem:[#allocation17_spill] sm:$0xff] }
 0x5ff   :  { %v2032_v7 = vmul.f32 %v2010_v27, %v5047_v10  ;;  %v2020_v22 = vmul.f32 %v3194_v37, %v2019_v51  ;;  %v5220_v10 = vld [vmem:[#allocation4 + $0x3e0] sm:$0xff]  ;;  %v1686_v56 = vadd.f32 %v6276_v50, %v6275_v59 }
 0x600   :  { %v5230_v51 = vld [vmem:[#allocation4 + $0x3c0] sm:$0xff] }
 0x601   :  { %v5217_v58 = vadd.f32 %v2033_v3, %v2032_v7  ;;  %v2021_v47 = vadd.f32 %v3194_v37, %v2020_v22  ;;  %v5223_v7 = vld [vmem:[#allocation4 + $0x3e8] sm:$0xff]  ;;  %v5227_v3 = vld [vmem:[#allocation4 + $0x3f8] sm:$0xff]  ;;  %v5356_v50 = vld [vmem:[#allocation4 + $0x340] sm:$0xff] }
 0x603   :  { %3197 = vtanh.f32 %v5217_v58  ;;  %v2025_v42 = vsel %vm2024_vm15, %v3194_v37, %v2021_v47  ;;  %v5233_v37 = vld [vmem:[#allocation4 + $0x3c8] sm:$0xff] }
 0x604   :  { %v2030_v46 = vsel %vm2027_vm0, %v2029_v61, %v2025_v42 }
 0x609   :  { %v3198_v19 = vpop.eup %3197 }
 0x60a   :  { %v2036_v29 = vmul.f32 %v3198_v19, %v2030_v46 }
 0x60c   :  { %2057 = vmatmul.f32.vlgmr.msra.gmra.mxu0 %v2036_v29  ;;  %2077 = vmatmul.f32.vlgmr.msra.gmra.mxu1 %v2036_v29 }
 0x60d   :  { %2097 = vmatmul.f32.vlgmr.msra.gmra.mxu2 %v2036_v29  ;;  %2117 = vmatmul.f32.vlgmr.msra.gmra.mxu3 %v2036_v29 }
 0x60e   :  { %2343 = vmatpush.msra.mxu0 %v5220_v10  ;;  %2363 = vmatpush.msra.mxu1 %v5223_v7 }
 0x60f   :  { %2383 = vmatpush.msra.mxu2 %v4734_v1  ;;  %2403 = vmatpush.msra.mxu3 %v5227_v3  ;;  %v5243_v1 = vld [vmem:[#allocation4 + $0x3a8] sm:$0xff] }
 0x610   :  { %2344 = vmatpush.msra.mxu0 %v5230_v51  ;;  %2364 = vmatpush.msra.mxu1 %v5233_v37 }
 0x611   :  { %2384 = vmatpush.msra.mxu2 %v6218_v48  ;;  %2404 = vmatpush.msra.mxu3 %v5237_v8 }
 0x612   :  { %2345 = vmatpush.msra.mxu0 %v5240_v53  ;;  %2365 = vmatpush.msra.mxu1 %v5243_v1 }
 0x613   :  { %2385 = vmatpush.msra.mxu2 %v4755_v62  ;;  %2405 = vmatpush.msra.mxu3 %v4739_v34  ;;  %v6251_v34 = vld [vmem:[#allocation35_spill] sm:$0xff]  ;;  %v6256_v62 = vld [vmem:[#allocation33_spill] sm:$0xff] }
 0x614   :  { %2346 = vmatpush.msra.mxu0 %v6221_v40  ;;  %2366 = vmatpush.msra.mxu1 %v4744_v38  ;;  %v6252_v38 = vld [vmem:[#allocation21_spill] sm:$0xff] }
 0x615   :  { %2386 = vmatpush.msra.mxu2 %v4759_v18  ;;  %2406 = vmatpush.msra.mxu3 %v4753_v31  ;;  %v6255_v31 = vld [vmem:[#allocation27_spill] sm:$0xff]  ;;  %v6257_v18 = vld [vmem:[#allocation25_spill] sm:$0xff] }
 0x616   :  { %2347 = vmatpush.msra.mxu0 %v4747_v33  ;;  %2367 = vmatpush.msra.mxu1 %v4751_v57  ;;  %v6253_v33 = vld [vmem:[#allocation22_spill] sm:$0xff]  ;;  %v6254_v57 = vld [vmem:[#allocation23_spill] sm:$0xff] }
 0x617   :  { %2387 = vmatpush.msra.mxu2 %v4766_v44  ;;  %2407 = vmatpush.msra.mxu3 %v4763_v6  ;;  %v6258_v6 = vld [vmem:[#allocation26_spill] sm:$0xff]  ;;  %v6259_v44 = vld [vmem:[#allocation31_spill] sm:$0xff] }
 0x618   :  { %2348 = vmatpush.msra.mxu0 %v4773_v36  ;;  %2368 = vmatpush.msra.mxu1 %v4775_v39  ;;  %v6260_v36 = vld [vmem:[#allocation43_spill] sm:$0xff]  ;;  %v6261_v39 = vld [vmem:[#allocation37_spill] sm:$0xff] }
 0x619   :  { %2388 = vmatpush.msra.mxu2 %v4787_v30  ;;  %2408 = vmatpush.msra.mxu3 %v4777_v17  ;;  %v6262_v17 = vld [vmem:[#allocation30_spill] sm:$0xff]  ;;  %v6263_v30 = vld [vmem:[#allocation36_spill] sm:$0xff] }
 0x61a   :  { %2349 = vmatpush.msra.mxu0 %v4789_v2  ;;  %2369 = vmatpush.msra.mxu1 %v4791_v20  ;;  %v6264_v2 = vld [vmem:[#allocation41_spill] sm:$0xff]  ;;  %v6265_v20 = vld [vmem:[#allocation40_spill] sm:$0xff] }
 0x61b   :  { %2389 = vmatpush.msra.mxu2 %v4799_v16  ;;  %2409 = vmatpush.msra.mxu3 %v4794_v24  ;;  %v6266_v24 = vld [vmem:[#allocation32_spill] sm:$0xff]  ;;  %v6267_v16 = vld [vmem:[#allocation39_spill] sm:$0xff] }
 0x61c   :  { %2350 = vmatpush.msra.mxu0 %v4801_v12  ;;  %2370 = vmatpush.msra.mxu1 %v4803_v15  ;;  %v6268_v12 = vld [vmem:[#allocation38_spill] sm:$0xff]  ;;  %v6269_v15 = vld [vmem:[#allocation48_spill] sm:$0xff] }
 0x61d   :  { %2390 = vmatpush.msra.mxu2 %v4814_v23  ;;  %2410 = vmatpush.msra.mxu3 %v4806_v21  ;;  %v6270_v21 = vld [vmem:[#allocation42_spill] sm:$0xff] }
 0x61e   :  { %2351 = vmatpush.msra.mxu0 %v4818_v28  ;;  %2371 = vmatpush.msra.mxu1 %v4820_v32  ;;  %v1604_v23 = vadd.f32 %v6270_v21, %v6269_v15  ;;  %v6271_v28 = vld [vmem:[#allocation60_spill] sm:$0xff]  ;;  %v6272_v32 = vld [vmem:[#allocation7_spill] sm:$0xff] }
 0x61f   :  { %2391 = vmatpush.msra.mxu2 %v4828_v45  ;;  %2411 = vmatpush.msra.mxu3 %v4823_v35  ;;  %v1645_v35 = vadd.f32 %v6272_v32, %v6271_v28 }
 0x620   :  { %2352 = vmatpush.msra.mxu0 %v4830_v49  ;;  %2372 = vmatpush.msra.mxu1 %v4832_v14 }
 0x621   :  { %2392 = vmatpush.msra.mxu2 %v4856_v63  ;;  %2412 = vmatpush.msra.mxu3 %v4835_v0  ;;  %v6273_v63 = vld [vmem:[#allocation29_spill] sm:$0xff] }
 0x622   :  { %2353 = vmatpush.msra.mxu0 %v4841_v5  ;;  %2373 = vmatpush.msra.mxu1 %v4843_v60 }
 0x623   :  { %2393 = vmatpush.msra.mxu2 %v6198_v25  ;;  %2413 = vmatpush.msra.mxu3 %v6199_v43  ;;  %v6274_v25 = vld [vmem:[#allocation8_spill] sm:$0xff] }
 0x624   :  { %2354 = vmatpush.msra.mxu0 %v6200_v4  ;;  %2374 = vmatpush.msra.mxu1 %v6201_v9  ;;  %v1727_v43 = vadd.f32 %v6274_v25, %v6273_v63  ;;  %v5320_v25 = vld [vmem:[#allocation4 + $0x3d0] sm:$0xff] }
 0x625   :  { %2394 = vmatpush.msra.mxu2 %v6251_v34  ;;  %2414 = vmatpush.msra.mxu3 %v6252_v38 }
 0x626   :  { %2355 = vmatpush.msra.mxu0 %v6253_v33  ;;  %2375 = vmatpush.msra.mxu1 %v6254_v57 }
 0x627   :  { %2395 = vmatpush.msra.mxu2 %v6255_v31  ;;  %2415 = vmatpush.msra.mxu3 %v6256_v62 }
 0x628   :  { %2356 = vmatpush.msra.mxu0 %v6257_v18  ;;  %2376 = vmatpush.msra.mxu1 %v6258_v6 }
 0x629   :  { %2396 = vmatpush.msra.mxu2 %v6259_v44  ;;  %2416 = vmatpush.msra.mxu3 %v6260_v36 }
 0x62a   :  { %2357 = vmatpush.msra.mxu0 %v6261_v39  ;;  %2377 = vmatpush.msra.mxu1 %v6262_v17 }
 0x62b   :  { %2397 = vmatpush.msra.mxu2 %v6263_v30  ;;  %2417 = vmatpush.msra.mxu3 %v6264_v2 }
 0x62c   :  { %2358 = vmatpush.msra.mxu0 %v6265_v20  ;;  %2378 = vmatpush.msra.mxu1 %v6266_v24 }
 0x62d   :  { %2398 = vmatpush.msra.mxu2 %v6267_v16  ;;  %2418 = vmatpush.msra.mxu3 %v6268_v12 }
 0x689   :  { %v2058_v45 = vpop.f32.mrf.mxu0  ;;  %v2078_v49 = vpop.f32.mrf.mxu1 }
 0x68a   :  { %v2121_v14 = vadd.f32 %v2058_v45, %v1604_v23  ;;  %v2122_v0 = vadd.f32 %v2078_v49, %v1645_v35 }
 0x68c   :  { %v3024_v5 = vmul.f32 -1.442695, %v2121_v14  ;;  %v3025_v60 = vmul.f32 -1.442695, %v2122_v0 }
 0x68e   :  { %3199 = vpow2.f32 %v3024_v5 }
 0x68f   :  { %3201 = vpow2.f32 %v3025_v60 }
 0x690   :  { %v2118_v4 = vpop.f32.mrf.mxu3  ;;  %v2098_v52 = vpop.f32.mrf.mxu2 }
 0x691   :  { %v2124_v9 = vadd.f32 %v2118_v4, %v1727_v43  ;;  %v2123_v47 = vadd.f32 %v2098_v52, %v1686_v56  ;;  %v5326_v43 = vld [vmem:[#allocation4 + $0x3b0] sm:$0xff]  ;;  %v5329_v4 = vld [vmem:[#allocation4 + $0x3b8] sm:$0xff]  ;;  %v5359_v56 = vld [vmem:[#allocation4 + $0x348] sm:$0xff] }
 0x692   :  { %v5350_v52 = vld [vmem:[#allocation4 + $0x370] sm:$0xff] }
 0x693   :  { %v3026_v48 = vmul.f32 -1.442695, %v2124_v9  ;;  %v5332_v9 = vld [vmem:[#allocation4 + $0x380] sm:$0xff] }
 0x694   :  { %v3200_v40 = vpop.eup %3199 }
 0x695   :  { %v3202_v54 = vpop.eup %3201  ;;  %v2131_v13 = vadd.f32 1.0, %v3200_v40  ;;  %3203 = vpow2.f32 %v3026_v48  ;;  %v5335_v48 = vld [vmem:[#allocation4 + $0x388] sm:$0xff]  ;;  %v5338_v40 = vld [vmem:[#allocation4 + $0x390] sm:$0xff] }
 0x696   :  { %v2132_v11 = vadd.f32 1.0, %v3202_v54  ;;  %v5341_v54 = vld [vmem:[#allocation4 + $0x398] sm:$0xff] }
 0x697   :  { %3205 = vrcp.f32 %v2131_v13  ;;  %v2144_v46 = vand.u32 2147483648, %v2131_v13  ;;  %v2142_v38 = vand.u32 2147483647, %v2131_v13  ;;  %vm2138_vm3 = vweird.f32 %v2131_v13 }
 0x698   :  { %3207 = vrcp.f32 %v2132_v11  ;;  %v2159_v29 = vand.u32 2147483648, %v2132_v11  ;;  %v2157_v57 = vand.u32 2147483647, %v2132_v11  ;;  %vm2153_vm4 = vweird.f32 %v2132_v11 }
 0x699   :  { %v2145_v18 = vor.u32 1.1754944e-38, %v2144_v46  ;;  %vm2143_vm7 = vcmp.eq.f32.partialorder %v2142_v38, 8.507059e+37  ;;  %v5386_v46 = vld [vmem:[#allocation4 + $0x310] sm:$0xff]  ;;  %v5395_v38 = vld [vmem:[#allocation4 + $0x2e8] sm:$0xff] }
 0x69a   :  { %v2160_v36 = vor.u32 1.1754944e-38, %v2159_v29  ;;  %vm2158_vm8 = vcmp.eq.f32.partialorder %v2157_v57, 8.507059e+37  ;;  %v5389_v29 = vld [vmem:[#allocation4 + $0x318] sm:$0xff] }
 0x69b   :  { %v3204_v41 = vpop.eup %3203  ;;  %v5401_v57 = vld [vmem:[#allocation4 + $0x2f8] sm:$0xff] }
 0x69c   :  { %v2167_v27 = vadd.f32 1.0, %v3204_v41  ;;  %v5353_v41 = vld [vmem:[#allocation4 + $0x378] sm:$0xff] }
 0x69d   :  { %v3206_v22 = vpop.eup %3205 }
 0x69e   :  { %v3208_v26 = vpop.eup %3207  ;;  %v2134_v55 = vmul.f32 %v3206_v22, %v2131_v13  ;;  %3209 = vrcp.f32 %v2167_v27  ;;  %vm2139_vm1 = vweird.f32 %v3206_v22  ;;  %v2179_v35 = vand.u32 2147483648, %v2167_v27  ;;  %v5344_v13 = vld [vmem:[#allocation4 + $0x360] sm:$0xff] }
 0x69f   :  { %v2149_v42 = vmul.f32 %v3208_v26, %v2132_v11  ;;  %3211 = vtanh.f32 %v2123_v47  ;;  %vm2154_vm2 = vweird.f32 %v3208_v26  ;;  %vm2140_vm5 = vmor %vm2138_vm3, %vm2139_vm1  ;;  %vm2173_vm10 = vweird.f32 %v2167_v27  ;;  %v5347_v11 = vld [vmem:[#allocation4 + $0x368] sm:$0xff]  ;;  %v5368_v47 = vld [vmem:[#allocation4 + $0x320] sm:$0xff] }
 0x6a0   :  { %v2135_v61 = vsub.f32 1.0, %v2134_v55  ;;  %vm2155_vm6 = vmor %vm2153_vm4, %vm2154_vm2  ;;  %v2177_v45 = vand.u32 2147483647, %v2167_v27  ;;  %v2180_v14 = vor.u32 1.1754944e-38, %v2179_v35  ;;  %v5374_v55 = vld [vmem:[#allocation4 + $0x330] sm:$0xff]  ;;  %v5452_v35 = vld [vmem:[#allocation4 + $0x240] sm:$0xff] }
 0x6a1   :  { %v2150_v19 = vsub.f32 1.0, %v2149_v42  ;;  %v5377_v42 = vld [vmem:[#allocation4 + $0x338] sm:$0xff]  ;;  %6291 = vst [vmem:[#allocation27_spill] sm:$0xff] %v5452_v35 }
 0x6a2   :  { %v2136_v34 = vmul.f32 %v3206_v22, %v2135_v61  ;;  %vm2178_vm12 = vcmp.eq.f32.partialorder %v2177_v45, 8.507059e+37  ;;  %v5380_v61 = vld [vmem:[#allocation4 + $0x300] sm:$0xff]  ;;  %v5455_v45 = vld [vmem:[#allocation4 + $0x248] sm:$0xff] }
 0x6a3   :  { %v2151_v33 = vmul.f32 %v3208_v26, %v2150_v19  ;;  %v5383_v19 = vld [vmem:[#allocation4 + $0x308] sm:$0xff]  ;;  %6292 = vst [vmem:[#allocation33_spill] sm:$0xff] %v5455_v45 }
 0x6a4   :  { %v3210_v31 = vpop.eup %3209  ;;  %v2137_v62 = vadd.f32 %v3206_v22, %v2136_v34  ;;  %v5392_v34 = vld [vmem:[#allocation4 + $0x2e0] sm:$0xff] }
 0x6a5   :  { %v2152_v6 = vadd.f32 %v3208_v26, %v2151_v33  ;;  %v2169_v44 = vmul.f32 %v3210_v31, %v2167_v27  ;;  %v3212_v17 = vpop.eup %3211  ;;  %vm2174_vm9 = vweird.f32 %v3210_v31  ;;  %v5362_v27 = vld [vmem:[#allocation4 + $0x350] sm:$0xff] }
 0x6a6   :  { %v2141_v39 = vsel %vm2140_vm5, %v3206_v22, %v2137_v62  ;;  %vm2175_vm11 = vmor %vm2173_vm10, %vm2174_vm9  ;;  %v5365_v22 = vld [vmem:[#allocation4 + $0x358] sm:$0xff]  ;;  %v5398_v33 = vld [vmem:[#allocation4 + $0x2f0] sm:$0xff] }
 0x6a7   :  { %v2146_v30 = vsel %vm2143_vm7, %v2145_v18, %v2141_v39  ;;  %v2156_v2 = vsel %vm2155_vm6, %v3208_v26, %v2152_v6  ;;  %v2170_v20 = vsub.f32 1.0, %v2169_v44  ;;  %v5371_v26 = vld [vmem:[#allocation4 + $0x328] sm:$0xff]  ;;  %v5410_v18 = vld [vmem:[#allocation4 + $0x2d0] sm:$0xff]  ;;  %v5413_v6 = vld [vmem:[#allocation4 + $0x2d8] sm:$0xff] }
 0x6a8   :  { %v2161_v24 = vsel %vm2158_vm8, %v2160_v36, %v2156_v2  ;;  %v2184_v16 = vmul.f32 %v3212_v17, %v2146_v30  ;;  %v5407_v62 = vld [vmem:[#allocation4 + $0x2c8] sm:$0xff]  ;;  %6277 = vst [vmem:[#allocation51_spill] sm:$0xff] %v5410_v18  ;;  %v5416_v44 = vld [vmem:[#allocation4 + $0x2a0] sm:$0xff]  ;;  %v5422_v39 = vld [vmem:[#allocation4 + $0x2b0] sm:$0xff] }
 0x6a9   :  { %v2183_v12 = vmul.f32 %v2161_v24, %v5217_v58  ;;  %v2171_v21 = vmul.f32 %v3210_v31, %v2170_v20  ;;  %v5314_v58 = vld [vmem:[#allocation4 + $0x3f0] sm:$0xff]  ;;  %6278 = vst [vmem:[#allocation18_spill] sm:$0xff] %v5413_v6  ;;  %v5419_v36 = vld [vmem:[#allocation4 + $0x2a8] sm:$0xff]  ;;  %v5425_v17 = vld [vmem:[#allocation4 + $0x2b8] sm:$0xff] }
 0x6aa   :  { %6279 = vst [vmem:[#allocation9_spill] sm:$0xff] %v5416_v44  ;;  %v5428_v30 = vld [vmem:[#allocation4 + $0x280] sm:$0xff]  ;;  %v5431_v2 = vld [vmem:[#allocation4 + $0x288] sm:$0xff]  ;;  %v5434_v20 = vld [vmem:[#allocation4 + $0x290] sm:$0xff] }
 0x6ab   :  { %v5309_v23 = vadd.f32 %v2184_v16, %v2183_v12  ;;  %v2172_v32 = vadd.f32 %v3210_v31, %v2171_v21  ;;  %6280 = vst [vmem:[#allocation12_spill] sm:$0xff] %v5419_v36  ;;  %v5437_v24 = vld [vmem:[#allocation4 + $0x298] sm:$0xff]  ;;  %v5440_v16 = vld [vmem:[#allocation4 + $0x260] sm:$0xff]  ;;  %v5443_v12 = vld [vmem:[#allocation4 + $0x268] sm:$0xff] }
 0x6ac   :  { %6281 = vst [vmem:[#allocation13_spill] sm:$0xff] %v5422_v39  ;;  %v5446_v21 = vld [vmem:[#allocation4 + $0x270] sm:$0xff] }
 0x6ad   :  { %3213 = vtanh.f32 %v5309_v23  ;;  %v2176_v49 = vsel %vm2175_vm11, %v3210_v31, %v2172_v32  ;;  %v5404_v31 = vld [vmem:[#allocation4 + $0x2c0] sm:$0xff]  ;;  %6282 = vst [vmem:[#allocation47_spill] sm:$0xff] %v5425_v17  ;;  %v5449_v32 = vld [vmem:[#allocation4 + $0x278] sm:$0xff] }
 0x6ae   :  { %v2181_v5 = vsel %vm2178_vm12, %v2180_v14, %v2176_v49  ;;  %6283 = vst [vmem:[#allocation14_spill] sm:$0xff] %v5428_v30  ;;  %v5458_v49 = vld [vmem:[#allocation4 + $0x250] sm:$0xff]  ;;  %v5461_v14 = vld [vmem:[#allocation4 + $0x258] sm:$0xff] }
 0x6af   :  { %6284 = vst [vmem:[#allocation11_spill] sm:$0xff] %v5431_v2 }
 0x6b0   :  { %6285 = vst [vmem:[#allocation15_spill] sm:$0xff] %v5434_v20 }
 0x6b1   :  { %6286 = vst [vmem:[#allocation16_spill] sm:$0xff] %v5437_v24 }
 0x6b2   :  { %6287 = vst [vmem:[#allocation35_spill] sm:$0xff] %v5440_v16 }
 0x6b3   :  { %v3214_v0 = vpop.eup %3213  ;;  %6288 = vst [vmem:[#allocation21_spill] sm:$0xff] %v5443_v12 }
 0x6b4   :  { %v2187_v60 = vmul.f32 %v3214_v0, %v2181_v5  ;;  %6289 = vst [vmem:[#allocation22_spill] sm:$0xff] %v5446_v21  ;;  %v5464_v0 = vld [vmem:[#allocation4 + $0x220] sm:$0xff]  ;;  %v5467_v5 = vld [vmem:[#allocation4 + $0x228] sm:$0xff] }
 0x6b5   :  { %6290 = vst [vmem:[#allocation23_spill] sm:$0xff] %v5449_v32 }
 0x6b6   :  { %2208 = vmatmul.f32.vlgmr.msrb.gmra.mxu0 %v2187_v60  ;;  %2228 = vmatmul.f32.vlgmr.msrb.gmra.mxu1 %v2187_v60  ;;  %6293 = vst [vmem:[#allocation25_spill] sm:$0xff] %v5458_v49 }
 0x6b7   :  { %2248 = vmatmul.f32.vlgmr.msrb.gmra.mxu2 %v2187_v60  ;;  %2268 = vmatmul.f32.vlgmr.msrb.gmra.mxu3 %v2187_v60  ;;  %6294 = vst [vmem:[#allocation26_spill] sm:$0xff] %v5461_v14  ;;  %v5470_v60 = vld [vmem:[#allocation4 + $0x230] sm:$0xff] }
 0x6b8   :  { %2494 = vmatpush.msrb.mxu0 %v5220_v10  ;;  %2514 = vmatpush.msrb.mxu1 %v5223_v7  ;;  %6295 = vst [vmem:[#allocation31_spill] sm:$0xff] %v5464_v0 }
 0x6b9   :  { %2534 = vmatpush.msrb.mxu2 %v5314_v58  ;;  %2554 = vmatpush.msrb.mxu3 %v5227_v3  ;;  %6296 = vst [vmem:[#allocation43_spill] sm:$0xff] %v5467_v5 }
 0x6ba   :  { %2495 = vmatpush.msrb.mxu0 %v5230_v51  ;;  %2515 = vmatpush.msrb.mxu1 %v5233_v37  ;;  %6297 = vst [vmem:[#allocation37_spill] sm:$0xff] %v5470_v60 }
 0x6bb   :  { %2535 = vmatpush.msrb.mxu2 %v5320_v25  ;;  %2555 = vmatpush.msrb.mxu3 %v5237_v8 }
 0x6bc   :  { %2496 = vmatpush.msrb.mxu0 %v5240_v53  ;;  %2516 = vmatpush.msrb.mxu1 %v5243_v1 }
 0x6bd   :  { %2536 = vmatpush.msrb.mxu2 %v5326_v43  ;;  %2556 = vmatpush.msrb.mxu3 %v5329_v4 }
 0x6be   :  { %2497 = vmatpush.msrb.mxu0 %v5332_v9  ;;  %2517 = vmatpush.msrb.mxu1 %v5335_v48 }
 0x6bf   :  { %2537 = vmatpush.msrb.mxu2 %v5338_v40  ;;  %2557 = vmatpush.msrb.mxu3 %v5341_v54 }
 0x6c0   :  { %2498 = vmatpush.msrb.mxu0 %v5344_v13  ;;  %2518 = vmatpush.msrb.mxu1 %v5347_v11 }
 0x6c1   :  { %2538 = vmatpush.msrb.mxu2 %v5350_v52  ;;  %2558 = vmatpush.msrb.mxu3 %v5353_v41 }
 0x6c2   :  { %2499 = vmatpush.msrb.mxu0 %v5356_v50  ;;  %2519 = vmatpush.msrb.mxu1 %v5359_v56 }
 0x6c3   :  { %2539 = vmatpush.msrb.mxu2 %v5362_v27  ;;  %2559 = vmatpush.msrb.mxu3 %v5365_v22 }
 0x6c4   :  { %2500 = vmatpush.msrb.mxu0 %v5368_v47  ;;  %2520 = vmatpush.msrb.mxu1 %v5371_v26 }
 0x6c5   :  { %2540 = vmatpush.msrb.mxu2 %v5374_v55  ;;  %2560 = vmatpush.msrb.mxu3 %v5377_v42 }
 0x6c6   :  { %2501 = vmatpush.msrb.mxu0 %v5380_v61  ;;  %2521 = vmatpush.msrb.mxu1 %v5383_v19 }
 0x6c7   :  { %2541 = vmatpush.msrb.mxu2 %v5386_v46  ;;  %2561 = vmatpush.msrb.mxu3 %v5389_v29 }
 0x6c8   :  { %2502 = vmatpush.msrb.mxu0 %v5392_v34  ;;  %2522 = vmatpush.msrb.mxu1 %v5395_v38 }
 0x6c9   :  { %2542 = vmatpush.msrb.mxu2 %v5398_v33  ;;  %2562 = vmatpush.msrb.mxu3 %v5401_v57 }
 0x6ca   :  { %2503 = vmatpush.msrb.mxu0 %v5404_v31  ;;  %2523 = vmatpush.msrb.mxu1 %v5407_v62 }
 0x6cb   :  { %2543 = vmatpush.msrb.mxu2 %v5410_v18  ;;  %2563 = vmatpush.msrb.mxu3 %v5413_v6 }
 0x6cc   :  { %2504 = vmatpush.msrb.mxu0 %v5416_v44  ;;  %2524 = vmatpush.msrb.mxu1 %v5419_v36 }
 0x6cd   :  { %2544 = vmatpush.msrb.mxu2 %v5422_v39  ;;  %2564 = vmatpush.msrb.mxu3 %v5425_v17 }
 0x6ce   :  { %2505 = vmatpush.msrb.mxu0 %v5428_v30  ;;  %2525 = vmatpush.msrb.mxu1 %v5431_v2 }
 0x6cf   :  { %2545 = vmatpush.msrb.mxu2 %v5434_v20  ;;  %2565 = vmatpush.msrb.mxu3 %v5437_v24  ;;  %v6305_v20 = vld [vmem:[#allocation50_spill] sm:$0xff] }
 0x6d0   :  { %2506 = vmatpush.msrb.mxu0 %v5440_v16  ;;  %2526 = vmatpush.msrb.mxu1 %v5443_v12 }
 0x6d1   :  { %2546 = vmatpush.msrb.mxu2 %v5446_v21  ;;  %2566 = vmatpush.msrb.mxu3 %v5449_v32 }
 0x6d2   :  { %2507 = vmatpush.msrb.mxu0 %v5452_v35  ;;  %2527 = vmatpush.msrb.mxu1 %v5455_v45  ;;  %v5473_v45 = vld [vmem:[#allocation4 + $0x238] sm:$0xff] }
 0x6d3   :  { %2547 = vmatpush.msrb.mxu2 %v5458_v49  ;;  %2567 = vmatpush.msrb.mxu3 %v5461_v14  ;;  %6298 = vst [vmem:[#allocation30_spill] sm:$0xff] %v5473_v45  ;;  %v5476_v49 = vld [vmem:[#allocation4 + $0x200] sm:$0xff]  ;;  %v5479_v14 = vld [vmem:[#allocation4 + $0x208] sm:$0xff] }
 0x6d4   :  { %2508 = vmatpush.msrb.mxu0 %v5464_v0  ;;  %2528 = vmatpush.msrb.mxu1 %v5467_v5  ;;  %6299 = vst [vmem:[#allocation36_spill] sm:$0xff] %v5476_v49  ;;  %v5482_v0 = vld [vmem:[#allocation4 + $0x210] sm:$0xff]  ;;  %v5485_v5 = vld [vmem:[#allocation4 + $0x218] sm:$0xff] }
 0x6d5   :  { %2548 = vmatpush.msrb.mxu2 %v5470_v60  ;;  %2568 = vmatpush.msrb.mxu3 %v5473_v45  ;;  %6300 = vst [vmem:[#allocation41_spill] sm:$0xff] %v5479_v14  ;;  %v6303_v60 = vld [vmem:[#allocation19_spill] sm:$0xff]  ;;  %v6304_v45 = vld [vmem:[#allocation49_spill] sm:$0xff] }
 0x6d6   :  { %2509 = vmatpush.msrb.mxu0 %v5476_v49  ;;  %2529 = vmatpush.msrb.mxu1 %v5479_v14  ;;  %6301 = vst [vmem:[#allocation40_spill] sm:$0xff] %v5482_v0  ;;  %v1607_v35 = vadd.f32 %v6303_v60, %v6269_v15  ;;  %v1648_v32 = vadd.f32 %v6304_v45, %v6271_v28 }
 0x6d7   :  { %2549 = vmatpush.msrb.mxu2 %v5482_v0  ;;  %6302 = vst [vmem:[#allocation32_spill] sm:$0xff] %v5485_v5  ;;  %2569 = vmatpush.msrb.mxu3 %v5485_v5  ;;  %v1730_v0 = vadd.f32 %v6305_v20, %v6273_v63 }
 0x733   :  { %v2209_v21 = vpop.f32.mrf.mxu0  ;;  %v2229_v49 = vpop.f32.mrf.mxu1 }
 0x734   :  { %v2272_v12 = vadd.f32 %v2209_v21, %v1607_v35  ;;  %v2273_v16 = vadd.f32 %v2229_v49, %v1648_v32 }
 0x736   :  { %v3027_v24 = vmul.f32 -1.442695, %v2272_v12  ;;  %v3028_v14 = vmul.f32 -1.442695, %v2273_v16  ;;  %v6306_v12 = vld [vmem:[#allocation44_spill] sm:$0xff] }
 0x737   :  { %v1689_v16 = vadd.f32 %v6306_v12, %v6275_v59 }
 0x738   :  { %3215 = vpow2.f32 %v3027_v24 }
 0x739   :  { %3217 = vpow2.f32 %v3028_v14 }
 0x73a   :  { %v2269_v2 = vpop.f32.mrf.mxu3  ;;  %v2249_v45 = vpop.f32.mrf.mxu2 }
 0x73b   :  { %v2275_v30 = vadd.f32 %v2269_v2, %v1730_v0  ;;  %v2274_v35 = vadd.f32 %v2249_v45, %v1689_v16 }
 0x73d   :  { %v3029_v5 = vmul.f32 -1.442695, %v2275_v30 }
 0x73e   :  { %v3216_v17 = vpop.eup %3215 }
 0x73f   :  { %v3218_v39 = vpop.eup %3217  ;;  %v2282_v60 = vadd.f32 1.0, %v3216_v17  ;;  %3219 = vpow2.f32 %v3029_v5 }
 0x740   :  { %v2283_v15 = vadd.f32 1.0, %v3218_v39 }
 0x741   :  { %3221 = vrcp.f32 %v2282_v60  ;;  %v2295_v0 = vand.u32 2147483648, %v2282_v60  ;;  %v2293_v5 = vand.u32 2147483647, %v2282_v60  ;;  %vm2289_vm15 = vweird.f32 %v2282_v60 }
 0x742   :  { %3223 = vrcp.f32 %v2283_v15  ;;  %v2310_v17 = vand.u32 2147483648, %v2283_v15  ;;  %v2308_v28 = vand.u32 2147483647, %v2283_v15  ;;  %vm2304_vm0 = vweird.f32 %v2283_v15 }
 0x743   :  { %v2296_v45 = vor.u32 1.1754944e-38, %v2295_v0  ;;  %vm2294_vm3 = vcmp.eq.f32.partialorder %v2293_v5, 8.507059e+37 }
 0x744   :  { %vm2309_vm4 = vcmp.eq.f32.partialorder %v2308_v28, 8.507059e+37 }
 0x745   :  { %v3220_v21 = vpop.eup %3219 }
 0x746   :  { %v2318_v24 = vadd.f32 1.0, %v3220_v21 }
 0x747   :  { %v3222_v32 = vpop.eup %3221 }
 0x748   :  { %v3224_v20 = vpop.eup %3223  ;;  %v2285_v49 = vmul.f32 %v3222_v32, %v2282_v60  ;;  %3225 = vrcp.f32 %v2318_v24  ;;  %vm2290_vm13 = vweird.f32 %v3222_v32  ;;  %vm2324_vm6 = vweird.f32 %v2318_v24 }
 0x749   :  { %v2300_v2 = vmul.f32 %v3224_v20, %v2283_v15  ;;  %3227 = vtanh.f32 %v2274_v35  ;;  %vm2305_vm14 = vweird.f32 %v3224_v20  ;;  %vm2291_vm1 = vmor %vm2289_vm15, %vm2290_vm13 }
 0x74a   :  { %v2286_v30 = vsub.f32 1.0, %v2285_v49  ;;  %vm2306_vm2 = vmor %vm2304_vm0, %vm2305_vm14  ;;  %v2311_v49 = vor.u32 1.1754944e-38, %v2310_v17 }
 0x74b   :  { %v2301_v14 = vsub.f32 1.0, %v2300_v2 }
 0x74c   :  { %v2287_v39 = vmul.f32 %v3222_v32, %v2286_v30 }
 0x74d   :  { %v2302_v63 = vmul.f32 %v3224_v20, %v2301_v14 }
 0x74e   :  { %v3226_v36 = vpop.eup %3225  ;;  %v2288_v12 = vadd.f32 %v3222_v32, %v2287_v39 }
 0x74f   :  { %v2303_v21 = vadd.f32 %v3224_v20, %v2302_v63  ;;  %v2320_v16 = vmul.f32 %v3226_v36, %v2318_v24  ;;  %v3228_v35 = vpop.eup %3227  ;;  %vm2325_vm5 = vweird.f32 %v3226_v36  ;;  %v2330_v63 = vand.u32 2147483648, %v2318_v24 }
 0x750   :  { %v2292_v2 = vsel %vm2291_vm1, %v3222_v32, %v2288_v12  ;;  %v2328_v32 = vand.u32 2147483647, %v2318_v24  ;;  %vm2326_vm7 = vmor %vm2324_vm6, %vm2325_vm5  ;;  %v6313_v24 = vld [vmem:[#allocation14_spill] sm:$0xff]  ;;  %v6314_v12 = vld [vmem:[#allocation11_spill] sm:$0xff] }
 0x751   :  { %v2297_v59 = vsel %vm2294_vm3, %v2296_v45, %v2292_v2  ;;  %v2307_v30 = vsel %vm2306_vm2, %v3224_v20, %v2303_v21  ;;  %v2321_v44 = vsub.f32 1.0, %v2320_v16  ;;  %v2331_v17 = vor.u32 1.1754944e-38, %v2330_v63  ;;  %v6315_v45 = vld [vmem:[#allocation15_spill] sm:$0xff]  ;;  %v6316_v21 = vld [vmem:[#allocation16_spill] sm:$0xff]  ;;  %v6319_v2 = vld [vmem:[#allocation22_spill] sm:$0xff] }
 0x752   :  { %v2312_v14 = vsel %vm2309_vm4, %v2311_v49, %v2307_v30  ;;  %v2335_v6 = vmul.f32 %v3228_v35, %v2297_v59  ;;  %vm2329_vm8 = vcmp.eq.f32.partialorder %v2328_v32, 8.507059e+37  ;;  %v6307_v59 = vld [vmem:[#allocation51_spill] sm:$0xff]  ;;  %v6318_v49 = vld [vmem:[#allocation21_spill] sm:$0xff] }
 0x753   :  { %v2334_v18 = vmul.f32 %v2312_v14, %v5309_v23  ;;  %v2322_v39 = vmul.f32 %v3226_v36, %v2321_v44  ;;  %v6308_v23 = vld [vmem:[#allocation18_spill] sm:$0xff]  ;;  %v6311_v44 = vld [vmem:[#allocation13_spill] sm:$0xff]  ;;  %v6317_v16 = vld [vmem:[#allocation35_spill] sm:$0xff] }
 0x754   :  { %v6320_v35 = vld [vmem:[#allocation23_spill] sm:$0xff]  ;;  %v6322_v14 = vld [vmem:[#allocation33_spill] sm:$0xff] }
 0x755   :  { %v5497_v60 = vadd.f32 %v2335_v6, %v2334_v18  ;;  %v2323_v15 = vadd.f32 %v3226_v36, %v2322_v39  ;;  %v6309_v18 = vld [vmem:[#allocation9_spill] sm:$0xff]  ;;  %v6310_v6 = vld [vmem:[#allocation12_spill] sm:$0xff]  ;;  %v6321_v30 = vld [vmem:[#allocation27_spill] sm:$0xff] }
 0x756   :  { %v6323_v39 = vld [vmem:[#allocation25_spill] sm:$0xff]  ;;  %v6325_v63 = vld [vmem:[#allocation31_spill] sm:$0xff] }
 0x757   :  { %3229 = vtanh.f32 %v5497_v60  ;;  %v2327_v0 = vsel %vm2326_vm7, %v3226_v36, %v2323_v15  ;;  %v6312_v36 = vld [vmem:[#allocation47_spill] sm:$0xff]  ;;  %v6324_v15 = vld [vmem:[#allocation26_spill] sm:$0xff] }
 0x758   :  { %v2332_v20 = vsel %vm2329_vm8, %v2331_v17, %v2327_v0  ;;  %v6326_v32 = vld [vmem:[#allocation43_spill] sm:$0xff]  ;;  %v6327_v0 = vld [vmem:[#allocation37_spill] sm:$0xff]  ;;  %v6328_v17 = vld [vmem:[#allocation30_spill] sm:$0xff] }
 0x75d   :  { %v3230_v28 = vpop.eup %3229 }
 0x75e   :  { %v2338_v5 = vmul.f32 %v3230_v28, %v2332_v20  ;;  %v6329_v28 = vld [vmem:[#allocation36_spill] sm:$0xff]  ;;  %v6330_v20 = vld [vmem:[#allocation41_spill] sm:$0xff] }
 0x760   :  { %2359 = vmatmul.f32.vlgmr.msra.gmra.mxu0 %v2338_v5  ;;  %2379 = vmatmul.f32.vlgmr.msra.gmra.mxu1 %v2338_v5 }
 0x761   :  { %2399 = vmatmul.f32.vlgmr.msra.gmra.mxu2 %v2338_v5  ;;  %2419 = vmatmul.f32.vlgmr.msra.gmra.mxu3 %v2338_v5  ;;  %v6331_v5 = vld [vmem:[#allocation40_spill] sm:$0xff] }
 0x762   :  { %2645 = vmatpush.msra.mxu0 %v5220_v10  ;;  %2665 = vmatpush.msra.mxu1 %v5223_v7 }
 0x763   :  { %2685 = vmatpush.msra.mxu2 %v5314_v58  ;;  %2705 = vmatpush.msra.mxu3 %v5227_v3 }
 0x764   :  { %2646 = vmatpush.msra.mxu0 %v5230_v51  ;;  %2666 = vmatpush.msra.mxu1 %v5233_v37 }
 0x765   :  { %2686 = vmatpush.msra.mxu2 %v5320_v25  ;;  %2706 = vmatpush.msra.mxu3 %v5237_v8 }
 0x766   :  { %2647 = vmatpush.msra.mxu0 %v5240_v53  ;;  %2667 = vmatpush.msra.mxu1 %v5243_v1 }
 0x767   :  { %2687 = vmatpush.msra.mxu2 %v5326_v43  ;;  %2707 = vmatpush.msra.mxu3 %v5329_v4 }
 0x768   :  { %2648 = vmatpush.msra.mxu0 %v5332_v9  ;;  %2668 = vmatpush.msra.mxu1 %v5335_v48 }
 0x769   :  { %2688 = vmatpush.msra.mxu2 %v5338_v40  ;;  %2708 = vmatpush.msra.mxu3 %v5341_v54 }
 0x76a   :  { %2649 = vmatpush.msra.mxu0 %v5344_v13  ;;  %2669 = vmatpush.msra.mxu1 %v5347_v11 }
 0x76b   :  { %2689 = vmatpush.msra.mxu2 %v5350_v52  ;;  %2709 = vmatpush.msra.mxu3 %v5353_v41 }
 0x76c   :  { %2650 = vmatpush.msra.mxu0 %v5356_v50  ;;  %2670 = vmatpush.msra.mxu1 %v5359_v56 }
 0x76d   :  { %2690 = vmatpush.msra.mxu2 %v5362_v27  ;;  %2710 = vmatpush.msra.mxu3 %v5365_v22 }
 0x76e   :  { %2651 = vmatpush.msra.mxu0 %v5368_v47  ;;  %2671 = vmatpush.msra.mxu1 %v5371_v26 }
 0x76f   :  { %2691 = vmatpush.msra.mxu2 %v5374_v55  ;;  %2711 = vmatpush.msra.mxu3 %v5377_v42 }
 0x770   :  { %2652 = vmatpush.msra.mxu0 %v5380_v61  ;;  %2672 = vmatpush.msra.mxu1 %v5383_v19 }
 0x771   :  { %2692 = vmatpush.msra.mxu2 %v5386_v46  ;;  %2712 = vmatpush.msra.mxu3 %v5389_v29 }
 0x772   :  { %2653 = vmatpush.msra.mxu0 %v5392_v34  ;;  %2673 = vmatpush.msra.mxu1 %v5395_v38 }
 0x773   :  { %2693 = vmatpush.msra.mxu2 %v5398_v33  ;;  %2713 = vmatpush.msra.mxu3 %v5401_v57 }
 0x774   :  { %2654 = vmatpush.msra.mxu0 %v5404_v31  ;;  %2674 = vmatpush.msra.mxu1 %v5407_v62 }
 0x775   :  { %2694 = vmatpush.msra.mxu2 %v6307_v59  ;;  %2714 = vmatpush.msra.mxu3 %v6308_v23 }
 0x776   :  { %2655 = vmatpush.msra.mxu0 %v6309_v18  ;;  %2675 = vmatpush.msra.mxu1 %v6310_v6 }
 0x777   :  { %2695 = vmatpush.msra.mxu2 %v6311_v44  ;;  %2715 = vmatpush.msra.mxu3 %v6312_v36 }
 0x778   :  { %2656 = vmatpush.msra.mxu0 %v6313_v24  ;;  %2676 = vmatpush.msra.mxu1 %v6314_v12 }
 0x779   :  { %2696 = vmatpush.msra.mxu2 %v6315_v45  ;;  %2716 = vmatpush.msra.mxu3 %v6316_v21  ;;  %v6338_v45 = vld [vmem:[#allocation55_spill] sm:$0xff] }
 0x77a   :  { %2657 = vmatpush.msra.mxu0 %v6317_v16  ;;  %2677 = vmatpush.msra.mxu1 %v6318_v49 }
 0x77b   :  { %2697 = vmatpush.msra.mxu2 %v6319_v2  ;;  %2717 = vmatpush.msra.mxu3 %v6320_v35  ;;  %v6336_v2 = vld [vmem:[#allocation52_spill] sm:$0xff] }
 0x77c   :  { %2658 = vmatpush.msra.mxu0 %v6321_v30  ;;  %2678 = vmatpush.msra.mxu1 %v6322_v14  ;;  %v6332_v30 = vld [vmem:[#allocation32_spill] sm:$0xff] }
 0x77d   :  { %2698 = vmatpush.msra.mxu2 %v6323_v39  ;;  %2718 = vmatpush.msra.mxu3 %v6324_v15  ;;  %v6333_v14 = vld [vmem:[#allocation48_spill] sm:$0xff] }
 0x77e   :  { %2659 = vmatpush.msra.mxu0 %v6325_v63  ;;  %2679 = vmatpush.msra.mxu1 %v6326_v32  ;;  %v6334_v39 = vld [vmem:[#allocation28_spill] sm:$0xff] }
 0x77f   :  { %2699 = vmatpush.msra.mxu2 %v6327_v0  ;;  %2719 = vmatpush.msra.mxu3 %v6328_v17  ;;  %v1610_v35 = vadd.f32 %v6334_v39, %v6333_v14  ;;  %v6335_v15 = vld [vmem:[#allocation60_spill] sm:$0xff] }
 0x780   :  { %2660 = vmatpush.msra.mxu0 %v6329_v28  ;;  %2680 = vmatpush.msra.mxu1 %v6330_v20  ;;  %v1651_v63 = vadd.f32 %v6336_v2, %v6335_v15  ;;  %v6337_v28 = vld [vmem:[#allocation29_spill] sm:$0xff] }
 0x781   :  { %2700 = vmatpush.msra.mxu2 %v6331_v5  ;;  %2720 = vmatpush.msra.mxu3 %v6332_v30  ;;  %v1733_v20 = vadd.f32 %v6338_v45, %v6337_v28 }
 0x7dd   :  { %v2360_v49 = vpop.f32.mrf.mxu0  ;;  %v2380_v32 = vpop.f32.mrf.mxu1 }
 0x7de   :  { %v2423_v16 = vadd.f32 %v2360_v49, %v1610_v35  ;;  %v2424_v0 = vadd.f32 %v2380_v32, %v1651_v63  ;;  %v6339_v35 = vld [vmem:[#allocation45_spill] sm:$0xff] }
 0x7e0   :  { %v3030_v21 = vmul.f32 -1.442695, %v2423_v16  ;;  %v3031_v17 = vmul.f32 -1.442695, %v2424_v0  ;;  %v6340_v16 = vld [vmem:[#allocation56_spill] sm:$0xff] }
 0x7e1   :  { %v1692_v63 = vadd.f32 %v6340_v16, %v6339_v35 }
 0x7e2   :  { %3231 = vpow2.f32 %v3030_v21 }
 0x7e3   :  { %3233 = vpow2.f32 %v3031_v17 }
 0x7e4   :  { %v2420_v5 = vpop.f32.mrf.mxu3  ;;  %v2400_v2 = vpop.f32.mrf.mxu2 }
 0x7e5   :  { %v2426_v12 = vadd.f32 %v2420_v5, %v1733_v20  ;;  %v2425_v0 = vadd.f32 %v2400_v2, %v1692_v63 }
 0x7e7   :  { %v3032_v30 = vmul.f32 -1.442695, %v2426_v12 }
 0x7e8   :  { %v3232_v24 = vpop.eup %3231 }
 0x7e9   :  { %v3234_v36 = vpop.eup %3233  ;;  %v2433_v39 = vadd.f32 1.0, %v3232_v24  ;;  %3235 = vpow2.f32 %v3032_v30 }
 0x7ea   :  { %v2434_v14 = vadd.f32 1.0, %v3234_v36 }
 0x7eb   :  { %3237 = vrcp.f32 %v2433_v39  ;;  %v2446_v28 = vand.u32 2147483648, %v2433_v39  ;;  %v2444_v30 = vand.u32 2147483647, %v2433_v39  ;;  %vm2440_vm11 = vweird.f32 %v2433_v39 }
 0x7ec   :  { %3239 = vrcp.f32 %v2434_v14  ;;  %v2461_v24 = vand.u32 2147483648, %v2434_v14  ;;  %v2459_v44 = vand.u32 2147483647, %v2434_v14  ;;  %vm2455_vm12 = vweird.f32 %v2434_v14 }
 0x7ed   :  { %v2447_v2 = vor.u32 1.1754944e-38, %v2446_v28  ;;  %vm2445_vm15 = vcmp.eq.f32.partialorder %v2444_v30, 8.507059e+37 }
 0x7ee   :  { %vm2460_vm0 = vcmp.eq.f32.partialorder %v2459_v44, 8.507059e+37 }
 0x7ef   :  { %v3236_v49 = vpop.eup %3235 }
 0x7f0   :  { %v2469_v21 = vadd.f32 1.0, %v3236_v49 }
 0x7f1   :  { %v3238_v32 = vpop.eup %3237 }
 0x7f2   :  { %v3240_v45 = vpop.eup %3239  ;;  %v2436_v17 = vmul.f32 %v3238_v32, %v2433_v39  ;;  %3241 = vrcp.f32 %v2469_v21  ;;  %vm2441_vm9 = vweird.f32 %v3238_v32  ;;  %vm2475_vm2 = vweird.f32 %v2469_v21 }
 0x7f3   :  { %v2451_v20 = vmul.f32 %v3240_v45, %v2434_v14  ;;  %3243 = vtanh.f32 %v2425_v0  ;;  %vm2456_vm10 = vweird.f32 %v3240_v45  ;;  %vm2442_vm13 = vmor %vm2440_vm11, %vm2441_vm9  ;;  %v2479_v28 = vand.u32 2147483647, %v2469_v21 }
 0x7f4   :  { %v2437_v12 = vsub.f32 1.0, %v2436_v17  ;;  %vm2457_vm14 = vmor %vm2455_vm12, %vm2456_vm10  ;;  %v2462_v17 = vor.u32 1.1754944e-38, %v2461_v24 }
 0x7f5   :  { %v2452_v5 = vsub.f32 1.0, %v2451_v20  ;;  %vm2480_vm4 = vcmp.eq.f32.partialorder %v2479_v28, 8.507059e+37 }
 0x7f6   :  { %v2438_v36 = vmul.f32 %v3238_v32, %v2437_v12 }
 0x7f7   :  { %v2453_v15 = vmul.f32 %v3240_v45, %v2452_v5 }
 0x7f8   :  { %v3242_v6 = vpop.eup %3241  ;;  %v2439_v16 = vadd.f32 %v3238_v32, %v2438_v36 }
 0x7f9   :  { %v2454_v49 = vadd.f32 %v3240_v45, %v2453_v15  ;;  %v2471_v63 = vmul.f32 %v3242_v6, %v2469_v21  ;;  %v3244_v0 = vpop.eup %3243  ;;  %vm2476_vm1 = vweird.f32 %v3242_v6  ;;  %v2481_v15 = vand.u32 2147483648, %v2469_v21 }
 0x7fa   :  { %v2443_v20 = vsel %vm2442_vm13, %v3238_v32, %v2439_v16  ;;  %vm2477_vm3 = vmor %vm2475_vm2, %vm2476_vm1 }
 0x7fb   :  { %v2448_v35 = vsel %vm2445_vm15, %v2447_v2, %v2443_v20  ;;  %v2458_v12 = vsel %vm2457_vm14, %v3240_v45, %v2454_v49  ;;  %v2472_v18 = vsub.f32 1.0, %v2471_v63  ;;  %v2482_v24 = vor.u32 1.1754944e-38, %v2481_v15  ;;  %v6373_v20 = vld [vmem:[#allocation45_spill] sm:$0xff] }
 0x7fc   :  { %v2463_v5 = vsel %vm2460_vm0, %v2462_v17, %v2458_v12  ;;  %v2486_v23 = vmul.f32 %v3244_v0, %v2448_v35  ;;  %v6374_v0 = vld [vmem:[#allocation10_spill] sm:$0xff] }
 0x7fd   :  { %v2485_v59 = vmul.f32 %v2463_v5, %v5497_v60  ;;  %v2473_v36 = vmul.f32 %v3242_v6, %v2472_v18  ;;  %v6371_v60 = vld [vmem:[#allocation29_spill] sm:$0xff]  ;;  %v1695_v12 = vadd.f32 %v6374_v0, %v6373_v20 }
 0x7ff   :  { %v5573_v39 = vadd.f32 %v2486_v23, %v2485_v59  ;;  %v2474_v14 = vadd.f32 %v3242_v6, %v2473_v36  ;;  %v6372_v59 = vld [vmem:[#allocation59_spill] sm:$0xff] }
 0x800   :  { %v1736_v23 = vadd.f32 %v6372_v59, %v6371_v60 }
 0x801   :  { %3245 = vtanh.f32 %v5573_v39  ;;  %v2478_v32 = vsel %vm2477_vm3, %v3242_v6, %v2474_v14 }
 0x802   :  { %v2483_v45 = vsel %vm2480_vm4, %v2482_v24, %v2478_v32 }
 0x807   :  { %v3246_v44 = vpop.eup %3245 }
 0x808   :  { %v2489_v30 = vmul.f32 %v3246_v44, %v2483_v45 }
 0x80a   :  { %2510 = vmatmul.f32.vlgmr.msrb.gmra.mxu0 %v2489_v30  ;;  %2530 = vmatmul.f32.vlgmr.msrb.gmra.mxu1 %v2489_v30 }
 0x80b   :  { %2550 = vmatmul.f32.vlgmr.msrb.gmra.mxu2 %v2489_v30  ;;  %2570 = vmatmul.f32.vlgmr.msrb.gmra.mxu3 %v2489_v30 }
 0x80c   :  { %2796 = vmatpush.msrb.mxu0 %v5220_v10  ;;  %2816 = vmatpush.msrb.mxu1 %v5223_v7  ;;  %v6341_v10 = vld [vmem:[#allocation51_spill] sm:$0xff]  ;;  %v6342_v7 = vld [vmem:[#allocation18_spill] sm:$0xff] }
 0x80d   :  { %2836 = vmatpush.msrb.mxu2 %v5314_v58  ;;  %2856 = vmatpush.msrb.mxu3 %v5227_v3  ;;  %v6343_v3 = vld [vmem:[#allocation9_spill] sm:$0xff]  ;;  %v6349_v58 = vld [vmem:[#allocation15_spill] sm:$0xff] }
 0x80e   :  { %2797 = vmatpush.msrb.mxu0 %v5230_v51  ;;  %2817 = vmatpush.msrb.mxu1 %v5233_v37  ;;  %v6344_v51 = vld [vmem:[#allocation12_spill] sm:$0xff]  ;;  %v6345_v37 = vld [vmem:[#allocation13_spill] sm:$0xff] }
 0x80f   :  { %2837 = vmatpush.msrb.mxu2 %v5320_v25  ;;  %2857 = vmatpush.msrb.mxu3 %v5237_v8  ;;  %v6346_v8 = vld [vmem:[#allocation47_spill] sm:$0xff]  ;;  %v6350_v25 = vld [vmem:[#allocation16_spill] sm:$0xff] }
 0x810   :  { %2798 = vmatpush.msrb.mxu0 %v5240_v53  ;;  %2818 = vmatpush.msrb.mxu1 %v5243_v1  ;;  %v6347_v53 = vld [vmem:[#allocation14_spill] sm:$0xff]  ;;  %v6348_v1 = vld [vmem:[#allocation11_spill] sm:$0xff] }
 0x811   :  { %2838 = vmatpush.msrb.mxu2 %v5326_v43  ;;  %2858 = vmatpush.msrb.mxu3 %v5329_v4  ;;  %v6351_v43 = vld [vmem:[#allocation35_spill] sm:$0xff]  ;;  %v6352_v4 = vld [vmem:[#allocation21_spill] sm:$0xff] }
 0x812   :  { %2799 = vmatpush.msrb.mxu0 %v5332_v9  ;;  %2819 = vmatpush.msrb.mxu1 %v5335_v48  ;;  %v6353_v9 = vld [vmem:[#allocation22_spill] sm:$0xff]  ;;  %v6354_v48 = vld [vmem:[#allocation23_spill] sm:$0xff] }
 0x813   :  { %2839 = vmatpush.msrb.mxu2 %v5338_v40  ;;  %2859 = vmatpush.msrb.mxu3 %v5341_v54  ;;  %v6355_v40 = vld [vmem:[#allocation27_spill] sm:$0xff]  ;;  %v6356_v54 = vld [vmem:[#allocation33_spill] sm:$0xff] }
 0x814   :  { %2800 = vmatpush.msrb.mxu0 %v5344_v13  ;;  %2820 = vmatpush.msrb.mxu1 %v5347_v11  ;;  %v6357_v13 = vld [vmem:[#allocation25_spill] sm:$0xff]  ;;  %v6358_v11 = vld [vmem:[#allocation26_spill] sm:$0xff] }
 0x815   :  { %2840 = vmatpush.msrb.mxu2 %v5350_v52  ;;  %2860 = vmatpush.msrb.mxu3 %v5353_v41  ;;  %v6359_v52 = vld [vmem:[#allocation31_spill] sm:$0xff] }
 0x816   :  { %2801 = vmatpush.msrb.mxu0 %v5356_v50  ;;  %2821 = vmatpush.msrb.mxu1 %v5359_v56  ;;  %v6360_v41 = vld [vmem:[#allocation43_spill] sm:$0xff]  ;;  %v6361_v50 = vld [vmem:[#allocation37_spill] sm:$0xff]  ;;  %v6362_v56 = vld [vmem:[#allocation30_spill] sm:$0xff] }
 0x817   :  { %2841 = vmatpush.msrb.mxu2 %v5362_v27  ;;  %2861 = vmatpush.msrb.mxu3 %v5365_v22  ;;  %v6363_v27 = vld [vmem:[#allocation36_spill] sm:$0xff]  ;;  %v6364_v22 = vld [vmem:[#allocation41_spill] sm:$0xff] }
 0x818   :  { %2802 = vmatpush.msrb.mxu0 %v5368_v47  ;;  %2822 = vmatpush.msrb.mxu1 %v5371_v26  ;;  %v6365_v47 = vld [vmem:[#allocation40_spill] sm:$0xff] }
 0x819   :  { %2842 = vmatpush.msrb.mxu2 %v5374_v55  ;;  %2862 = vmatpush.msrb.mxu3 %v5377_v42  ;;  %v6366_v26 = vld [vmem:[#allocation32_spill] sm:$0xff]  ;;  %v6368_v42 = vld [vmem:[#allocation53_spill] sm:$0xff] }
 0x81a   :  { %2803 = vmatpush.msrb.mxu0 %v5380_v61  ;;  %2823 = vmatpush.msrb.mxu1 %v5383_v19  ;;  %v6367_v55 = vld [vmem:[#allocation48_spill] sm:$0xff] }
 0x81b   :  { %2843 = vmatpush.msrb.mxu2 %v5386_v46  ;;  %2863 = vmatpush.msrb.mxu3 %v5389_v29  ;;  %v1613_v61 = vadd.f32 %v6368_v42, %v6367_v55  ;;  %v6369_v19 = vld [vmem:[#allocation60_spill] sm:$0xff]  ;;  %v6370_v46 = vld [vmem:[#allocation54_spill] sm:$0xff] }
 0x81c   :  { %2804 = vmatpush.msrb.mxu0 %v5392_v34  ;;  %2824 = vmatpush.msrb.mxu1 %v5395_v38  ;;  %v1654_v29 = vadd.f32 %v6370_v46, %v6369_v19 }
 0x81d   :  { %2844 = vmatpush.msrb.mxu2 %v5398_v33  ;;  %2864 = vmatpush.msrb.mxu3 %v5401_v57 }
 0x81e   :  { %2805 = vmatpush.msrb.mxu0 %v5404_v31  ;;  %2825 = vmatpush.msrb.mxu1 %v5407_v62 }
 0x81f   :  { %2845 = vmatpush.msrb.mxu2 %v6341_v10  ;;  %2865 = vmatpush.msrb.mxu3 %v6342_v7 }
 0x820   :  { %2806 = vmatpush.msrb.mxu0 %v6343_v3  ;;  %2826 = vmatpush.msrb.mxu1 %v6344_v51 }
 0x821   :  { %2846 = vmatpush.msrb.mxu2 %v6345_v37  ;;  %2866 = vmatpush.msrb.mxu3 %v6346_v8 }
 0x822   :  { %2807 = vmatpush.msrb.mxu0 %v6347_v53  ;;  %2827 = vmatpush.msrb.mxu1 %v6348_v1 }
 0x823   :  { %2847 = vmatpush.msrb.mxu2 %v6349_v58  ;;  %2867 = vmatpush.msrb.mxu3 %v6350_v25 }
 0x824   :  { %2808 = vmatpush.msrb.mxu0 %v6351_v43  ;;  %2828 = vmatpush.msrb.mxu1 %v6352_v4 }
 0x825   :  { %2848 = vmatpush.msrb.mxu2 %v6353_v9  ;;  %2868 = vmatpush.msrb.mxu3 %v6354_v48 }
 0x826   :  { %2809 = vmatpush.msrb.mxu0 %v6355_v40  ;;  %2829 = vmatpush.msrb.mxu1 %v6356_v54 }
 0x827   :  { %2849 = vmatpush.msrb.mxu2 %v6357_v13  ;;  %2869 = vmatpush.msrb.mxu3 %v6358_v11 }
 0x828   :  { %2810 = vmatpush.msrb.mxu0 %v6359_v52  ;;  %2830 = vmatpush.msrb.mxu1 %v6360_v41 }
 0x829   :  { %2850 = vmatpush.msrb.mxu2 %v6361_v50  ;;  %2870 = vmatpush.msrb.mxu3 %v6362_v56 }
 0x82a   :  { %2811 = vmatpush.msrb.mxu0 %v6363_v27  ;;  %2831 = vmatpush.msrb.mxu1 %v6364_v22 }
 0x82b   :  { %2851 = vmatpush.msrb.mxu2 %v6365_v47  ;;  %2871 = vmatpush.msrb.mxu3 %v6366_v26 }
 0x887   :  { %v2511_v34 = vpop.f32.mrf.mxu0  ;;  %v2531_v38 = vpop.f32.mrf.mxu1 }
 0x888   :  { %v2574_v33 = vadd.f32 %v2511_v34, %v1613_v61  ;;  %v2575_v57 = vadd.f32 %v2531_v38, %v1654_v29  ;;  %v6376_v29 = vld [vmem:[#allocation62_spill] sm:$0xff] }
 0x889   :  { %v1657_v34 = vadd.f32 %v6376_v29, %v6369_v19 }
 0x88a   :  { %v3033_v31 = vmul.f32 -1.442695, %v2574_v33  ;;  %v3034_v62 = vmul.f32 -1.442695, %v2575_v57 }
 0x88c   :  { %3247 = vpow2.f32 %v3033_v31 }
 0x88d   :  { %3249 = vpow2.f32 %v3034_v62 }
 0x88e   :  { %v2571_v18 = vpop.f32.mrf.mxu3  ;;  %v2551_v63 = vpop.f32.mrf.mxu2 }
 0x88f   :  { %v2577_v6 = vadd.f32 %v2571_v18, %v1736_v23  ;;  %v2576_v14 = vadd.f32 %v2551_v63, %v1695_v12  ;;  %v6377_v23 = vld [vmem:[#allocation34_spill] sm:$0xff]  ;;  %v6378_v12 = vld [vmem:[#allocation61_spill] sm:$0xff] }
 0x890   :  { %v1739_v18 = vadd.f32 %v6377_v23, %v6371_v60 }
 0x891   :  { %v3035_v35 = vmul.f32 -1.442695, %v2577_v6 }
 0x892   :  { %v3248_v21 = vpop.eup %3247 }
 0x893   :  { %v3250_v16 = vpop.eup %3249  ;;  %v2584_v2 = vadd.f32 1.0, %v3248_v21  ;;  %3251 = vpow2.f32 %v3035_v35 }
 0x894   :  { %v2585_v49 = vadd.f32 1.0, %v3250_v16 }
 0x895   :  { %3253 = vrcp.f32 %v2584_v2  ;;  %v2597_v45 = vand.u32 2147483648, %v2584_v2  ;;  %v2595_v7 = vand.u32 2147483647, %v2584_v2  ;;  %vm2591_vm7 = vweird.f32 %v2584_v2 }
 0x896   :  { %3255 = vrcp.f32 %v2585_v49  ;;  %v2612_v30 = vand.u32 2147483648, %v2585_v49  ;;  %v2610_v51 = vand.u32 2147483647, %v2585_v49  ;;  %vm2606_vm8 = vweird.f32 %v2585_v49 }
 0x897   :  { %v2598_v53 = vor.u32 1.1754944e-38, %v2597_v45  ;;  %vm2596_vm11 = vcmp.eq.f32.partialorder %v2595_v7, 8.507059e+37 }
 0x898   :  { %v2613_v25 = vor.u32 1.1754944e-38, %v2612_v30  ;;  %vm2611_vm12 = vcmp.eq.f32.partialorder %v2610_v51, 8.507059e+37 }
 0x899   :  { %v3252_v17 = vpop.eup %3251 }
 0x89a   :  { %v2620_v5 = vadd.f32 1.0, %v3252_v17 }
 0x89b   :  { %v3254_v36 = vpop.eup %3253 }
 0x89c   :  { %v3256_v15 = vpop.eup %3255  ;;  %v2587_v28 = vmul.f32 %v3254_v36, %v2584_v2  ;;  %3257 = vrcp.f32 %v2620_v5  ;;  %vm2592_vm5 = vweird.f32 %v3254_v36  ;;  %v2632_v56 = vand.u32 2147483648, %v2620_v5 }
 0x89d   :  { %v2602_v32 = vmul.f32 %v3256_v15, %v2585_v49  ;;  %3259 = vtanh.f32 %v2576_v14  ;;  %vm2607_vm6 = vweird.f32 %v3256_v15  ;;  %vm2593_vm9 = vmor %vm2591_vm7, %vm2592_vm5  ;;  %vm2626_vm14 = vweird.f32 %v2620_v5 }
 0x89e   :  { %v2588_v24 = vsub.f32 1.0, %v2587_v28  ;;  %vm2608_vm10 = vmor %vm2606_vm8, %vm2607_vm6  ;;  %v2630_v27 = vand.u32 2147483647, %v2620_v5  ;;  %v2633_v47 = vor.u32 1.1754944e-38, %v2632_v56 }
 0x89f   :  { %v2603_v44 = vsub.f32 1.0, %v2602_v32 }
 0x8a0   :  { %v2589_v10 = vmul.f32 %v3254_v36, %v2588_v24  ;;  %vm2631_vm0 = vcmp.eq.f32.partialorder %v2630_v27, 8.507059e+37 }
 0x8a1   :  { %v2604_v3 = vmul.f32 %v3256_v15, %v2603_v44 }
 0x8a2   :  { %v3258_v37 = vpop.eup %3257  ;;  %v2590_v8 = vadd.f32 %v3254_v36, %v2589_v10 }
 0x8a3   :  { %v2605_v1 = vadd.f32 %v3256_v15, %v2604_v3  ;;  %v2622_v58 = vmul.f32 %v3258_v37, %v2620_v5  ;;  %v3260_v4 = vpop.eup %3259  ;;  %vm2627_vm13 = vweird.f32 %v3258_v37  ;;  %v1698_v5 = vadd.f32 %v6378_v12, %v6373_v20 }
 0x8a4   :  { %v2594_v43 = vsel %vm2593_vm9, %v3254_v36, %v2590_v8  ;;  %vm2628_vm15 = vmor %vm2626_vm14, %vm2627_vm13 }
 0x8a5   :  { %v2599_v9 = vsel %vm2596_vm11, %v2598_v53, %v2594_v43  ;;  %v2609_v48 = vsel %vm2608_vm10, %v3256_v15, %v2605_v1  ;;  %v2623_v40 = vsub.f32 1.0, %v2622_v58 }
 0x8a6   :  { %v2614_v54 = vsel %vm2611_vm12, %v2613_v25, %v2609_v48  ;;  %v2637_v13 = vmul.f32 %v3260_v4, %v2599_v9 }
 0x8a7   :  { %v2636_v11 = vmul.f32 %v2614_v54, %v5573_v39  ;;  %v2624_v52 = vmul.f32 %v3258_v37, %v2623_v40  ;;  %v6375_v39 = vld [vmem:[#allocation46_spill] sm:$0xff] }
 0x8a8   :  { %v1616_v46 = vadd.f32 %v6375_v39, %v6367_v55 }
 0x8a9   :  { %v5649_v41 = vadd.f32 %v2637_v13, %v2636_v11  ;;  %v2625_v50 = vadd.f32 %v3258_v37, %v2624_v52 }
 0x8ab   :  { %3261 = vtanh.f32 %v5649_v41  ;;  %v2629_v22 = vsel %vm2628_vm15, %v3258_v37, %v2625_v50 }
 0x8ac   :  { %v2634_v42 = vsel %vm2631_vm0, %v2633_v47, %v2629_v22 }
 0x8b1   :  { %v3262_v26 = vpop.eup %3261 }
 0x8b2   :  { %v2640_v61 = vmul.f32 %v3262_v26, %v2634_v42 }
 0x8b4   :  { %2661 = vmatmul.f32.vlgmr.msra.gmra.mxu0 %v2640_v61  ;;  %2681 = vmatmul.f32.vlgmr.msra.gmra.mxu1 %v2640_v61 }
 0x8b5   :  { %2701 = vmatmul.f32.vlgmr.msra.gmra.mxu2 %v2640_v61  ;;  %2721 = vmatmul.f32.vlgmr.msra.gmra.mxu3 %v2640_v61 }
 0x931   :  { %v2662_v38 = vpop.f32.mrf.mxu0  ;;  %v2682_v33 = vpop.f32.mrf.mxu1 }
 0x932   :  { %v2725_v57 = vadd.f32 %v2662_v38, %v1616_v46  ;;  %v2726_v31 = vadd.f32 %v2682_v33, %v1657_v34  ;;  %v6380_v34 = vld [vmem:[#allocation58_spill] sm:$0xff] }
 0x933   :  { %v1660_v38 = vadd.f32 %v6380_v34, %v6369_v19 }
 0x934   :  { %v3036_v62 = vmul.f32 -1.442695, %v2725_v57  ;;  %v3037_v59 = vmul.f32 -1.442695, %v2726_v31 }
 0x936   :  { %3263 = vpow2.f32 %v3036_v62 }
 0x937   :  { %3265 = vpow2.f32 %v3037_v59 }
 0x938   :  { %v2722_v6 = vpop.f32.mrf.mxu3  ;;  %v2702_v17 = vpop.f32.mrf.mxu2 }
 0x939   :  { %v2728_v35 = vadd.f32 %v2722_v6, %v1739_v18  ;;  %v2727_v15 = vadd.f32 %v2702_v17, %v1698_v5  ;;  %v6381_v18 = vld [vmem:[#allocation24_spill] sm:$0xff] }
 0x93a   :  { %v1742_v6 = vadd.f32 %v6381_v18, %v6371_v60 }
 0x93b   :  { %v3038_v21 = vmul.f32 -1.442695, %v2728_v35 }
 0x93c   :  { %v3264_v16 = vpop.eup %3263 }
 0x93d   :  { %v3266_v2 = vpop.eup %3265  ;;  %v2735_v49 = vadd.f32 1.0, %v3264_v16  ;;  %3267 = vpow2.f32 %v3038_v21 }
 0x93e   :  { %v2736_v63 = vadd.f32 1.0, %v3266_v2 }
 0x93f   :  { %3269 = vrcp.f32 %v2735_v49  ;;  %v2748_v30 = vand.u32 2147483648, %v2735_v49  ;;  %v2746_v3 = vand.u32 2147483647, %v2735_v49  ;;  %vm2742_vm3 = vweird.f32 %v2735_v49 }
 0x940   :  { %3271 = vrcp.f32 %v2736_v63  ;;  %v2763_v10 = vand.u32 2147483648, %v2736_v63  ;;  %v2761_v37 = vand.u32 2147483647, %v2736_v63  ;;  %vm2757_vm4 = vweird.f32 %v2736_v63 }
 0x941   :  { %v2749_v1 = vor.u32 1.1754944e-38, %v2748_v30  ;;  %vm2747_vm7 = vcmp.eq.f32.partialorder %v2746_v3, 8.507059e+37 }
 0x942   :  { %v2764_v43 = vor.u32 1.1754944e-38, %v2763_v10  ;;  %vm2762_vm8 = vcmp.eq.f32.partialorder %v2761_v37, 8.507059e+37 }
 0x943   :  { %v3268_v0 = vpop.eup %3267 }
 0x944   :  { %v2771_v36 = vadd.f32 1.0, %v3268_v0  ;;  %v6382_v0 = vld [vmem:[#allocation20_spill] sm:$0xff] }
 0x945   :  { %v3270_v14 = vpop.eup %3269  ;;  %v1701_v12 = vadd.f32 %v6382_v0, %v6373_v20 }
 0x946   :  { %v3272_v28 = vpop.eup %3271  ;;  %v2738_v32 = vmul.f32 %v3270_v14, %v2735_v49  ;;  %3273 = vrcp.f32 %v2771_v36  ;;  %vm2743_vm1 = vweird.f32 %v3270_v14  ;;  %v2783_v22 = vand.u32 2147483648, %v2771_v36 }
 0x947   :  { %v2753_v24 = vmul.f32 %v3272_v28, %v2736_v63  ;;  %3275 = vtanh.f32 %v2727_v15  ;;  %vm2758_vm2 = vweird.f32 %v3272_v28  ;;  %vm2744_vm5 = vmor %vm2742_vm3, %vm2743_vm1  ;;  %vm2777_vm10 = vweird.f32 %v2771_v36 }
 0x948   :  { %v2739_v44 = vsub.f32 1.0, %v2738_v32  ;;  %vm2759_vm6 = vmor %vm2757_vm4, %vm2758_vm2  ;;  %v2781_v47 = vand.u32 2147483647, %v2771_v36  ;;  %v2784_v42 = vor.u32 1.1754944e-38, %v2783_v22 }
 0x949   :  { %v2754_v45 = vsub.f32 1.0, %v2753_v24 }
 0x94a   :  { %v2740_v7 = vmul.f32 %v3270_v14, %v2739_v44  ;;  %vm2782_vm12 = vcmp.eq.f32.partialorder %v2781_v47, 8.507059e+37 }
 0x94b   :  { %v2755_v51 = vmul.f32 %v3272_v28, %v2754_v45 }
 0x94c   :  { %v3274_v8 = vpop.eup %3273  ;;  %v2741_v53 = vadd.f32 %v3270_v14, %v2740_v7 }
 0x94d   :  { %v2756_v58 = vadd.f32 %v3272_v28, %v2755_v51  ;;  %v2773_v25 = vmul.f32 %v3274_v8, %v2771_v36  ;;  %v3276_v9 = vpop.eup %3275  ;;  %vm2778_vm9 = vweird.f32 %v3274_v8 }
 0x94e   :  { %v2745_v4 = vsel %vm2744_vm5, %v3270_v14, %v2741_v53  ;;  %vm2779_vm11 = vmor %vm2777_vm10, %vm2778_vm9 }
 0x94f   :  { %v2750_v48 = vsel %vm2747_vm7, %v2749_v1, %v2745_v4  ;;  %v2760_v40 = vsel %vm2759_vm6, %v3272_v28, %v2756_v58  ;;  %v2774_v54 = vsub.f32 1.0, %v2773_v25 }
 0x950   :  { %v2765_v13 = vsel %vm2762_vm8, %v2764_v43, %v2760_v40  ;;  %v2788_v11 = vmul.f32 %v3276_v9, %v2750_v48 }
 0x951   :  { %v2787_v52 = vmul.f32 %v2765_v13, %v5649_v41  ;;  %v2775_v50 = vmul.f32 %v3274_v8, %v2774_v54  ;;  %v6379_v41 = vld [vmem:[#allocation57_spill] sm:$0xff] }
 0x952   :  { %v1619_v29 = vadd.f32 %v6379_v41, %v6367_v55 }
 0x953   :  { %v5661_v56 = vadd.f32 %v2788_v11, %v2787_v52  ;;  %v2776_v27 = vadd.f32 %v3274_v8, %v2775_v50 }
 0x955   :  { %3277 = vtanh.f32 %v5661_v56  ;;  %v2780_v26 = vsel %vm2779_vm11, %v3274_v8, %v2776_v27 }
 0x956   :  { %v2785_v39 = vsel %vm2782_vm12, %v2784_v42, %v2780_v26 }
 0x95b   :  { %v3278_v61 = vpop.eup %3277 }
 0x95c   :  { %v2791_v46 = vmul.f32 %v3278_v61, %v2785_v39 }
 0x95e   :  { %2812 = vmatmul.f32.vlgmr.msrb.gmra.mxu0 %v2791_v46  ;;  %2832 = vmatmul.f32.vlgmr.msrb.gmra.mxu1 %v2791_v46 }
 0x95f   :  { %2852 = vmatmul.f32.vlgmr.msrb.gmra.mxu2 %v2791_v46  ;;  %2872 = vmatmul.f32.vlgmr.msrb.gmra.mxu3 %v2791_v46 }
 0x9db   :  { %v2813_v33 = vpop.f32.mrf.mxu0  ;;  %v2833_v57 = vpop.f32.mrf.mxu1 }
 0x9dc   :  { %v2876_v31 = vadd.f32 %v2813_v33, %v1619_v29  ;;  %v2877_v62 = vadd.f32 %v2833_v57, %v1660_v38 }
 0x9de   :  { %v3039_v59 = vmul.f32 -1.442695, %v2876_v31  ;;  %v3040_v23 = vmul.f32 -1.442695, %v2877_v62 }
 0x9e0   :  { %3279 = vpow2.f32 %v3039_v59 }
 0x9e1   :  { %3281 = vpow2.f32 %v3040_v23 }
 0x9e2   :  { %v2873_v35 = vpop.f32.mrf.mxu3  ;;  %v2853_v19 = vpop.f32.mrf.mxu2 }
 0x9e3   :  { %v2879_v21 = vadd.f32 %v2873_v35, %v1742_v6  ;;  %v2878_v14 = vadd.f32 %v2853_v19, %v1701_v12 }
 0x9e5   :  { %v3041_v16 = vmul.f32 -1.442695, %v2879_v21 }
 0x9e6   :  { %v3280_v2 = vpop.eup %3279 }
 0x9e7   :  { %v3282_v49 = vpop.eup %3281  ;;  %v2886_v55 = vadd.f32 1.0, %v3280_v2  ;;  %3283 = vpow2.f32 %v3041_v16 }
 0x9e8   :  { %v2887_v63 = vadd.f32 1.0, %v3282_v49 }
 0x9e9   :  { %3285 = vrcp.f32 %v2886_v55  ;;  %v2899_v44 = vand.u32 2147483648, %v2886_v55  ;;  %v2897_v10 = vand.u32 2147483647, %v2886_v55  ;;  %vm2893_vm15 = vweird.f32 %v2886_v55 }
 0x9ea   :  { %3287 = vrcp.f32 %v2887_v63  ;;  %v2914_v45 = vand.u32 2147483648, %v2887_v63  ;;  %v2912_v3 = vand.u32 2147483647, %v2887_v63  ;;  %vm2908_vm0 = vweird.f32 %v2887_v63 }
 0x9eb   :  { %v2900_v37 = vor.u32 1.1754944e-38, %v2899_v44  ;;  %vm2898_vm3 = vcmp.eq.f32.partialorder %v2897_v10, 8.507059e+37 }
 0x9ec   :  { %v2915_v1 = vor.u32 1.1754944e-38, %v2914_v45  ;;  %vm2913_vm4 = vcmp.eq.f32.partialorder %v2912_v3, 8.507059e+37 }
 0x9ed   :  { %v3284_v17 = vpop.eup %3283 }
 0x9ee   :  { %v2922_v5 = vadd.f32 1.0, %v3284_v17 }
 0x9ef   :  { %v3286_v36 = vpop.eup %3285 }
 0x9f0   :  { %v3288_v60 = vpop.eup %3287  ;;  %v2889_v15 = vmul.f32 %v3286_v36, %v2886_v55  ;;  %3289 = vrcp.f32 %v2922_v5  ;;  %vm2894_vm13 = vweird.f32 %v3286_v36  ;;  %v2934_v50 = vand.u32 2147483648, %v2922_v5 }
 0x9f1   :  { %v2904_v28 = vmul.f32 %v3288_v60, %v2887_v63  ;;  %3291 = vtanh.f32 %v2878_v14  ;;  %vm2909_vm14 = vweird.f32 %v3288_v60  ;;  %vm2895_vm1 = vmor %vm2893_vm15, %vm2894_vm13  ;;  %vm2928_vm6 = vweird.f32 %v2922_v5 }
 0x9f2   :  { %v2890_v32 = vsub.f32 1.0, %v2889_v15  ;;  %vm2910_vm2 = vmor %vm2908_vm0, %vm2909_vm14  ;;  %v2932_v27 = vand.u32 2147483647, %v2922_v5  ;;  %v2935_v47 = vor.u32 1.1754944e-38, %v2934_v50 }
 0x9f3   :  { %v2905_v24 = vsub.f32 1.0, %v2904_v28 }
 0x9f4   :  { %v2891_v30 = vmul.f32 %v3286_v36, %v2890_v32  ;;  %vm2933_vm8 = vcmp.eq.f32.partialorder %v2932_v27, 8.507059e+37 }
 0x9f5   :  { %v2906_v7 = vmul.f32 %v3288_v60, %v2905_v24 }
 0x9f6   :  { %v3290_v51 = vpop.eup %3289  ;;  %v2892_v20 = vadd.f32 %v3286_v36, %v2891_v30 }
 0x9f7   :  { %v2907_v8 = vadd.f32 %v3288_v60, %v2906_v7  ;;  %v2924_v53 = vmul.f32 %v3290_v51, %v2922_v5  ;;  %v3292_v25 = vpop.eup %3291  ;;  %vm2929_vm5 = vweird.f32 %v3290_v51 }
 0x9f8   :  { %v2896_v58 = vsel %vm2895_vm1, %v3286_v36, %v2892_v20  ;;  %vm2930_vm7 = vmor %vm2928_vm6, %vm2929_vm5 }
 0x9f9   :  { %v2901_v43 = vsel %vm2898_vm3, %v2900_v37, %v2896_v58  ;;  %v2911_v4 = vsel %vm2910_vm2, %v3288_v60, %v2907_v8  ;;  %v2925_v9 = vsub.f32 1.0, %v2924_v53 }
 0x9fa   :  { %v2916_v48 = vsel %vm2913_vm4, %v2915_v1, %v2911_v4  ;;  %v2939_v40 = vmul.f32 %v3292_v25, %v2901_v43 }
 0x9fb   :  { %v2938_v54 = vmul.f32 %v2916_v48, %v5661_v56  ;;  %v2926_v13 = vmul.f32 %v3290_v51, %v2925_v9 }
 0x9fd   :  { %v2940_v11 = vadd.f32 %v2939_v40, %v2938_v54  ;;  %v2927_v52 = vadd.f32 %v3290_v51, %v2926_v13 }
 0x9ff   :  { %3293 = vtanh.f32 %v2940_v11  ;;  %3043 = vst [vmem:[%s5685_s6 + $0x8] sm:$0xff] %v2940_v11  ;;  %v2931_v22 = vsel %vm2930_vm7, %v3290_v51, %v2927_v52 }
 0xa00   :  { %v2936_v42 = vsel %vm2933_vm8, %v2935_v47, %v2931_v22 }
 0xa05   :  { %v3294_v26 = vpop.eup %3293 }
 0xa06   :  { %v2942_v61 = vmul.f32 %v3294_v26, %v2936_v42 }
 0xa08   :  { %3042 = vst [vmem:[%s5684_s5 + $0x8] sm:$0xff] %v2942_v61 }
 0xa09   :  { %2955 = vsyncpa [#allocation5], 1 }

</bundles_post_ra>
